<compile_context>
chip_gen: v7x
topology: tpu7x:2x2x1
jax: 0.10.0
libtpu: 0.0.40
codegen_flags: <defaults>
</compile_context>

<pallas_src>
import functools

import jax
import jax.numpy as jnp
from jax import lax
from jax.experimental import pallas as pl
from jax.experimental.pallas import tpu as pltpu

KSIZE = 7
PAD = (KSIZE - 1) // 2
BN_EPS = 1e-5
MAX_UNROLL = 16


def _block_off(i, cb):
    """Block offset; annotate alignment only when the index is traced."""
    if isinstance(i, int):
        return i * cb
    return pl.multiple_of(i * cb, cb)


def _for_blocks(n, body, init):
    """body(i, carry) -> carry over i in range(n). Static unroll if short."""
    if n <= MAX_UNROLL:
        carry = init
        for i in range(n):
            carry = body(i, carry)
        return carry
    return lax.fori_loop(0, n, body, init)


def cbam_kernel(x_ref, w1_ref, b1_ref, w2_ref, b2_ref, hh_ref, ww_ref,
                convw_ref, bn_ref, o_ref, avg_ref, mx_ref, cs_ref,
                *, H, W, CB):
    """One batch element per grid step.

    x_ref     : (1, C, H*W) VMEM  -- lane axis is H*W (lane-dense).
    w1_ref    : (hid, C)    VMEM  -- Linear #1 weight (PyTorch (out, in)).
    b1_ref    : (hid, 1)    VMEM
    w2_ref    : (C, hid)    VMEM  -- Linear #2 weight (PyTorch (out, in)).
    b2_ref    : (C, 1)      VMEM
    hh_ref    : (1, H*W)    VMEM  int32, flat index // W  (row index).
    ww_ref    : (1, H*W)    VMEM  int32, flat index %  W  (col index).
    convw_ref : (98,)       SMEM  -- 7x7x2 conv weights, index c*49 + ky*7 + kx.
    bn_ref    : (2,)        SMEM  -- folded eval-mode BN [scale, bias].
    o_ref     : (1, C, H*W) VMEM
    avg_ref   : (C, 1) VMEM f32 scratch -- HW-avg pool per channel.
    mx_ref    : (C, 1) VMEM f32 scratch -- HW-max pool per channel.
    cs_ref    : (C, 1) VMEM f32 scratch -- channel attention scale.
    """
    C = x_ref.shape[1]
    HW = x_ref.shape[2]
    n_cb = C // CB
    inv_hw = 1.0 / float(HW)
    inv_c = 1.0 / float(C)

    # ---------- Phase 1: fused avg+max pooling over HW (single slab read) ----
    def pool_body(i, carry):
        off = _block_off(i, CB)
        blk = x_ref[0, pl.ds(off, CB), :].astype(jnp.float32)        # (CB, HW)
        avg_ref[pl.ds(off, CB), :] = jnp.sum(blk, axis=1, keepdims=True) * inv_hw
        mx_ref[pl.ds(off, CB), :] = jnp.max(blk, axis=1, keepdims=True)
        return carry

    _for_blocks(n_cb, pool_body, 0)

    # ---------- Phase 2: shared MLP on both pooled columns -> c_scale --------
    pooled = jnp.concatenate([avg_ref[...], mx_ref[...]], axis=1)     # (C, 2)
    h = jnp.dot(w1_ref[...], pooled,
                preferred_element_type=jnp.float32) + b1_ref[...]     # (hid, 2)
    h = jnp.maximum(h, 0.0)
    att = jnp.dot(w2_ref[...], h,
                  preferred_element_type=jnp.float32) + b2_ref[...]   # (C, 2)
    c_scale = jax.nn.sigmoid(att[:, 0:1] + att[:, 1:2])               # (C, 1)
    cs_ref[...] = c_scale

    # ---------- Phase 3: ChannelPool of x*c_scale without materializing x1 ---
    def cpool_body(i, carry):
        sum_acc, max_acc = carry
        off = _block_off(i, CB)
        blk = x_ref[0, pl.ds(off, CB), :].astype(jnp.float32)         # (CB, HW)
        y = blk * cs_ref[pl.ds(off, CB), :]
        return sum_acc + y, jnp.maximum(max_acc, y)

    sum0 = jnp.zeros((CB, HW), jnp.float32)
    max0 = jnp.full((CB, HW), -jnp.inf, jnp.float32)
    sum_acc, max_acc = _for_blocks(n_cb, cpool_body, (sum0, max0))
    cmean = jnp.sum(sum_acc, axis=0, keepdims=True) * inv_c           # (1, HW)
    cmax = jnp.max(max_acc, axis=0, keepdims=True)                    # (1, HW)

    # ---------- Phase 4: 7x7 conv on flat planes via lane rolls + masks ------
    hh = hh_ref[...]                                                  # (1, HW)
    ww = ww_ref[...]
    row_ok = {}
    col_ok = {}
    for d in range(-PAD, PAD + 1):
        row_ok[d] = (hh >= -d) & (hh < H - d)
        col_ok[d] = (ww >= -d) & (ww < W - d)

    # ChannelPool order from PyTorch: channel 0 = max, channel 1 = mean.
    acc = [jnp.zeros((1, HW), jnp.float32) for _ in range(4)]
    for ky in range(KSIZE):
        dy = ky - PAD
        for kx in range(KSIZE):
            dx = kx - PAD
            shift = (-(dy * W + dx)) % HW
            mask = row_ok[dy] & col_ok[dx]
            wa = convw_ref[ky * KSIZE + kx]                    # max-plane tap
            wb = convw_ref[KSIZE * KSIZE + ky * KSIZE + kx]    # mean-plane tap
            ra = cmax if shift == 0 else pltpu.roll(cmax, shift, 1)
            rb = cmean if shift == 0 else pltpu.roll(cmean, shift, 1)
            contrib = ra * wa + rb * wb
            idx = (ky & 1) * 2 + (kx & 1)
            acc[idx] = acc[idx] + jnp.where(mask, contrib, 0.0)
    conv = (acc[0] + acc[1]) + (acc[2] + acc[3])                      # (1, HW)

    # Folded eval-mode BatchNorm + sigmoid.
    s_flat = jax.nn.sigmoid(conv * bn_ref[0] + bn_ref[1])             # (1, HW)

    # ---------- Phase 5: fused final store  o = x * c_scale * s_flat ---------
    def store_body(i, carry):
        off = _block_off(i, CB)
        blk = x_ref[0, pl.ds(off, CB), :].astype(jnp.float32)
        o_ref[0, pl.ds(off, CB), :] = (
            blk * cs_ref[pl.ds(off, CB), :] * s_flat).astype(o_ref.dtype)
        return carry

    _for_blocks(n_cb, store_body, 0)


def cbam_pallas(x_nchw, w1, b1, w2, b2, convw, bnp):
    """CBAM forward.  x_nchw: (B, C, H, W).  Returns (B, C, H, W).

    w1: (hid, C), b1: (hid, 1), w2: (C, hid), b2: (C, 1)  (PyTorch Linear layout)
    convw: (2, 7, 7) conv weight (out=1, in=2, no bias)
    bnp:   (4,) = [gamma, beta, running_mean, running_var]  (eval-mode BN)
    """
    B, C, H, W = x_nchw.shape
    HW = H * W
    hid = w1.shape[0]

    # Free contiguous reshape (no transpose): lane axis becomes H*W.
    x_flat = x_nchw.reshape(B, C, HW)

    convw_flat = convw.reshape(-1).astype(jnp.float32)                # (98,)
    gamma, beta, rm, rv = bnp[0], bnp[1], bnp[2], bnp[3]
    bn_scale = gamma / jnp.sqrt(rv + BN_EPS)
    bn_fold = jnp.stack([bn_scale, beta - rm * bn_scale]).astype(jnp.float32)

    # Host-built row/col index planes for the conv edge masks (avoids in-kernel
    # vector integer div/mod).
    flat = jnp.arange(HW, dtype=jnp.int32)
    hh = (flat // W).reshape(1, HW)
    ww = (flat % W).reshape(1, HW)

    # Channel sub-block (sublane) granularity for the chunked slab passes.
    CB = next(cb for cb in (8, 4, 2, 1) if C % cb == 0)

    kernel = functools.partial(cbam_kernel, H=H, W=W, CB=CB)

    itemsize = jnp.dtype(x_nchw.dtype).itemsize
    vmem_bytes = 2 * 2 * C * HW * itemsize + (8 << 20)   # in+out, double-buffered
    vmem_limit = int(min(100 << 20, max(vmem_bytes, 16 << 20)))

    out_flat = pl.pallas_call(
        kernel,
        out_shape=jax.ShapeDtypeStruct((B, C, HW), x_nchw.dtype),
        grid=(B,),
        in_specs=[
            pl.BlockSpec((1, C, HW), lambda b: (b, 0, 0)),
            pl.BlockSpec((hid, C), lambda b: (0, 0)),
            pl.BlockSpec((hid, 1), lambda b: (0, 0)),
            pl.BlockSpec((C, hid), lambda b: (0, 0)),
            pl.BlockSpec((C, 1), lambda b: (0, 0)),
            pl.BlockSpec((1, HW), lambda b: (0, 0)),                # hh
            pl.BlockSpec((1, HW), lambda b: (0, 0)),                # ww
            pl.BlockSpec(memory_space=pltpu.MemorySpace.SMEM),      # convw (98,)
            pl.BlockSpec(memory_space=pltpu.MemorySpace.SMEM),      # bn_fold (2,)
        ],
        out_specs=pl.BlockSpec((1, C, HW), lambda b: (b, 0, 0)),
        scratch_shapes=[
            pltpu.VMEM((C, 1), jnp.float32),   # avg pool
            pltpu.VMEM((C, 1), jnp.float32),   # max pool
            pltpu.VMEM((C, 1), jnp.float32),   # channel attention scale
        ],
        compiler_params=pltpu.CompilerParams(
            dimension_semantics=("parallel",),
            vmem_limit_bytes=vmem_limit),
    )(x_flat, w1, b1, w2, b2, hh, ww, convw_flat, bn_fold)

    return out_flat.reshape(B, C, H, W)


def cbam_reference(x, w1, b1, w2, b2, convw, bnp):
    """Pure-JAX NCHW reference mirroring the PyTorch forward (eval-mode BN)."""
    def mlp(p):  # p: (B, C); PyTorch Linear: y = p @ W.T + b
        return jnp.maximum(p @ w1.T + b1[:, 0], 0.0) @ w2.T + b2[:, 0]

    avg = x.mean(axis=(2, 3))
    mx = x.max(axis=(2, 3))
    c_scale = jax.nn.sigmoid(mlp(avg) + mlp(mx))[:, :, None, None]
    x1 = x * c_scale

    comp = jnp.concatenate(
        [x1.max(axis=1, keepdims=True), x1.mean(axis=1, keepdims=True)], axis=1)
    kw = convw.reshape(1, 2, KSIZE, KSIZE)
    conv = lax.conv_general_dilated(
        comp, kw, window_strides=(1, 1), padding=((PAD, PAD), (PAD, PAD)),
        dimension_numbers=("NCHW", "OIHW", "NCHW"))
    gamma, beta, rm, rv = bnp[0], bnp[1], bnp[2], bnp[3]
    bn = (conv - rm) * gamma / jnp.sqrt(rv + BN_EPS) + beta
    return x1 * jax.nn.sigmoid(bn)


if __name__ == "__main__":
    # gate_channels must be >= reduction_ratio (16) so the hidden dim is >= 1.
    B, C, H, W = 2, 32, 16, 16
    reduction_ratio = 16
    hid = C // reduction_ratio

    key = jax.random.PRNGKey(0)
    kx, k1, k2, k3, k4, k5, k6, k7 = jax.random.split(key, 8)

    x = jax.random.normal(kx, (B, C, H, W), dtype=jnp.float32)

    # ChannelGate MLP params in PyTorch Linear layout (out, in); column biases.
    w1 = 0.2 * jax.random.normal(k1, (hid, C), dtype=jnp.float32)
    b1 = 0.1 * jax.random.normal(k2, (hid, 1), dtype=jnp.float32)
    w2 = 0.2 * jax.random.normal(k3, (C, hid), dtype=jnp.float32)
    b2 = 0.1 * jax.random.normal(k4, (C, 1), dtype=jnp.float32)

    # SpatialGate: 7x7 conv (out=1, in=2, no bias).
    convw = 0.1 * jax.random.normal(k5, (2, KSIZE, KSIZE), dtype=jnp.float32)

    # BatchNorm (eval mode): gamma, beta, running_mean, running_var.
    gamma = 1.0 + 0.1 * jax.random.normal(k6, (), dtype=jnp.float32)
    beta = 0.1 * jax.random.normal(k7, (), dtype=jnp.float32)
    bnp = jnp.stack([gamma, beta, jnp.zeros(()), jnp.ones(())]).astype(jnp.float32)

    out = cbam_pallas(x, w1, b1, w2, b2, convw, bnp)
    out = jax.block_until_ready(out)

    ref = cbam_reference(x, w1, b1, w2, b2, convw, bnp)
    assert out.shape == (B, C, H, W)
    err = float(jnp.max(jnp.abs(out - ref)))
    assert jnp.allclose(out, ref, atol=1e-3, rtol=1e-3), err
    print("KERNEL_OK")
</pallas_src>

<mosaic_0001>
module attributes {stable_mosaic.version = 11 : i64} {
  func.func @cbam_kernel(%arg0: i32, %arg1: memref<1x32x256xf32, #tpu.memory_space<vmem>>, %arg2: memref<2x32xf32, #tpu.memory_space<vmem>>, %arg3: memref<2x1xf32, #tpu.memory_space<vmem>>, %arg4: memref<32x2xf32, #tpu.memory_space<vmem>>, %arg5: memref<32x1xf32, #tpu.memory_space<vmem>>, %arg6: memref<1x256xi32, #tpu.memory_space<vmem>>, %arg7: memref<1x256xi32, #tpu.memory_space<vmem>>, %arg8: memref<98xf32, #tpu.memory_space<smem>>, %arg9: memref<2xf32, #tpu.memory_space<smem>>, %arg10: memref<1x32x256xf32, #tpu.memory_space<vmem>>, %arg11: memref<32x1xf32, #tpu.memory_space<vmem>>, %arg12: memref<32x1xf32, #tpu.memory_space<vmem>>, %arg13: memref<32x1xf32, #tpu.memory_space<vmem>>) attributes {dimension_semantics = [#tpu.dimension_semantics<parallel>], iteration_bounds = array<i64: 2>, scalar_prefetch = 0 : i64, scratch_operands = 3 : i64, tpu.core_type = #tpu.core_type<tc>, window_params = [{transform_indices = @transform_0, window_bounds = array<i64: 1, 32, 256>}, {pipeline_mode = #tpu.pipeline_mode<synchronous>, transform_indices = @transform_1, window_bounds = array<i64: 2, 32>}, {pipeline_mode = #tpu.pipeline_mode<synchronous>, transform_indices = @transform_2, window_bounds = array<i64: 2, 1>}, {pipeline_mode = #tpu.pipeline_mode<synchronous>, transform_indices = @transform_3, window_bounds = array<i64: 32, 2>}, {pipeline_mode = #tpu.pipeline_mode<synchronous>, transform_indices = @transform_4, window_bounds = array<i64: 32, 1>}, {pipeline_mode = #tpu.pipeline_mode<synchronous>, transform_indices = @transform_5, window_bounds = array<i64: 1, 256>}, {pipeline_mode = #tpu.pipeline_mode<synchronous>, transform_indices = @transform_6, window_bounds = array<i64: 1, 256>}, {transform_indices = @transform_7, window_bounds = array<i64: 98>}, {transform_indices = @transform_8, window_bounds = array<i64: 2>}, {transform_indices = @transform_9, window_bounds = array<i64: 1, 32, 256>}]} {
    %c0 = arith.constant 0 : index
    %c0_0 = arith.constant 0 : index
    %c0_1 = arith.constant 0 : index
    %0 = vector.load %arg1[%c0, %c0_0, %c0_1] : memref<1x32x256xf32, #tpu.memory_space<vmem>>, vector<1x8x256xf32>
    %1 = vector.shape_cast %0 : vector<1x8x256xf32> to vector<8x256xf32>
    %cst = arith.constant dense<0.000000e+00> : vector<8xf32>
    %2 = vector.multi_reduction <add>, %1, %cst [1] : vector<8x256xf32> to vector<8xf32>
    %3 = vector.shape_cast %2 : vector<8xf32> to vector<8x1xf32>
    %cst_2 = arith.constant 3.906250e-03 : f32
    %4 = vector.broadcast %cst_2 : f32 to vector<8x1xf32>
    %5 = arith.mulf %3, %4 : vector<8x1xf32>
    %c0_3 = arith.constant 0 : index
    %c0_4 = arith.constant 0 : index
    %6 = vector.load %arg11[%c0_3, %c0_4] : memref<32x1xf32, #tpu.memory_space<vmem>>, vector<8x1xf32>
    tpu.vector_store %arg11[%c0_3, %c0_4], %5 {strides = array<i32>} : memref<32x1xf32, #tpu.memory_space<vmem>>, vector<8x1xf32>,
    %cst_5 = arith.constant dense<0xFF800000> : vector<8xf32>
    %7 = vector.multi_reduction <maximumf>, %1, %cst_5 [1] : vector<8x256xf32> to vector<8xf32>
    %8 = vector.shape_cast %7 : vector<8xf32> to vector<8x1xf32>
    %c0_6 = arith.constant 0 : index
    %c0_7 = arith.constant 0 : index
    %9 = vector.load %arg12[%c0_6, %c0_7] : memref<32x1xf32, #tpu.memory_space<vmem>>, vector<8x1xf32>
    tpu.vector_store %arg12[%c0_6, %c0_7], %8 {strides = array<i32>} : memref<32x1xf32, #tpu.memory_space<vmem>>, vector<8x1xf32>,
    %c0_8 = arith.constant 0 : index
    %c8 = arith.constant 8 : index
    %c0_9 = arith.constant 0 : index
    %10 = vector.load %arg1[%c0_8, %c8, %c0_9] : memref<1x32x256xf32, #tpu.memory_space<vmem>>, vector<1x8x256xf32>
    %11 = vector.shape_cast %10 : vector<1x8x256xf32> to vector<8x256xf32>
    %cst_10 = arith.constant dense<0.000000e+00> : vector<8xf32>
    %12 = vector.multi_reduction <add>, %11, %cst_10 [1] : vector<8x256xf32> to vector<8xf32>
    %13 = vector.shape_cast %12 : vector<8xf32> to vector<8x1xf32>
    %cst_11 = arith.constant 3.906250e-03 : f32
    %14 = vector.broadcast %cst_11 : f32 to vector<8x1xf32>
    %15 = arith.mulf %13, %14 : vector<8x1xf32>
    %c8_12 = arith.constant 8 : index
    %c0_13 = arith.constant 0 : index
    %16 = vector.load %arg11[%c8_12, %c0_13] : memref<32x1xf32, #tpu.memory_space<vmem>>, vector<8x1xf32>
    tpu.vector_store %arg11[%c8_12, %c0_13], %15 {strides = array<i32>} : memref<32x1xf32, #tpu.memory_space<vmem>>, vector<8x1xf32>,
    %cst_14 = arith.constant dense<0xFF800000> : vector<8xf32>
    %17 = vector.multi_reduction <maximumf>, %11, %cst_14 [1] : vector<8x256xf32> to vector<8xf32>
    %18 = vector.shape_cast %17 : vector<8xf32> to vector<8x1xf32>
    %c8_15 = arith.constant 8 : index
    %c0_16 = arith.constant 0 : index
    %19 = vector.load %arg12[%c8_15, %c0_16] : memref<32x1xf32, #tpu.memory_space<vmem>>, vector<8x1xf32>
    tpu.vector_store %arg12[%c8_15, %c0_16], %18 {strides = array<i32>} : memref<32x1xf32, #tpu.memory_space<vmem>>, vector<8x1xf32>,
    %c0_17 = arith.constant 0 : index
    %c16 = arith.constant 16 : index
    %c0_18 = arith.constant 0 : index
    %20 = vector.load %arg1[%c0_17, %c16, %c0_18] : memref<1x32x256xf32, #tpu.memory_space<vmem>>, vector<1x8x256xf32>
    %21 = vector.shape_cast %20 : vector<1x8x256xf32> to vector<8x256xf32>
    %cst_19 = arith.constant dense<0.000000e+00> : vector<8xf32>
    %22 = vector.multi_reduction <add>, %21, %cst_19 [1] : vector<8x256xf32> to vector<8xf32>
    %23 = vector.shape_cast %22 : vector<8xf32> to vector<8x1xf32>
    %cst_20 = arith.constant 3.906250e-03 : f32
    %24 = vector.broadcast %cst_20 : f32 to vector<8x1xf32>
    %25 = arith.mulf %23, %24 : vector<8x1xf32>
    %c16_21 = arith.constant 16 : index
    %c0_22 = arith.constant 0 : index
    %26 = vector.load %arg11[%c16_21, %c0_22] : memref<32x1xf32, #tpu.memory_space<vmem>>, vector<8x1xf32>
    tpu.vector_store %arg11[%c16_21, %c0_22], %25 {strides = array<i32>} : memref<32x1xf32, #tpu.memory_space<vmem>>, vector<8x1xf32>,
    %cst_23 = arith.constant dense<0xFF800000> : vector<8xf32>
    %27 = vector.multi_reduction <maximumf>, %21, %cst_23 [1] : vector<8x256xf32> to vector<8xf32>
    %28 = vector.shape_cast %27 : vector<8xf32> to vector<8x1xf32>
    %c16_24 = arith.constant 16 : index
    %c0_25 = arith.constant 0 : index
    %29 = vector.load %arg12[%c16_24, %c0_25] : memref<32x1xf32, #tpu.memory_space<vmem>>, vector<8x1xf32>
    tpu.vector_store %arg12[%c16_24, %c0_25], %28 {strides = array<i32>} : memref<32x1xf32, #tpu.memory_space<vmem>>, vector<8x1xf32>,
    %c0_26 = arith.constant 0 : index
    %c24 = arith.constant 24 : index
    %c0_27 = arith.constant 0 : index
    %30 = vector.load %arg1[%c0_26, %c24, %c0_27] : memref<1x32x256xf32, #tpu.memory_space<vmem>>, vector<1x8x256xf32>
    %31 = vector.shape_cast %30 : vector<1x8x256xf32> to vector<8x256xf32>
    %cst_28 = arith.constant dense<0.000000e+00> : vector<8xf32>
    %32 = vector.multi_reduction <add>, %31, %cst_28 [1] : vector<8x256xf32> to vector<8xf32>
    %33 = vector.shape_cast %32 : vector<8xf32> to vector<8x1xf32>
    %cst_29 = arith.constant 3.906250e-03 : f32
    %34 = vector.broadcast %cst_29 : f32 to vector<8x1xf32>
    %35 = arith.mulf %33, %34 : vector<8x1xf32>
    %c24_30 = arith.constant 24 : index
    %c0_31 = arith.constant 0 : index
    %36 = vector.load %arg11[%c24_30, %c0_31] : memref<32x1xf32, #tpu.memory_space<vmem>>, vector<8x1xf32>
    tpu.vector_store %arg11[%c24_30, %c0_31], %35 {strides = array<i32>} : memref<32x1xf32, #tpu.memory_space<vmem>>, vector<8x1xf32>,
    %cst_32 = arith.constant dense<0xFF800000> : vector<8xf32>
    %37 = vector.multi_reduction <maximumf>, %31, %cst_32 [1] : vector<8x256xf32> to vector<8xf32>
    %38 = vector.shape_cast %37 : vector<8xf32> to vector<8x1xf32>
    %c24_33 = arith.constant 24 : index
    %c0_34 = arith.constant 0 : index
    %39 = vector.load %arg12[%c24_33, %c0_34] : memref<32x1xf32, #tpu.memory_space<vmem>>, vector<8x1xf32>
    tpu.vector_store %arg12[%c24_33, %c0_34], %38 {strides = array<i32>} : memref<32x1xf32, #tpu.memory_space<vmem>>, vector<8x1xf32>,
    %c0_35 = arith.constant 0 : index
    %c0_36 = arith.constant 0 : index
    %40 = vector.load %arg11[%c0_35, %c0_36] : memref<32x1xf32, #tpu.memory_space<vmem>>, vector<32x1xf32>
    %c0_37 = arith.constant 0 : index
    %c0_38 = arith.constant 0 : index
    %41 = vector.load %arg12[%c0_37, %c0_38] : memref<32x1xf32, #tpu.memory_space<vmem>>, vector<32x1xf32>
    %42 = tpu.concatenate %40, %41 in 1 : vector<32x1xf32>, vector<32x1xf32> -> vector<32x2xf32>
    %c0_39 = arith.constant 0 : index
    %c0_40 = arith.constant 0 : index
    %43 = vector.load %arg2[%c0_39, %c0_40] : memref<2x32xf32, #tpu.memory_space<vmem>>, vector<2x32xf32>
    %cst_41 = arith.constant dense<0.000000e+00> : vector<2x2xf32>
    %44 = tpu.matmul %43, %42, %cst_41 {dimension_numbers = #tpu.dot_dimension_numbers<[1], [0], [0], [1], [0, 0, 1, 1], [], []>} : vector<2x32xf32>, vector<32x2xf32>, vector<2x2xf32> -> vector<2x2xf32>
    %c0_42 = arith.constant 0 : index
    %c0_43 = arith.constant 0 : index
    %45 = vector.load %arg3[%c0_42, %c0_43] : memref<2x1xf32, #tpu.memory_space<vmem>>, vector<2x1xf32>
    %46 = vector.broadcast %45 : vector<2x1xf32> to vector<2x2xf32>
    %47 = arith.addf %44, %46 : vector<2x2xf32>
    %cst_44 = arith.constant 0.000000e+00 : f32
    %48 = vector.broadcast %cst_44 : f32 to vector<2x2xf32>
    %49 = arith.maximumf %47, %48 : vector<2x2xf32>
    %c0_45 = arith.constant 0 : index
    %c0_46 = arith.constant 0 : index
    %50 = vector.load %arg4[%c0_45, %c0_46] : memref<32x2xf32, #tpu.memory_space<vmem>>, vector<32x2xf32>
    %cst_47 = arith.constant dense<0.000000e+00> : vector<32x2xf32>
    %51 = tpu.matmul %50, %49, %cst_47 {dimension_numbers = #tpu.dot_dimension_numbers<[1], [0], [0], [1], [0, 0, 1, 1], [], []>} : vector<32x2xf32>, vector<2x2xf32>, vector<32x2xf32> -> vector<32x2xf32>
    %c0_48 = arith.constant 0 : index
    %c0_49 = arith.constant 0 : index
    %52 = vector.load %arg5[%c0_48, %c0_49] : memref<32x1xf32, #tpu.memory_space<vmem>>, vector<32x1xf32>
    %53 = vector.broadcast %52 : vector<32x1xf32> to vector<32x2xf32>
    %54 = arith.addf %51, %53 : vector<32x2xf32>
    %55 = vector.extract_strided_slice %54 {offsets = [0, 0], sizes = [32, 1], strides = [1, 1]} : vector<32x2xf32> to vector<32x1xf32>
    %56 = vector.extract_strided_slice %54 {offsets = [0, 1], sizes = [32, 1], strides = [1, 1]} : vector<32x2xf32> to vector<32x1xf32>
    %57 = arith.addf %55, %56 : vector<32x1xf32>
    %58 = arith.negf %57 : vector<32x1xf32>
    %59 = math.exp %58 : vector<32x1xf32>
    %cst_50 = arith.constant 1.000000e+00 : f32
    %60 = vector.broadcast %cst_50 : f32 to vector<32x1xf32>
    %61 = arith.addf %60, %59 : vector<32x1xf32>
    %62 = arith.divf %60, %61 : vector<32x1xf32>
    %c0_51 = arith.constant 0 : index
    %c0_52 = arith.constant 0 : index
    %63 = vector.load %arg13[%c0_51, %c0_52] : memref<32x1xf32, #tpu.memory_space<vmem>>, vector<32x1xf32>
    tpu.vector_store %arg13[%c0_51, %c0_52], %62 {strides = array<i32>} : memref<32x1xf32, #tpu.memory_space<vmem>>, vector<32x1xf32>,
    %cst_53 = arith.constant 0.000000e+00 : f32
    %64 = vector.broadcast %cst_53 : f32 to vector<8x256xf32>
    %cst_54 = arith.constant 0xFF800000 : f32
    %65 = vector.broadcast %cst_54 : f32 to vector<8x256xf32>
    %c0_55 = arith.constant 0 : index
    %c0_56 = arith.constant 0 : index
    %c0_57 = arith.constant 0 : index
    %66 = vector.load %arg1[%c0_55, %c0_56, %c0_57] : memref<1x32x256xf32, #tpu.memory_space<vmem>>, vector<1x8x256xf32>
    %67 = vector.shape_cast %66 : vector<1x8x256xf32> to vector<8x256xf32>
    %c0_58 = arith.constant 0 : index
    %c0_59 = arith.constant 0 : index
    %68 = vector.load %arg13[%c0_58, %c0_59] : memref<32x1xf32, #tpu.memory_space<vmem>>, vector<8x1xf32>
    %69 = vector.broadcast %68 : vector<8x1xf32> to vector<8x256xf32>
    %70 = arith.mulf %67, %69 : vector<8x256xf32>
    %71 = arith.addf %64, %70 : vector<8x256xf32>
    %72 = arith.maximumf %65, %70 : vector<8x256xf32>
    %c0_60 = arith.constant 0 : index
    %c8_61 = arith.constant 8 : index
    %c0_62 = arith.constant 0 : index
    %73 = vector.load %arg1[%c0_60, %c8_61, %c0_62] : memref<1x32x256xf32, #tpu.memory_space<vmem>>, vector<1x8x256xf32>
    %74 = vector.shape_cast %73 : vector<1x8x256xf32> to vector<8x256xf32>
    %c8_63 = arith.constant 8 : index
    %c0_64 = arith.constant 0 : index
    %75 = vector.load %arg13[%c8_63, %c0_64] : memref<32x1xf32, #tpu.memory_space<vmem>>, vector<8x1xf32>
    %76 = vector.broadcast %75 : vector<8x1xf32> to vector<8x256xf32>
    %77 = arith.mulf %74, %76 : vector<8x256xf32>
    %78 = arith.addf %71, %77 : vector<8x256xf32>
    %79 = arith.maximumf %72, %77 : vector<8x256xf32>
    %c0_65 = arith.constant 0 : index
    %c16_66 = arith.constant 16 : index
    %c0_67 = arith.constant 0 : index
    %80 = vector.load %arg1[%c0_65, %c16_66, %c0_67] : memref<1x32x256xf32, #tpu.memory_space<vmem>>, vector<1x8x256xf32>
    %81 = vector.shape_cast %80 : vector<1x8x256xf32> to vector<8x256xf32>
    %c16_68 = arith.constant 16 : index
    %c0_69 = arith.constant 0 : index
    %82 = vector.load %arg13[%c16_68, %c0_69] : memref<32x1xf32, #tpu.memory_space<vmem>>, vector<8x1xf32>
    %83 = vector.broadcast %82 : vector<8x1xf32> to vector<8x256xf32>
    %84 = arith.mulf %81, %83 : vector<8x256xf32>
    %85 = arith.addf %78, %84 : vector<8x256xf32>
    %86 = arith.maximumf %79, %84 : vector<8x256xf32>
    %c0_70 = arith.constant 0 : index
    %c24_71 = arith.constant 24 : index
    %c0_72 = arith.constant 0 : index
    %87 = vector.load %arg1[%c0_70, %c24_71, %c0_72] : memref<1x32x256xf32, #tpu.memory_space<vmem>>, vector<1x8x256xf32>
    %88 = vector.shape_cast %87 : vector<1x8x256xf32> to vector<8x256xf32>
    %c24_73 = arith.constant 24 : index
    %c0_74 = arith.constant 0 : index
    %89 = vector.load %arg13[%c24_73, %c0_74] : memref<32x1xf32, #tpu.memory_space<vmem>>, vector<8x1xf32>
    %90 = vector.broadcast %89 : vector<8x1xf32> to vector<8x256xf32>
    %91 = arith.mulf %88, %90 : vector<8x256xf32>
    %92 = arith.addf %85, %91 : vector<8x256xf32>
    %93 = arith.maximumf %86, %91 : vector<8x256xf32>
    %cst_75 = arith.constant dense<0.000000e+00> : vector<256xf32>
    %94 = vector.multi_reduction <add>, %92, %cst_75 [0] : vector<8x256xf32> to vector<256xf32>
    %95 = vector.shape_cast %94 : vector<256xf32> to vector<1x256xf32>
    %cst_76 = arith.constant 3.125000e-02 : f32
    %96 = vector.broadcast %cst_76 : f32 to vector<1x256xf32>
    %97 = arith.mulf %95, %96 : vector<1x256xf32>
    %cst_77 = arith.constant dense<0xFF800000> : vector<256xf32>
    %98 = vector.multi_reduction <maximumf>, %93, %cst_77 [0] : vector<8x256xf32> to vector<256xf32>
    %99 = vector.shape_cast %98 : vector<256xf32> to vector<1x256xf32>
    %c0_78 = arith.constant 0 : index
    %c0_79 = arith.constant 0 : index
    %100 = vector.load %arg6[%c0_78, %c0_79] : memref<1x256xi32, #tpu.memory_space<vmem>>, vector<1x256xi32>
    %c0_80 = arith.constant 0 : index
    %c0_81 = arith.constant 0 : index
    %101 = vector.load %arg7[%c0_80, %c0_81] : memref<1x256xi32, #tpu.memory_space<vmem>>, vector<1x256xi32>
    %c3_i32 = arith.constant 3 : i32
    %102 = vector.broadcast %c3_i32 : i32 to vector<1x256xi32>
    %103 = arith.cmpi sge, %100, %102 : vector<1x256xi32>
    %c19_i32 = arith.constant 19 : i32
    %104 = vector.broadcast %c19_i32 : i32 to vector<1x256xi32>
    %105 = arith.cmpi slt, %100, %104 : vector<1x256xi32>
    %106 = arith.andi %103, %105 : vector<1x256xi1>
    %c3_i32_82 = arith.constant 3 : i32
    %107 = vector.broadcast %c3_i32_82 : i32 to vector<1x256xi32>
    %108 = arith.cmpi sge, %101, %107 : vector<1x256xi32>
    %c19_i32_83 = arith.constant 19 : i32
    %109 = vector.broadcast %c19_i32_83 : i32 to vector<1x256xi32>
    %110 = arith.cmpi slt, %101, %109 : vector<1x256xi32>
    %111 = arith.andi %108, %110 : vector<1x256xi1>
    %c2_i32 = arith.constant 2 : i32
    %112 = vector.broadcast %c2_i32 : i32 to vector<1x256xi32>
    %113 = arith.cmpi sge, %100, %112 : vector<1x256xi32>
    %c18_i32 = arith.constant 18 : i32
    %114 = vector.broadcast %c18_i32 : i32 to vector<1x256xi32>
    %115 = arith.cmpi slt, %100, %114 : vector<1x256xi32>
    %116 = arith.andi %113, %115 : vector<1x256xi1>
    %c2_i32_84 = arith.constant 2 : i32
    %117 = vector.broadcast %c2_i32_84 : i32 to vector<1x256xi32>
    %118 = arith.cmpi sge, %101, %117 : vector<1x256xi32>
    %c18_i32_85 = arith.constant 18 : i32
    %119 = vector.broadcast %c18_i32_85 : i32 to vector<1x256xi32>
    %120 = arith.cmpi slt, %101, %119 : vector<1x256xi32>
    %121 = arith.andi %118, %120 : vector<1x256xi1>
    %c1_i32 = arith.constant 1 : i32
    %122 = vector.broadcast %c1_i32 : i32 to vector<1x256xi32>
    %123 = arith.cmpi sge, %100, %122 : vector<1x256xi32>
    %c17_i32 = arith.constant 17 : i32
    %124 = vector.broadcast %c17_i32 : i32 to vector<1x256xi32>
    %125 = arith.cmpi slt, %100, %124 : vector<1x256xi32>
    %126 = arith.andi %123, %125 : vector<1x256xi1>
    %c1_i32_86 = arith.constant 1 : i32
    %127 = vector.broadcast %c1_i32_86 : i32 to vector<1x256xi32>
    %128 = arith.cmpi sge, %101, %127 : vector<1x256xi32>
    %c17_i32_87 = arith.constant 17 : i32
    %129 = vector.broadcast %c17_i32_87 : i32 to vector<1x256xi32>
    %130 = arith.cmpi slt, %101, %129 : vector<1x256xi32>
    %131 = arith.andi %128, %130 : vector<1x256xi1>
    %c0_i32 = arith.constant 0 : i32
    %132 = vector.broadcast %c0_i32 : i32 to vector<1x256xi32>
    %133 = arith.cmpi sge, %100, %132 : vector<1x256xi32>
    %c16_i32 = arith.constant 16 : i32
    %134 = vector.broadcast %c16_i32 : i32 to vector<1x256xi32>
    %135 = arith.cmpi slt, %100, %134 : vector<1x256xi32>
    %136 = arith.andi %133, %135 : vector<1x256xi1>
    %c0_i32_88 = arith.constant 0 : i32
    %137 = vector.broadcast %c0_i32_88 : i32 to vector<1x256xi32>
    %138 = arith.cmpi sge, %101, %137 : vector<1x256xi32>
    %c16_i32_89 = arith.constant 16 : i32
    %139 = vector.broadcast %c16_i32_89 : i32 to vector<1x256xi32>
    %140 = arith.cmpi slt, %101, %139 : vector<1x256xi32>
    %141 = arith.andi %138, %140 : vector<1x256xi1>
    %c-1_i32 = arith.constant -1 : i32
    %142 = vector.broadcast %c-1_i32 : i32 to vector<1x256xi32>
    %143 = arith.cmpi sge, %100, %142 : vector<1x256xi32>
    %c15_i32 = arith.constant 15 : i32
    %144 = vector.broadcast %c15_i32 : i32 to vector<1x256xi32>
    %145 = arith.cmpi slt, %100, %144 : vector<1x256xi32>
    %146 = arith.andi %143, %145 : vector<1x256xi1>
    %c-1_i32_90 = arith.constant -1 : i32
    %147 = vector.broadcast %c-1_i32_90 : i32 to vector<1x256xi32>
    %148 = arith.cmpi sge, %101, %147 : vector<1x256xi32>
    %c15_i32_91 = arith.constant 15 : i32
    %149 = vector.broadcast %c15_i32_91 : i32 to vector<1x256xi32>
    %150 = arith.cmpi slt, %101, %149 : vector<1x256xi32>
    %151 = arith.andi %148, %150 : vector<1x256xi1>
    %c-2_i32 = arith.constant -2 : i32
    %152 = vector.broadcast %c-2_i32 : i32 to vector<1x256xi32>
    %153 = arith.cmpi sge, %100, %152 : vector<1x256xi32>
    %c14_i32 = arith.constant 14 : i32
    %154 = vector.broadcast %c14_i32 : i32 to vector<1x256xi32>
    %155 = arith.cmpi slt, %100, %154 : vector<1x256xi32>
    %156 = arith.andi %153, %155 : vector<1x256xi1>
    %c-2_i32_92 = arith.constant -2 : i32
    %157 = vector.broadcast %c-2_i32_92 : i32 to vector<1x256xi32>
    %158 = arith.cmpi sge, %101, %157 : vector<1x256xi32>
    %c14_i32_93 = arith.constant 14 : i32
    %159 = vector.broadcast %c14_i32_93 : i32 to vector<1x256xi32>
    %160 = arith.cmpi slt, %101, %159 : vector<1x256xi32>
    %161 = arith.andi %158, %160 : vector<1x256xi1>
    %c-3_i32 = arith.constant -3 : i32
    %162 = vector.broadcast %c-3_i32 : i32 to vector<1x256xi32>
    %163 = arith.cmpi sge, %100, %162 : vector<1x256xi32>
    %c13_i32 = arith.constant 13 : i32
    %164 = vector.broadcast %c13_i32 : i32 to vector<1x256xi32>
    %165 = arith.cmpi slt, %100, %164 : vector<1x256xi32>
    %166 = arith.andi %163, %165 : vector<1x256xi1>
    %c-3_i32_94 = arith.constant -3 : i32
    %167 = vector.broadcast %c-3_i32_94 : i32 to vector<1x256xi32>
    %168 = arith.cmpi sge, %101, %167 : vector<1x256xi32>
    %c13_i32_95 = arith.constant 13 : i32
    %169 = vector.broadcast %c13_i32_95 : i32 to vector<1x256xi32>
    %170 = arith.cmpi slt, %101, %169 : vector<1x256xi32>
    %171 = arith.andi %168, %170 : vector<1x256xi1>
    %cst_96 = arith.constant 0.000000e+00 : f32
    %172 = vector.broadcast %cst_96 : f32 to vector<1x256xf32>
    %cst_97 = arith.constant 0.000000e+00 : f32
    %173 = vector.broadcast %cst_97 : f32 to vector<1x256xf32>
    %cst_98 = arith.constant 0.000000e+00 : f32
    %174 = vector.broadcast %cst_98 : f32 to vector<1x256xf32>
    %cst_99 = arith.constant 0.000000e+00 : f32
    %175 = vector.broadcast %cst_99 : f32 to vector<1x256xf32>
    %176 = arith.andi %106, %111 : vector<1x256xi1>
    %c0_100 = arith.constant 0 : index
    %177 = memref.load %arg8[%c0_100] : memref<98xf32, #tpu.memory_space<smem>>
    %c49 = arith.constant 49 : index
    %178 = memref.load %arg8[%c49] : memref<98xf32, #tpu.memory_space<smem>>
    %c51_i32 = arith.constant 51 : i32
    %179 = tpu.dynamic_rotate %99 by %c51_i32 dim 1 : vector<1x256xf32>, i32 -> vector<1x256xf32>
    %c51_i32_101 = arith.constant 51 : i32
    %180 = tpu.dynamic_rotate %97 by %c51_i32_101 dim 1 : vector<1x256xf32>, i32 -> vector<1x256xf32>
    %181 = vector.broadcast %177 : f32 to vector<1x256xf32>
    %182 = arith.mulf %179, %181 : vector<1x256xf32>
    %183 = vector.broadcast %178 : f32 to vector<1x256xf32>
    %184 = arith.mulf %180, %183 : vector<1x256xf32>
    %185 = arith.addf %182, %184 : vector<1x256xf32>
    %cst_102 = arith.constant 0.000000e+00 : f32
    %186 = vector.broadcast %cst_102 : f32 to vector<1x256xf32>
    %187 = arith.select %176, %185, %186 : vector<1x256xi1>, vector<1x256xf32>
    %188 = arith.addf %172, %187 : vector<1x256xf32>
    %189 = arith.andi %106, %121 : vector<1x256xi1>
    %c1 = arith.constant 1 : index
    %190 = memref.load %arg8[%c1] : memref<98xf32, #tpu.memory_space<smem>>
    %c50 = arith.constant 50 : index
    %191 = memref.load %arg8[%c50] : memref<98xf32, #tpu.memory_space<smem>>
    %c50_i32 = arith.constant 50 : i32
    %192 = tpu.dynamic_rotate %99 by %c50_i32 dim 1 : vector<1x256xf32>, i32 -> vector<1x256xf32>
    %c50_i32_103 = arith.constant 50 : i32
    %193 = tpu.dynamic_rotate %97 by %c50_i32_103 dim 1 : vector<1x256xf32>, i32 -> vector<1x256xf32>
    %194 = vector.broadcast %190 : f32 to vector<1x256xf32>
    %195 = arith.mulf %192, %194 : vector<1x256xf32>
    %196 = vector.broadcast %191 : f32 to vector<1x256xf32>
    %197 = arith.mulf %193, %196 : vector<1x256xf32>
    %198 = arith.addf %195, %197 : vector<1x256xf32>
    %cst_104 = arith.constant 0.000000e+00 : f32
    %199 = vector.broadcast %cst_104 : f32 to vector<1x256xf32>
    %200 = arith.select %189, %198, %199 : vector<1x256xi1>, vector<1x256xf32>
    %201 = arith.addf %173, %200 : vector<1x256xf32>
    %202 = arith.andi %106, %131 : vector<1x256xi1>
    %c2 = arith.constant 2 : index
    %203 = memref.load %arg8[%c2] : memref<98xf32, #tpu.memory_space<smem>>
    %c51 = arith.constant 51 : index
    %204 = memref.load %arg8[%c51] : memref<98xf32, #tpu.memory_space<smem>>
    %c49_i32 = arith.constant 49 : i32
    %205 = tpu.dynamic_rotate %99 by %c49_i32 dim 1 : vector<1x256xf32>, i32 -> vector<1x256xf32>
    %c49_i32_105 = arith.constant 49 : i32
    %206 = tpu.dynamic_rotate %97 by %c49_i32_105 dim 1 : vector<1x256xf32>, i32 -> vector<1x256xf32>
    %207 = vector.broadcast %203 : f32 to vector<1x256xf32>
    %208 = arith.mulf %205, %207 : vector<1x256xf32>
    %209 = vector.broadcast %204 : f32 to vector<1x256xf32>
    %210 = arith.mulf %206, %209 : vector<1x256xf32>
    %211 = arith.addf %208, %210 : vector<1x256xf32>
    %cst_106 = arith.constant 0.000000e+00 : f32
    %212 = vector.broadcast %cst_106 : f32 to vector<1x256xf32>
    %213 = arith.select %202, %211, %212 : vector<1x256xi1>, vector<1x256xf32>
    %214 = arith.addf %188, %213 : vector<1x256xf32>
    %215 = arith.andi %106, %141 : vector<1x256xi1>
    %c3 = arith.constant 3 : index
    %216 = memref.load %arg8[%c3] : memref<98xf32, #tpu.memory_space<smem>>
    %c52 = arith.constant 52 : index
    %217 = memref.load %arg8[%c52] : memref<98xf32, #tpu.memory_space<smem>>
    %c48_i32 = arith.constant 48 : i32
    %218 = tpu.dynamic_rotate %99 by %c48_i32 dim 1 : vector<1x256xf32>, i32 -> vector<1x256xf32>
    %c48_i32_107 = arith.constant 48 : i32
    %219 = tpu.dynamic_rotate %97 by %c48_i32_107 dim 1 : vector<1x256xf32>, i32 -> vector<1x256xf32>
    %220 = vector.broadcast %216 : f32 to vector<1x256xf32>
    %221 = arith.mulf %218, %220 : vector<1x256xf32>
    %222 = vector.broadcast %217 : f32 to vector<1x256xf32>
    %223 = arith.mulf %219, %222 : vector<1x256xf32>
    %224 = arith.addf %221, %223 : vector<1x256xf32>
    %cst_108 = arith.constant 0.000000e+00 : f32
    %225 = vector.broadcast %cst_108 : f32 to vector<1x256xf32>
    %226 = arith.select %215, %224, %225 : vector<1x256xi1>, vector<1x256xf32>
    %227 = arith.addf %201, %226 : vector<1x256xf32>
    %228 = arith.andi %106, %151 : vector<1x256xi1>
    %c4 = arith.constant 4 : index
    %229 = memref.load %arg8[%c4] : memref<98xf32, #tpu.memory_space<smem>>
    %c53 = arith.constant 53 : index
    %230 = memref.load %arg8[%c53] : memref<98xf32, #tpu.memory_space<smem>>
    %c47_i32 = arith.constant 47 : i32
    %231 = tpu.dynamic_rotate %99 by %c47_i32 dim 1 : vector<1x256xf32>, i32 -> vector<1x256xf32>
    %c47_i32_109 = arith.constant 47 : i32
    %232 = tpu.dynamic_rotate %97 by %c47_i32_109 dim 1 : vector<1x256xf32>, i32 -> vector<1x256xf32>
    %233 = vector.broadcast %229 : f32 to vector<1x256xf32>
    %234 = arith.mulf %231, %233 : vector<1x256xf32>
    %235 = vector.broadcast %230 : f32 to vector<1x256xf32>
    %236 = arith.mulf %232, %235 : vector<1x256xf32>
    %237 = arith.addf %234, %236 : vector<1x256xf32>
    %cst_110 = arith.constant 0.000000e+00 : f32
    %238 = vector.broadcast %cst_110 : f32 to vector<1x256xf32>
    %239 = arith.select %228, %237, %238 : vector<1x256xi1>, vector<1x256xf32>
    %240 = arith.addf %214, %239 : vector<1x256xf32>
    %241 = arith.andi %106, %161 : vector<1x256xi1>
    %c5 = arith.constant 5 : index
    %242 = memref.load %arg8[%c5] : memref<98xf32, #tpu.memory_space<smem>>
    %c54 = arith.constant 54 : index
    %243 = memref.load %arg8[%c54] : memref<98xf32, #tpu.memory_space<smem>>
    %c46_i32 = arith.constant 46 : i32
    %244 = tpu.dynamic_rotate %99 by %c46_i32 dim 1 : vector<1x256xf32>, i32 -> vector<1x256xf32>
    %c46_i32_111 = arith.constant 46 : i32
    %245 = tpu.dynamic_rotate %97 by %c46_i32_111 dim 1 : vector<1x256xf32>, i32 -> vector<1x256xf32>
    %246 = vector.broadcast %242 : f32 to vector<1x256xf32>
    %247 = arith.mulf %244, %246 : vector<1x256xf32>
    %248 = vector.broadcast %243 : f32 to vector<1x256xf32>
    %249 = arith.mulf %245, %248 : vector<1x256xf32>
    %250 = arith.addf %247, %249 : vector<1x256xf32>
    %cst_112 = arith.constant 0.000000e+00 : f32
    %251 = vector.broadcast %cst_112 : f32 to vector<1x256xf32>
    %252 = arith.select %241, %250, %251 : vector<1x256xi1>, vector<1x256xf32>
    %253 = arith.addf %227, %252 : vector<1x256xf32>
    %254 = arith.andi %106, %171 : vector<1x256xi1>
    %c6 = arith.constant 6 : index
    %255 = memref.load %arg8[%c6] : memref<98xf32, #tpu.memory_space<smem>>
    %c55 = arith.constant 55 : index
    %256 = memref.load %arg8[%c55] : memref<98xf32, #tpu.memory_space<smem>>
    %c45_i32 = arith.constant 45 : i32
    %257 = tpu.dynamic_rotate %99 by %c45_i32 dim 1 : vector<1x256xf32>, i32 -> vector<1x256xf32>
    %c45_i32_113 = arith.constant 45 : i32
    %258 = tpu.dynamic_rotate %97 by %c45_i32_113 dim 1 : vector<1x256xf32>, i32 -> vector<1x256xf32>
    %259 = vector.broadcast %255 : f32 to vector<1x256xf32>
    %260 = arith.mulf %257, %259 : vector<1x256xf32>
    %261 = vector.broadcast %256 : f32 to vector<1x256xf32>
    %262 = arith.mulf %258, %261 : vector<1x256xf32>
    %263 = arith.addf %260, %262 : vector<1x256xf32>
    %cst_114 = arith.constant 0.000000e+00 : f32
    %264 = vector.broadcast %cst_114 : f32 to vector<1x256xf32>
    %265 = arith.select %254, %263, %264 : vector<1x256xi1>, vector<1x256xf32>
    %266 = arith.addf %240, %265 : vector<1x256xf32>
    %267 = arith.andi %116, %111 : vector<1x256xi1>
    %c7 = arith.constant 7 : index
    %268 = memref.load %arg8[%c7] : memref<98xf32, #tpu.memory_space<smem>>
    %c56 = arith.constant 56 : index
    %269 = memref.load %arg8[%c56] : memref<98xf32, #tpu.memory_space<smem>>
    %c35_i32 = arith.constant 35 : i32
    %270 = tpu.dynamic_rotate %99 by %c35_i32 dim 1 : vector<1x256xf32>, i32 -> vector<1x256xf32>
    %c35_i32_115 = arith.constant 35 : i32
    %271 = tpu.dynamic_rotate %97 by %c35_i32_115 dim 1 : vector<1x256xf32>, i32 -> vector<1x256xf32>
    %272 = vector.broadcast %268 : f32 to vector<1x256xf32>
    %273 = arith.mulf %270, %272 : vector<1x256xf32>
    %274 = vector.broadcast %269 : f32 to vector<1x256xf32>
    %275 = arith.mulf %271, %274 : vector<1x256xf32>
    %276 = arith.addf %273, %275 : vector<1x256xf32>
    %cst_116 = arith.constant 0.000000e+00 : f32
    %277 = vector.broadcast %cst_116 : f32 to vector<1x256xf32>
    %278 = arith.select %267, %276, %277 : vector<1x256xi1>, vector<1x256xf32>
    %279 = arith.addf %174, %278 : vector<1x256xf32>
    %280 = arith.andi %116, %121 : vector<1x256xi1>
    %c8_117 = arith.constant 8 : index
    %281 = memref.load %arg8[%c8_117] : memref<98xf32, #tpu.memory_space<smem>>
    %c57 = arith.constant 57 : index
    %282 = memref.load %arg8[%c57] : memref<98xf32, #tpu.memory_space<smem>>
    %c34_i32 = arith.constant 34 : i32
    %283 = tpu.dynamic_rotate %99 by %c34_i32 dim 1 : vector<1x256xf32>, i32 -> vector<1x256xf32>
    %c34_i32_118 = arith.constant 34 : i32
    %284 = tpu.dynamic_rotate %97 by %c34_i32_118 dim 1 : vector<1x256xf32>, i32 -> vector<1x256xf32>
    %285 = vector.broadcast %281 : f32 to vector<1x256xf32>
    %286 = arith.mulf %283, %285 : vector<1x256xf32>
    %287 = vector.broadcast %282 : f32 to vector<1x256xf32>
    %288 = arith.mulf %284, %287 : vector<1x256xf32>
    %289 = arith.addf %286, %288 : vector<1x256xf32>
    %cst_119 = arith.constant 0.000000e+00 : f32
    %290 = vector.broadcast %cst_119 : f32 to vector<1x256xf32>
    %291 = arith.select %280, %289, %290 : vector<1x256xi1>, vector<1x256xf32>
    %292 = arith.addf %175, %291 : vector<1x256xf32>
    %293 = arith.andi %116, %131 : vector<1x256xi1>
    %c9 = arith.constant 9 : index
    %294 = memref.load %arg8[%c9] : memref<98xf32, #tpu.memory_space<smem>>
    %c58 = arith.constant 58 : index
    %295 = memref.load %arg8[%c58] : memref<98xf32, #tpu.memory_space<smem>>
    %c33_i32 = arith.constant 33 : i32
    %296 = tpu.dynamic_rotate %99 by %c33_i32 dim 1 : vector<1x256xf32>, i32 -> vector<1x256xf32>
    %c33_i32_120 = arith.constant 33 : i32
    %297 = tpu.dynamic_rotate %97 by %c33_i32_120 dim 1 : vector<1x256xf32>, i32 -> vector<1x256xf32>
    %298 = vector.broadcast %294 : f32 to vector<1x256xf32>
    %299 = arith.mulf %296, %298 : vector<1x256xf32>
    %300 = vector.broadcast %295 : f32 to vector<1x256xf32>
    %301 = arith.mulf %297, %300 : vector<1x256xf32>
    %302 = arith.addf %299, %301 : vector<1x256xf32>
    %cst_121 = arith.constant 0.000000e+00 : f32
    %303 = vector.broadcast %cst_121 : f32 to vector<1x256xf32>
    %304 = arith.select %293, %302, %303 : vector<1x256xi1>, vector<1x256xf32>
    %305 = arith.addf %279, %304 : vector<1x256xf32>
    %306 = arith.andi %116, %141 : vector<1x256xi1>
    %c10 = arith.constant 10 : index
    %307 = memref.load %arg8[%c10] : memref<98xf32, #tpu.memory_space<smem>>
    %c59 = arith.constant 59 : index
    %308 = memref.load %arg8[%c59] : memref<98xf32, #tpu.memory_space<smem>>
    %c32_i32 = arith.constant 32 : i32
    %309 = tpu.dynamic_rotate %99 by %c32_i32 dim 1 : vector<1x256xf32>, i32 -> vector<1x256xf32>
    %c32_i32_122 = arith.constant 32 : i32
    %310 = tpu.dynamic_rotate %97 by %c32_i32_122 dim 1 : vector<1x256xf32>, i32 -> vector<1x256xf32>
    %311 = vector.broadcast %307 : f32 to vector<1x256xf32>
    %312 = arith.mulf %309, %311 : vector<1x256xf32>
    %313 = vector.broadcast %308 : f32 to vector<1x256xf32>
    %314 = arith.mulf %310, %313 : vector<1x256xf32>
    %315 = arith.addf %312, %314 : vector<1x256xf32>
    %cst_123 = arith.constant 0.000000e+00 : f32
    %316 = vector.broadcast %cst_123 : f32 to vector<1x256xf32>
    %317 = arith.select %306, %315, %316 : vector<1x256xi1>, vector<1x256xf32>
    %318 = arith.addf %292, %317 : vector<1x256xf32>
    %319 = arith.andi %116, %151 : vector<1x256xi1>
    %c11 = arith.constant 11 : index
    %320 = memref.load %arg8[%c11] : memref<98xf32, #tpu.memory_space<smem>>
    %c60 = arith.constant 60 : index
    %321 = memref.load %arg8[%c60] : memref<98xf32, #tpu.memory_space<smem>>
    %c31_i32 = arith.constant 31 : i32
    %322 = tpu.dynamic_rotate %99 by %c31_i32 dim 1 : vector<1x256xf32>, i32 -> vector<1x256xf32>
    %c31_i32_124 = arith.constant 31 : i32
    %323 = tpu.dynamic_rotate %97 by %c31_i32_124 dim 1 : vector<1x256xf32>, i32 -> vector<1x256xf32>
    %324 = vector.broadcast %320 : f32 to vector<1x256xf32>
    %325 = arith.mulf %322, %324 : vector<1x256xf32>
    %326 = vector.broadcast %321 : f32 to vector<1x256xf32>
    %327 = arith.mulf %323, %326 : vector<1x256xf32>
    %328 = arith.addf %325, %327 : vector<1x256xf32>
    %cst_125 = arith.constant 0.000000e+00 : f32
    %329 = vector.broadcast %cst_125 : f32 to vector<1x256xf32>
    %330 = arith.select %319, %328, %329 : vector<1x256xi1>, vector<1x256xf32>
    %331 = arith.addf %305, %330 : vector<1x256xf32>
    %332 = arith.andi %116, %161 : vector<1x256xi1>
    %c12 = arith.constant 12 : index
    %333 = memref.load %arg8[%c12] : memref<98xf32, #tpu.memory_space<smem>>
    %c61 = arith.constant 61 : index
    %334 = memref.load %arg8[%c61] : memref<98xf32, #tpu.memory_space<smem>>
    %c30_i32 = arith.constant 30 : i32
    %335 = tpu.dynamic_rotate %99 by %c30_i32 dim 1 : vector<1x256xf32>, i32 -> vector<1x256xf32>
    %c30_i32_126 = arith.constant 30 : i32
    %336 = tpu.dynamic_rotate %97 by %c30_i32_126 dim 1 : vector<1x256xf32>, i32 -> vector<1x256xf32>
    %337 = vector.broadcast %333 : f32 to vector<1x256xf32>
    %338 = arith.mulf %335, %337 : vector<1x256xf32>
    %339 = vector.broadcast %334 : f32 to vector<1x256xf32>
    %340 = arith.mulf %336, %339 : vector<1x256xf32>
    %341 = arith.addf %338, %340 : vector<1x256xf32>
    %cst_127 = arith.constant 0.000000e+00 : f32
    %342 = vector.broadcast %cst_127 : f32 to vector<1x256xf32>
    %343 = arith.select %332, %341, %342 : vector<1x256xi1>, vector<1x256xf32>
    %344 = arith.addf %318, %343 : vector<1x256xf32>
    %345 = arith.andi %116, %171 : vector<1x256xi1>
    %c13 = arith.constant 13 : index
    %346 = memref.load %arg8[%c13] : memref<98xf32, #tpu.memory_space<smem>>
    %c62 = arith.constant 62 : index
    %347 = memref.load %arg8[%c62] : memref<98xf32, #tpu.memory_space<smem>>
    %c29_i32 = arith.constant 29 : i32
    %348 = tpu.dynamic_rotate %99 by %c29_i32 dim 1 : vector<1x256xf32>, i32 -> vector<1x256xf32>
    %c29_i32_128 = arith.constant 29 : i32
    %349 = tpu.dynamic_rotate %97 by %c29_i32_128 dim 1 : vector<1x256xf32>, i32 -> vector<1x256xf32>
    %350 = vector.broadcast %346 : f32 to vector<1x256xf32>
    %351 = arith.mulf %348, %350 : vector<1x256xf32>
    %352 = vector.broadcast %347 : f32 to vector<1x256xf32>
    %353 = arith.mulf %349, %352 : vector<1x256xf32>
    %354 = arith.addf %351, %353 : vector<1x256xf32>
    %cst_129 = arith.constant 0.000000e+00 : f32
    %355 = vector.broadcast %cst_129 : f32 to vector<1x256xf32>
    %356 = arith.select %345, %354, %355 : vector<1x256xi1>, vector<1x256xf32>
    %357 = arith.addf %331, %356 : vector<1x256xf32>
    %358 = arith.andi %126, %111 : vector<1x256xi1>
    %c14 = arith.constant 14 : index
    %359 = memref.load %arg8[%c14] : memref<98xf32, #tpu.memory_space<smem>>
    %c63 = arith.constant 63 : index
    %360 = memref.load %arg8[%c63] : memref<98xf32, #tpu.memory_space<smem>>
    %c19_i32_130 = arith.constant 19 : i32
    %361 = tpu.dynamic_rotate %99 by %c19_i32_130 dim 1 : vector<1x256xf32>, i32 -> vector<1x256xf32>
    %c19_i32_131 = arith.constant 19 : i32
    %362 = tpu.dynamic_rotate %97 by %c19_i32_131 dim 1 : vector<1x256xf32>, i32 -> vector<1x256xf32>
    %363 = vector.broadcast %359 : f32 to vector<1x256xf32>
    %364 = arith.mulf %361, %363 : vector<1x256xf32>
    %365 = vector.broadcast %360 : f32 to vector<1x256xf32>
    %366 = arith.mulf %362, %365 : vector<1x256xf32>
    %367 = arith.addf %364, %366 : vector<1x256xf32>
    %cst_132 = arith.constant 0.000000e+00 : f32
    %368 = vector.broadcast %cst_132 : f32 to vector<1x256xf32>
    %369 = arith.select %358, %367, %368 : vector<1x256xi1>, vector<1x256xf32>
    %370 = arith.addf %266, %369 : vector<1x256xf32>
    %371 = arith.andi %126, %121 : vector<1x256xi1>
    %c15 = arith.constant 15 : index
    %372 = memref.load %arg8[%c15] : memref<98xf32, #tpu.memory_space<smem>>
    %c64 = arith.constant 64 : index
    %373 = memref.load %arg8[%c64] : memref<98xf32, #tpu.memory_space<smem>>
    %c18_i32_133 = arith.constant 18 : i32
    %374 = tpu.dynamic_rotate %99 by %c18_i32_133 dim 1 : vector<1x256xf32>, i32 -> vector<1x256xf32>
    %c18_i32_134 = arith.constant 18 : i32
    %375 = tpu.dynamic_rotate %97 by %c18_i32_134 dim 1 : vector<1x256xf32>, i32 -> vector<1x256xf32>
    %376 = vector.broadcast %372 : f32 to vector<1x256xf32>
    %377 = arith.mulf %374, %376 : vector<1x256xf32>
    %378 = vector.broadcast %373 : f32 to vector<1x256xf32>
    %379 = arith.mulf %375, %378 : vector<1x256xf32>
    %380 = arith.addf %377, %379 : vector<1x256xf32>
    %cst_135 = arith.constant 0.000000e+00 : f32
    %381 = vector.broadcast %cst_135 : f32 to vector<1x256xf32>
    %382 = arith.select %371, %380, %381 : vector<1x256xi1>, vector<1x256xf32>
    %383 = arith.addf %253, %382 : vector<1x256xf32>
    %384 = arith.andi %126, %131 : vector<1x256xi1>
    %c16_136 = arith.constant 16 : index
    %385 = memref.load %arg8[%c16_136] : memref<98xf32, #tpu.memory_space<smem>>
    %c65 = arith.constant 65 : index
    %386 = memref.load %arg8[%c65] : memref<98xf32, #tpu.memory_space<smem>>
    %c17_i32_137 = arith.constant 17 : i32
    %387 = tpu.dynamic_rotate %99 by %c17_i32_137 dim 1 : vector<1x256xf32>, i32 -> vector<1x256xf32>
    %c17_i32_138 = arith.constant 17 : i32
    %388 = tpu.dynamic_rotate %97 by %c17_i32_138 dim 1 : vector<1x256xf32>, i32 -> vector<1x256xf32>
    %389 = vector.broadcast %385 : f32 to vector<1x256xf32>
    %390 = arith.mulf %387, %389 : vector<1x256xf32>
    %391 = vector.broadcast %386 : f32 to vector<1x256xf32>
    %392 = arith.mulf %388, %391 : vector<1x256xf32>
    %393 = arith.addf %390, %392 : vector<1x256xf32>
    %cst_139 = arith.constant 0.000000e+00 : f32
    %394 = vector.broadcast %cst_139 : f32 to vector<1x256xf32>
    %395 = arith.select %384, %393, %394 : vector<1x256xi1>, vector<1x256xf32>
    %396 = arith.addf %370, %395 : vector<1x256xf32>
    %397 = arith.andi %126, %141 : vector<1x256xi1>
    %c17 = arith.constant 17 : index
    %398 = memref.load %arg8[%c17] : memref<98xf32, #tpu.memory_space<smem>>
    %c66 = arith.constant 66 : index
    %399 = memref.load %arg8[%c66] : memref<98xf32, #tpu.memory_space<smem>>
    %c16_i32_140 = arith.constant 16 : i32
    %400 = tpu.dynamic_rotate %99 by %c16_i32_140 dim 1 : vector<1x256xf32>, i32 -> vector<1x256xf32>
    %c16_i32_141 = arith.constant 16 : i32
    %401 = tpu.dynamic_rotate %97 by %c16_i32_141 dim 1 : vector<1x256xf32>, i32 -> vector<1x256xf32>
    %402 = vector.broadcast %398 : f32 to vector<1x256xf32>
    %403 = arith.mulf %400, %402 : vector<1x256xf32>
    %404 = vector.broadcast %399 : f32 to vector<1x256xf32>
    %405 = arith.mulf %401, %404 : vector<1x256xf32>
    %406 = arith.addf %403, %405 : vector<1x256xf32>
    %cst_142 = arith.constant 0.000000e+00 : f32
    %407 = vector.broadcast %cst_142 : f32 to vector<1x256xf32>
    %408 = arith.select %397, %406, %407 : vector<1x256xi1>, vector<1x256xf32>
    %409 = arith.addf %383, %408 : vector<1x256xf32>
    %410 = arith.andi %126, %151 : vector<1x256xi1>
    %c18 = arith.constant 18 : index
    %411 = memref.load %arg8[%c18] : memref<98xf32, #tpu.memory_space<smem>>
    %c67 = arith.constant 67 : index
    %412 = memref.load %arg8[%c67] : memref<98xf32, #tpu.memory_space<smem>>
    %c15_i32_143 = arith.constant 15 : i32
    %413 = tpu.dynamic_rotate %99 by %c15_i32_143 dim 1 : vector<1x256xf32>, i32 -> vector<1x256xf32>
    %c15_i32_144 = arith.constant 15 : i32
    %414 = tpu.dynamic_rotate %97 by %c15_i32_144 dim 1 : vector<1x256xf32>, i32 -> vector<1x256xf32>
    %415 = vector.broadcast %411 : f32 to vector<1x256xf32>
    %416 = arith.mulf %413, %415 : vector<1x256xf32>
    %417 = vector.broadcast %412 : f32 to vector<1x256xf32>
    %418 = arith.mulf %414, %417 : vector<1x256xf32>
    %419 = arith.addf %416, %418 : vector<1x256xf32>
    %cst_145 = arith.constant 0.000000e+00 : f32
    %420 = vector.broadcast %cst_145 : f32 to vector<1x256xf32>
    %421 = arith.select %410, %419, %420 : vector<1x256xi1>, vector<1x256xf32>
    %422 = arith.addf %396, %421 : vector<1x256xf32>
    %423 = arith.andi %126, %161 : vector<1x256xi1>
    %c19 = arith.constant 19 : index
    %424 = memref.load %arg8[%c19] : memref<98xf32, #tpu.memory_space<smem>>
    %c68 = arith.constant 68 : index
    %425 = memref.load %arg8[%c68] : memref<98xf32, #tpu.memory_space<smem>>
    %c14_i32_146 = arith.constant 14 : i32
    %426 = tpu.dynamic_rotate %99 by %c14_i32_146 dim 1 : vector<1x256xf32>, i32 -> vector<1x256xf32>
    %c14_i32_147 = arith.constant 14 : i32
    %427 = tpu.dynamic_rotate %97 by %c14_i32_147 dim 1 : vector<1x256xf32>, i32 -> vector<1x256xf32>
    %428 = vector.broadcast %424 : f32 to vector<1x256xf32>
    %429 = arith.mulf %426, %428 : vector<1x256xf32>
    %430 = vector.broadcast %425 : f32 to vector<1x256xf32>
    %431 = arith.mulf %427, %430 : vector<1x256xf32>
    %432 = arith.addf %429, %431 : vector<1x256xf32>
    %cst_148 = arith.constant 0.000000e+00 : f32
    %433 = vector.broadcast %cst_148 : f32 to vector<1x256xf32>
    %434 = arith.select %423, %432, %433 : vector<1x256xi1>, vector<1x256xf32>
    %435 = arith.addf %409, %434 : vector<1x256xf32>
    %436 = arith.andi %126, %171 : vector<1x256xi1>
    %c20 = arith.constant 20 : index
    %437 = memref.load %arg8[%c20] : memref<98xf32, #tpu.memory_space<smem>>
    %c69 = arith.constant 69 : index
    %438 = memref.load %arg8[%c69] : memref<98xf32, #tpu.memory_space<smem>>
    %c13_i32_149 = arith.constant 13 : i32
    %439 = tpu.dynamic_rotate %99 by %c13_i32_149 dim 1 : vector<1x256xf32>, i32 -> vector<1x256xf32>
    %c13_i32_150 = arith.constant 13 : i32
    %440 = tpu.dynamic_rotate %97 by %c13_i32_150 dim 1 : vector<1x256xf32>, i32 -> vector<1x256xf32>
    %441 = vector.broadcast %437 : f32 to vector<1x256xf32>
    %442 = arith.mulf %439, %441 : vector<1x256xf32>
    %443 = vector.broadcast %438 : f32 to vector<1x256xf32>
    %444 = arith.mulf %440, %443 : vector<1x256xf32>
    %445 = arith.addf %442, %444 : vector<1x256xf32>
    %cst_151 = arith.constant 0.000000e+00 : f32
    %446 = vector.broadcast %cst_151 : f32 to vector<1x256xf32>
    %447 = arith.select %436, %445, %446 : vector<1x256xi1>, vector<1x256xf32>
    %448 = arith.addf %422, %447 : vector<1x256xf32>
    %449 = arith.andi %136, %111 : vector<1x256xi1>
    %c21 = arith.constant 21 : index
    %450 = memref.load %arg8[%c21] : memref<98xf32, #tpu.memory_space<smem>>
    %c70 = arith.constant 70 : index
    %451 = memref.load %arg8[%c70] : memref<98xf32, #tpu.memory_space<smem>>
    %c3_i32_152 = arith.constant 3 : i32
    %452 = tpu.dynamic_rotate %99 by %c3_i32_152 dim 1 : vector<1x256xf32>, i32 -> vector<1x256xf32>
    %c3_i32_153 = arith.constant 3 : i32
    %453 = tpu.dynamic_rotate %97 by %c3_i32_153 dim 1 : vector<1x256xf32>, i32 -> vector<1x256xf32>
    %454 = vector.broadcast %450 : f32 to vector<1x256xf32>
    %455 = arith.mulf %452, %454 : vector<1x256xf32>
    %456 = vector.broadcast %451 : f32 to vector<1x256xf32>
    %457 = arith.mulf %453, %456 : vector<1x256xf32>
    %458 = arith.addf %455, %457 : vector<1x256xf32>
    %cst_154 = arith.constant 0.000000e+00 : f32
    %459 = vector.broadcast %cst_154 : f32 to vector<1x256xf32>
    %460 = arith.select %449, %458, %459 : vector<1x256xi1>, vector<1x256xf32>
    %461 = arith.addf %357, %460 : vector<1x256xf32>
    %462 = arith.andi %136, %121 : vector<1x256xi1>
    %c22 = arith.constant 22 : index
    %463 = memref.load %arg8[%c22] : memref<98xf32, #tpu.memory_space<smem>>
    %c71 = arith.constant 71 : index
    %464 = memref.load %arg8[%c71] : memref<98xf32, #tpu.memory_space<smem>>
    %c2_i32_155 = arith.constant 2 : i32
    %465 = tpu.dynamic_rotate %99 by %c2_i32_155 dim 1 : vector<1x256xf32>, i32 -> vector<1x256xf32>
    %c2_i32_156 = arith.constant 2 : i32
    %466 = tpu.dynamic_rotate %97 by %c2_i32_156 dim 1 : vector<1x256xf32>, i32 -> vector<1x256xf32>
    %467 = vector.broadcast %463 : f32 to vector<1x256xf32>
    %468 = arith.mulf %465, %467 : vector<1x256xf32>
    %469 = vector.broadcast %464 : f32 to vector<1x256xf32>
    %470 = arith.mulf %466, %469 : vector<1x256xf32>
    %471 = arith.addf %468, %470 : vector<1x256xf32>
    %cst_157 = arith.constant 0.000000e+00 : f32
    %472 = vector.broadcast %cst_157 : f32 to vector<1x256xf32>
    %473 = arith.select %462, %471, %472 : vector<1x256xi1>, vector<1x256xf32>
    %474 = arith.addf %344, %473 : vector<1x256xf32>
    %475 = arith.andi %136, %131 : vector<1x256xi1>
    %c23 = arith.constant 23 : index
    %476 = memref.load %arg8[%c23] : memref<98xf32, #tpu.memory_space<smem>>
    %c72 = arith.constant 72 : index
    %477 = memref.load %arg8[%c72] : memref<98xf32, #tpu.memory_space<smem>>
    %c1_i32_158 = arith.constant 1 : i32
    %478 = tpu.dynamic_rotate %99 by %c1_i32_158 dim 1 : vector<1x256xf32>, i32 -> vector<1x256xf32>
    %c1_i32_159 = arith.constant 1 : i32
    %479 = tpu.dynamic_rotate %97 by %c1_i32_159 dim 1 : vector<1x256xf32>, i32 -> vector<1x256xf32>
    %480 = vector.broadcast %476 : f32 to vector<1x256xf32>
    %481 = arith.mulf %478, %480 : vector<1x256xf32>
    %482 = vector.broadcast %477 : f32 to vector<1x256xf32>
    %483 = arith.mulf %479, %482 : vector<1x256xf32>
    %484 = arith.addf %481, %483 : vector<1x256xf32>
    %cst_160 = arith.constant 0.000000e+00 : f32
    %485 = vector.broadcast %cst_160 : f32 to vector<1x256xf32>
    %486 = arith.select %475, %484, %485 : vector<1x256xi1>, vector<1x256xf32>
    %487 = arith.addf %461, %486 : vector<1x256xf32>
    %488 = arith.andi %136, %141 : vector<1x256xi1>
    %c24_161 = arith.constant 24 : index
    %489 = memref.load %arg8[%c24_161] : memref<98xf32, #tpu.memory_space<smem>>
    %c73 = arith.constant 73 : index
    %490 = memref.load %arg8[%c73] : memref<98xf32, #tpu.memory_space<smem>>
    %491 = vector.broadcast %489 : f32 to vector<1x256xf32>
    %492 = arith.mulf %99, %491 : vector<1x256xf32>
    %493 = vector.broadcast %490 : f32 to vector<1x256xf32>
    %494 = arith.mulf %97, %493 : vector<1x256xf32>
    %495 = arith.addf %492, %494 : vector<1x256xf32>
    %cst_162 = arith.constant 0.000000e+00 : f32
    %496 = vector.broadcast %cst_162 : f32 to vector<1x256xf32>
    %497 = arith.select %488, %495, %496 : vector<1x256xi1>, vector<1x256xf32>
    %498 = arith.addf %474, %497 : vector<1x256xf32>
    %499 = arith.andi %136, %151 : vector<1x256xi1>
    %c25 = arith.constant 25 : index
    %500 = memref.load %arg8[%c25] : memref<98xf32, #tpu.memory_space<smem>>
    %c74 = arith.constant 74 : index
    %501 = memref.load %arg8[%c74] : memref<98xf32, #tpu.memory_space<smem>>
    %c255_i32 = arith.constant 255 : i32
    %502 = tpu.dynamic_rotate %99 by %c255_i32 dim 1 : vector<1x256xf32>, i32 -> vector<1x256xf32>
    %c255_i32_163 = arith.constant 255 : i32
    %503 = tpu.dynamic_rotate %97 by %c255_i32_163 dim 1 : vector<1x256xf32>, i32 -> vector<1x256xf32>
    %504 = vector.broadcast %500 : f32 to vector<1x256xf32>
    %505 = arith.mulf %502, %504 : vector<1x256xf32>
    %506 = vector.broadcast %501 : f32 to vector<1x256xf32>
    %507 = arith.mulf %503, %506 : vector<1x256xf32>
    %508 = arith.addf %505, %507 : vector<1x256xf32>
    %cst_164 = arith.constant 0.000000e+00 : f32
    %509 = vector.broadcast %cst_164 : f32 to vector<1x256xf32>
    %510 = arith.select %499, %508, %509 : vector<1x256xi1>, vector<1x256xf32>
    %511 = arith.addf %487, %510 : vector<1x256xf32>
    %512 = arith.andi %136, %161 : vector<1x256xi1>
    %c26 = arith.constant 26 : index
    %513 = memref.load %arg8[%c26] : memref<98xf32, #tpu.memory_space<smem>>
    %c75 = arith.constant 75 : index
    %514 = memref.load %arg8[%c75] : memref<98xf32, #tpu.memory_space<smem>>
    %c254_i32 = arith.constant 254 : i32
    %515 = tpu.dynamic_rotate %99 by %c254_i32 dim 1 : vector<1x256xf32>, i32 -> vector<1x256xf32>
    %c254_i32_165 = arith.constant 254 : i32
    %516 = tpu.dynamic_rotate %97 by %c254_i32_165 dim 1 : vector<1x256xf32>, i32 -> vector<1x256xf32>
    %517 = vector.broadcast %513 : f32 to vector<1x256xf32>
    %518 = arith.mulf %515, %517 : vector<1x256xf32>
    %519 = vector.broadcast %514 : f32 to vector<1x256xf32>
    %520 = arith.mulf %516, %519 : vector<1x256xf32>
    %521 = arith.addf %518, %520 : vector<1x256xf32>
    %cst_166 = arith.constant 0.000000e+00 : f32
    %522 = vector.broadcast %cst_166 : f32 to vector<1x256xf32>
    %523 = arith.select %512, %521, %522 : vector<1x256xi1>, vector<1x256xf32>
    %524 = arith.addf %498, %523 : vector<1x256xf32>
    %525 = arith.andi %136, %171 : vector<1x256xi1>
    %c27 = arith.constant 27 : index
    %526 = memref.load %arg8[%c27] : memref<98xf32, #tpu.memory_space<smem>>
    %c76 = arith.constant 76 : index
    %527 = memref.load %arg8[%c76] : memref<98xf32, #tpu.memory_space<smem>>
    %c253_i32 = arith.constant 253 : i32
    %528 = tpu.dynamic_rotate %99 by %c253_i32 dim 1 : vector<1x256xf32>, i32 -> vector<1x256xf32>
    %c253_i32_167 = arith.constant 253 : i32
    %529 = tpu.dynamic_rotate %97 by %c253_i32_167 dim 1 : vector<1x256xf32>, i32 -> vector<1x256xf32>
    %530 = vector.broadcast %526 : f32 to vector<1x256xf32>
    %531 = arith.mulf %528, %530 : vector<1x256xf32>
    %532 = vector.broadcast %527 : f32 to vector<1x256xf32>
    %533 = arith.mulf %529, %532 : vector<1x256xf32>
    %534 = arith.addf %531, %533 : vector<1x256xf32>
    %cst_168 = arith.constant 0.000000e+00 : f32
    %535 = vector.broadcast %cst_168 : f32 to vector<1x256xf32>
    %536 = arith.select %525, %534, %535 : vector<1x256xi1>, vector<1x256xf32>
    %537 = arith.addf %511, %536 : vector<1x256xf32>
    %538 = arith.andi %146, %111 : vector<1x256xi1>
    %c28 = arith.constant 28 : index
    %539 = memref.load %arg8[%c28] : memref<98xf32, #tpu.memory_space<smem>>
    %c77 = arith.constant 77 : index
    %540 = memref.load %arg8[%c77] : memref<98xf32, #tpu.memory_space<smem>>
    %c243_i32 = arith.constant 243 : i32
    %541 = tpu.dynamic_rotate %99 by %c243_i32 dim 1 : vector<1x256xf32>, i32 -> vector<1x256xf32>
    %c243_i32_169 = arith.constant 243 : i32
    %542 = tpu.dynamic_rotate %97 by %c243_i32_169 dim 1 : vector<1x256xf32>, i32 -> vector<1x256xf32>
    %543 = vector.broadcast %539 : f32 to vector<1x256xf32>
    %544 = arith.mulf %541, %543 : vector<1x256xf32>
    %545 = vector.broadcast %540 : f32 to vector<1x256xf32>
    %546 = arith.mulf %542, %545 : vector<1x256xf32>
    %547 = arith.addf %544, %546 : vector<1x256xf32>
    %cst_170 = arith.constant 0.000000e+00 : f32
    %548 = vector.broadcast %cst_170 : f32 to vector<1x256xf32>
    %549 = arith.select %538, %547, %548 : vector<1x256xi1>, vector<1x256xf32>
    %550 = arith.addf %448, %549 : vector<1x256xf32>
    %551 = arith.andi %146, %121 : vector<1x256xi1>
    %c29 = arith.constant 29 : index
    %552 = memref.load %arg8[%c29] : memref<98xf32, #tpu.memory_space<smem>>
    %c78 = arith.constant 78 : index
    %553 = memref.load %arg8[%c78] : memref<98xf32, #tpu.memory_space<smem>>
    %c242_i32 = arith.constant 242 : i32
    %554 = tpu.dynamic_rotate %99 by %c242_i32 dim 1 : vector<1x256xf32>, i32 -> vector<1x256xf32>
    %c242_i32_171 = arith.constant 242 : i32
    %555 = tpu.dynamic_rotate %97 by %c242_i32_171 dim 1 : vector<1x256xf32>, i32 -> vector<1x256xf32>
    %556 = vector.broadcast %552 : f32 to vector<1x256xf32>
    %557 = arith.mulf %554, %556 : vector<1x256xf32>
    %558 = vector.broadcast %553 : f32 to vector<1x256xf32>
    %559 = arith.mulf %555, %558 : vector<1x256xf32>
    %560 = arith.addf %557, %559 : vector<1x256xf32>
    %cst_172 = arith.constant 0.000000e+00 : f32
    %561 = vector.broadcast %cst_172 : f32 to vector<1x256xf32>
    %562 = arith.select %551, %560, %561 : vector<1x256xi1>, vector<1x256xf32>
    %563 = arith.addf %435, %562 : vector<1x256xf32>
    %564 = arith.andi %146, %131 : vector<1x256xi1>
    %c30 = arith.constant 30 : index
    %565 = memref.load %arg8[%c30] : memref<98xf32, #tpu.memory_space<smem>>
    %c79 = arith.constant 79 : index
    %566 = memref.load %arg8[%c79] : memref<98xf32, #tpu.memory_space<smem>>
    %c241_i32 = arith.constant 241 : i32
    %567 = tpu.dynamic_rotate %99 by %c241_i32 dim 1 : vector<1x256xf32>, i32 -> vector<1x256xf32>
    %c241_i32_173 = arith.constant 241 : i32
    %568 = tpu.dynamic_rotate %97 by %c241_i32_173 dim 1 : vector<1x256xf32>, i32 -> vector<1x256xf32>
    %569 = vector.broadcast %565 : f32 to vector<1x256xf32>
    %570 = arith.mulf %567, %569 : vector<1x256xf32>
    %571 = vector.broadcast %566 : f32 to vector<1x256xf32>
    %572 = arith.mulf %568, %571 : vector<1x256xf32>
    %573 = arith.addf %570, %572 : vector<1x256xf32>
    %cst_174 = arith.constant 0.000000e+00 : f32
    %574 = vector.broadcast %cst_174 : f32 to vector<1x256xf32>
    %575 = arith.select %564, %573, %574 : vector<1x256xi1>, vector<1x256xf32>
    %576 = arith.addf %550, %575 : vector<1x256xf32>
    %577 = arith.andi %146, %141 : vector<1x256xi1>
    %c31 = arith.constant 31 : index
    %578 = memref.load %arg8[%c31] : memref<98xf32, #tpu.memory_space<smem>>
    %c80 = arith.constant 80 : index
    %579 = memref.load %arg8[%c80] : memref<98xf32, #tpu.memory_space<smem>>
    %c240_i32 = arith.constant 240 : i32
    %580 = tpu.dynamic_rotate %99 by %c240_i32 dim 1 : vector<1x256xf32>, i32 -> vector<1x256xf32>
    %c240_i32_175 = arith.constant 240 : i32
    %581 = tpu.dynamic_rotate %97 by %c240_i32_175 dim 1 : vector<1x256xf32>, i32 -> vector<1x256xf32>
    %582 = vector.broadcast %578 : f32 to vector<1x256xf32>
    %583 = arith.mulf %580, %582 : vector<1x256xf32>
    %584 = vector.broadcast %579 : f32 to vector<1x256xf32>
    %585 = arith.mulf %581, %584 : vector<1x256xf32>
    %586 = arith.addf %583, %585 : vector<1x256xf32>
    %cst_176 = arith.constant 0.000000e+00 : f32
    %587 = vector.broadcast %cst_176 : f32 to vector<1x256xf32>
    %588 = arith.select %577, %586, %587 : vector<1x256xi1>, vector<1x256xf32>
    %589 = arith.addf %563, %588 : vector<1x256xf32>
    %590 = arith.andi %146, %151 : vector<1x256xi1>
    %c32 = arith.constant 32 : index
    %591 = memref.load %arg8[%c32] : memref<98xf32, #tpu.memory_space<smem>>
    %c81 = arith.constant 81 : index
    %592 = memref.load %arg8[%c81] : memref<98xf32, #tpu.memory_space<smem>>
    %c239_i32 = arith.constant 239 : i32
    %593 = tpu.dynamic_rotate %99 by %c239_i32 dim 1 : vector<1x256xf32>, i32 -> vector<1x256xf32>
    %c239_i32_177 = arith.constant 239 : i32
    %594 = tpu.dynamic_rotate %97 by %c239_i32_177 dim 1 : vector<1x256xf32>, i32 -> vector<1x256xf32>
    %595 = vector.broadcast %591 : f32 to vector<1x256xf32>
    %596 = arith.mulf %593, %595 : vector<1x256xf32>
    %597 = vector.broadcast %592 : f32 to vector<1x256xf32>
    %598 = arith.mulf %594, %597 : vector<1x256xf32>
    %599 = arith.addf %596, %598 : vector<1x256xf32>
    %cst_178 = arith.constant 0.000000e+00 : f32
    %600 = vector.broadcast %cst_178 : f32 to vector<1x256xf32>
    %601 = arith.select %590, %599, %600 : vector<1x256xi1>, vector<1x256xf32>
    %602 = arith.addf %576, %601 : vector<1x256xf32>
    %603 = arith.andi %146, %161 : vector<1x256xi1>
    %c33 = arith.constant 33 : index
    %604 = memref.load %arg8[%c33] : memref<98xf32, #tpu.memory_space<smem>>
    %c82 = arith.constant 82 : index
    %605 = memref.load %arg8[%c82] : memref<98xf32, #tpu.memory_space<smem>>
    %c238_i32 = arith.constant 238 : i32
    %606 = tpu.dynamic_rotate %99 by %c238_i32 dim 1 : vector<1x256xf32>, i32 -> vector<1x256xf32>
    %c238_i32_179 = arith.constant 238 : i32
    %607 = tpu.dynamic_rotate %97 by %c238_i32_179 dim 1 : vector<1x256xf32>, i32 -> vector<1x256xf32>
    %608 = vector.broadcast %604 : f32 to vector<1x256xf32>
    %609 = arith.mulf %606, %608 : vector<1x256xf32>
    %610 = vector.broadcast %605 : f32 to vector<1x256xf32>
    %611 = arith.mulf %607, %610 : vector<1x256xf32>
    %612 = arith.addf %609, %611 : vector<1x256xf32>
    %cst_180 = arith.constant 0.000000e+00 : f32
    %613 = vector.broadcast %cst_180 : f32 to vector<1x256xf32>
    %614 = arith.select %603, %612, %613 : vector<1x256xi1>, vector<1x256xf32>
    %615 = arith.addf %589, %614 : vector<1x256xf32>
    %616 = arith.andi %146, %171 : vector<1x256xi1>
    %c34 = arith.constant 34 : index
    %617 = memref.load %arg8[%c34] : memref<98xf32, #tpu.memory_space<smem>>
    %c83 = arith.constant 83 : index
    %618 = memref.load %arg8[%c83] : memref<98xf32, #tpu.memory_space<smem>>
    %c237_i32 = arith.constant 237 : i32
    %619 = tpu.dynamic_rotate %99 by %c237_i32 dim 1 : vector<1x256xf32>, i32 -> vector<1x256xf32>
    %c237_i32_181 = arith.constant 237 : i32
    %620 = tpu.dynamic_rotate %97 by %c237_i32_181 dim 1 : vector<1x256xf32>, i32 -> vector<1x256xf32>
    %621 = vector.broadcast %617 : f32 to vector<1x256xf32>
    %622 = arith.mulf %619, %621 : vector<1x256xf32>
    %623 = vector.broadcast %618 : f32 to vector<1x256xf32>
    %624 = arith.mulf %620, %623 : vector<1x256xf32>
    %625 = arith.addf %622, %624 : vector<1x256xf32>
    %cst_182 = arith.constant 0.000000e+00 : f32
    %626 = vector.broadcast %cst_182 : f32 to vector<1x256xf32>
    %627 = arith.select %616, %625, %626 : vector<1x256xi1>, vector<1x256xf32>
    %628 = arith.addf %602, %627 : vector<1x256xf32>
    %629 = arith.andi %156, %111 : vector<1x256xi1>
    %c35 = arith.constant 35 : index
    %630 = memref.load %arg8[%c35] : memref<98xf32, #tpu.memory_space<smem>>
    %c84 = arith.constant 84 : index
    %631 = memref.load %arg8[%c84] : memref<98xf32, #tpu.memory_space<smem>>
    %c227_i32 = arith.constant 227 : i32
    %632 = tpu.dynamic_rotate %99 by %c227_i32 dim 1 : vector<1x256xf32>, i32 -> vector<1x256xf32>
    %c227_i32_183 = arith.constant 227 : i32
    %633 = tpu.dynamic_rotate %97 by %c227_i32_183 dim 1 : vector<1x256xf32>, i32 -> vector<1x256xf32>
    %634 = vector.broadcast %630 : f32 to vector<1x256xf32>
    %635 = arith.mulf %632, %634 : vector<1x256xf32>
    %636 = vector.broadcast %631 : f32 to vector<1x256xf32>
    %637 = arith.mulf %633, %636 : vector<1x256xf32>
    %638 = arith.addf %635, %637 : vector<1x256xf32>
    %cst_184 = arith.constant 0.000000e+00 : f32
    %639 = vector.broadcast %cst_184 : f32 to vector<1x256xf32>
    %640 = arith.select %629, %638, %639 : vector<1x256xi1>, vector<1x256xf32>
    %641 = arith.addf %537, %640 : vector<1x256xf32>
    %642 = arith.andi %156, %121 : vector<1x256xi1>
    %c36 = arith.constant 36 : index
    %643 = memref.load %arg8[%c36] : memref<98xf32, #tpu.memory_space<smem>>
    %c85 = arith.constant 85 : index
    %644 = memref.load %arg8[%c85] : memref<98xf32, #tpu.memory_space<smem>>
    %c226_i32 = arith.constant 226 : i32
    %645 = tpu.dynamic_rotate %99 by %c226_i32 dim 1 : vector<1x256xf32>, i32 -> vector<1x256xf32>
    %c226_i32_185 = arith.constant 226 : i32
    %646 = tpu.dynamic_rotate %97 by %c226_i32_185 dim 1 : vector<1x256xf32>, i32 -> vector<1x256xf32>
    %647 = vector.broadcast %643 : f32 to vector<1x256xf32>
    %648 = arith.mulf %645, %647 : vector<1x256xf32>
    %649 = vector.broadcast %644 : f32 to vector<1x256xf32>
    %650 = arith.mulf %646, %649 : vector<1x256xf32>
    %651 = arith.addf %648, %650 : vector<1x256xf32>
    %cst_186 = arith.constant 0.000000e+00 : f32
    %652 = vector.broadcast %cst_186 : f32 to vector<1x256xf32>
    %653 = arith.select %642, %651, %652 : vector<1x256xi1>, vector<1x256xf32>
    %654 = arith.addf %524, %653 : vector<1x256xf32>
    %655 = arith.andi %156, %131 : vector<1x256xi1>
    %c37 = arith.constant 37 : index
    %656 = memref.load %arg8[%c37] : memref<98xf32, #tpu.memory_space<smem>>
    %c86 = arith.constant 86 : index
    %657 = memref.load %arg8[%c86] : memref<98xf32, #tpu.memory_space<smem>>
    %c225_i32 = arith.constant 225 : i32
    %658 = tpu.dynamic_rotate %99 by %c225_i32 dim 1 : vector<1x256xf32>, i32 -> vector<1x256xf32>
    %c225_i32_187 = arith.constant 225 : i32
    %659 = tpu.dynamic_rotate %97 by %c225_i32_187 dim 1 : vector<1x256xf32>, i32 -> vector<1x256xf32>
    %660 = vector.broadcast %656 : f32 to vector<1x256xf32>
    %661 = arith.mulf %658, %660 : vector<1x256xf32>
    %662 = vector.broadcast %657 : f32 to vector<1x256xf32>
    %663 = arith.mulf %659, %662 : vector<1x256xf32>
    %664 = arith.addf %661, %663 : vector<1x256xf32>
    %cst_188 = arith.constant 0.000000e+00 : f32
    %665 = vector.broadcast %cst_188 : f32 to vector<1x256xf32>
    %666 = arith.select %655, %664, %665 : vector<1x256xi1>, vector<1x256xf32>
    %667 = arith.addf %641, %666 : vector<1x256xf32>
    %668 = arith.andi %156, %141 : vector<1x256xi1>
    %c38 = arith.constant 38 : index
    %669 = memref.load %arg8[%c38] : memref<98xf32, #tpu.memory_space<smem>>
    %c87 = arith.constant 87 : index
    %670 = memref.load %arg8[%c87] : memref<98xf32, #tpu.memory_space<smem>>
    %c224_i32 = arith.constant 224 : i32
    %671 = tpu.dynamic_rotate %99 by %c224_i32 dim 1 : vector<1x256xf32>, i32 -> vector<1x256xf32>
    %c224_i32_189 = arith.constant 224 : i32
    %672 = tpu.dynamic_rotate %97 by %c224_i32_189 dim 1 : vector<1x256xf32>, i32 -> vector<1x256xf32>
    %673 = vector.broadcast %669 : f32 to vector<1x256xf32>
    %674 = arith.mulf %671, %673 : vector<1x256xf32>
    %675 = vector.broadcast %670 : f32 to vector<1x256xf32>
    %676 = arith.mulf %672, %675 : vector<1x256xf32>
    %677 = arith.addf %674, %676 : vector<1x256xf32>
    %cst_190 = arith.constant 0.000000e+00 : f32
    %678 = vector.broadcast %cst_190 : f32 to vector<1x256xf32>
    %679 = arith.select %668, %677, %678 : vector<1x256xi1>, vector<1x256xf32>
    %680 = arith.addf %654, %679 : vector<1x256xf32>
    %681 = arith.andi %156, %151 : vector<1x256xi1>
    %c39 = arith.constant 39 : index
    %682 = memref.load %arg8[%c39] : memref<98xf32, #tpu.memory_space<smem>>
    %c88 = arith.constant 88 : index
    %683 = memref.load %arg8[%c88] : memref<98xf32, #tpu.memory_space<smem>>
    %c223_i32 = arith.constant 223 : i32
    %684 = tpu.dynamic_rotate %99 by %c223_i32 dim 1 : vector<1x256xf32>, i32 -> vector<1x256xf32>
    %c223_i32_191 = arith.constant 223 : i32
    %685 = tpu.dynamic_rotate %97 by %c223_i32_191 dim 1 : vector<1x256xf32>, i32 -> vector<1x256xf32>
    %686 = vector.broadcast %682 : f32 to vector<1x256xf32>
    %687 = arith.mulf %684, %686 : vector<1x256xf32>
    %688 = vector.broadcast %683 : f32 to vector<1x256xf32>
    %689 = arith.mulf %685, %688 : vector<1x256xf32>
    %690 = arith.addf %687, %689 : vector<1x256xf32>
    %cst_192 = arith.constant 0.000000e+00 : f32
    %691 = vector.broadcast %cst_192 : f32 to vector<1x256xf32>
    %692 = arith.select %681, %690, %691 : vector<1x256xi1>, vector<1x256xf32>
    %693 = arith.addf %667, %692 : vector<1x256xf32>
    %694 = arith.andi %156, %161 : vector<1x256xi1>
    %c40 = arith.constant 40 : index
    %695 = memref.load %arg8[%c40] : memref<98xf32, #tpu.memory_space<smem>>
    %c89 = arith.constant 89 : index
    %696 = memref.load %arg8[%c89] : memref<98xf32, #tpu.memory_space<smem>>
    %c222_i32 = arith.constant 222 : i32
    %697 = tpu.dynamic_rotate %99 by %c222_i32 dim 1 : vector<1x256xf32>, i32 -> vector<1x256xf32>
    %c222_i32_193 = arith.constant 222 : i32
    %698 = tpu.dynamic_rotate %97 by %c222_i32_193 dim 1 : vector<1x256xf32>, i32 -> vector<1x256xf32>
    %699 = vector.broadcast %695 : f32 to vector<1x256xf32>
    %700 = arith.mulf %697, %699 : vector<1x256xf32>
    %701 = vector.broadcast %696 : f32 to vector<1x256xf32>
    %702 = arith.mulf %698, %701 : vector<1x256xf32>
    %703 = arith.addf %700, %702 : vector<1x256xf32>
    %cst_194 = arith.constant 0.000000e+00 : f32
    %704 = vector.broadcast %cst_194 : f32 to vector<1x256xf32>
    %705 = arith.select %694, %703, %704 : vector<1x256xi1>, vector<1x256xf32>
    %706 = arith.addf %680, %705 : vector<1x256xf32>
    %707 = arith.andi %156, %171 : vector<1x256xi1>
    %c41 = arith.constant 41 : index
    %708 = memref.load %arg8[%c41] : memref<98xf32, #tpu.memory_space<smem>>
    %c90 = arith.constant 90 : index
    %709 = memref.load %arg8[%c90] : memref<98xf32, #tpu.memory_space<smem>>
    %c221_i32 = arith.constant 221 : i32
    %710 = tpu.dynamic_rotate %99 by %c221_i32 dim 1 : vector<1x256xf32>, i32 -> vector<1x256xf32>
    %c221_i32_195 = arith.constant 221 : i32
    %711 = tpu.dynamic_rotate %97 by %c221_i32_195 dim 1 : vector<1x256xf32>, i32 -> vector<1x256xf32>
    %712 = vector.broadcast %708 : f32 to vector<1x256xf32>
    %713 = arith.mulf %710, %712 : vector<1x256xf32>
    %714 = vector.broadcast %709 : f32 to vector<1x256xf32>
    %715 = arith.mulf %711, %714 : vector<1x256xf32>
    %716 = arith.addf %713, %715 : vector<1x256xf32>
    %cst_196 = arith.constant 0.000000e+00 : f32
    %717 = vector.broadcast %cst_196 : f32 to vector<1x256xf32>
    %718 = arith.select %707, %716, %717 : vector<1x256xi1>, vector<1x256xf32>
    %719 = arith.addf %693, %718 : vector<1x256xf32>
    %720 = arith.andi %166, %111 : vector<1x256xi1>
    %c42 = arith.constant 42 : index
    %721 = memref.load %arg8[%c42] : memref<98xf32, #tpu.memory_space<smem>>
    %c91 = arith.constant 91 : index
    %722 = memref.load %arg8[%c91] : memref<98xf32, #tpu.memory_space<smem>>
    %c211_i32 = arith.constant 211 : i32
    %723 = tpu.dynamic_rotate %99 by %c211_i32 dim 1 : vector<1x256xf32>, i32 -> vector<1x256xf32>
    %c211_i32_197 = arith.constant 211 : i32
    %724 = tpu.dynamic_rotate %97 by %c211_i32_197 dim 1 : vector<1x256xf32>, i32 -> vector<1x256xf32>
    %725 = vector.broadcast %721 : f32 to vector<1x256xf32>
    %726 = arith.mulf %723, %725 : vector<1x256xf32>
    %727 = vector.broadcast %722 : f32 to vector<1x256xf32>
    %728 = arith.mulf %724, %727 : vector<1x256xf32>
    %729 = arith.addf %726, %728 : vector<1x256xf32>
    %cst_198 = arith.constant 0.000000e+00 : f32
    %730 = vector.broadcast %cst_198 : f32 to vector<1x256xf32>
    %731 = arith.select %720, %729, %730 : vector<1x256xi1>, vector<1x256xf32>
    %732 = arith.addf %628, %731 : vector<1x256xf32>
    %733 = arith.andi %166, %121 : vector<1x256xi1>
    %c43 = arith.constant 43 : index
    %734 = memref.load %arg8[%c43] : memref<98xf32, #tpu.memory_space<smem>>
    %c92 = arith.constant 92 : index
    %735 = memref.load %arg8[%c92] : memref<98xf32, #tpu.memory_space<smem>>
    %c210_i32 = arith.constant 210 : i32
    %736 = tpu.dynamic_rotate %99 by %c210_i32 dim 1 : vector<1x256xf32>, i32 -> vector<1x256xf32>
    %c210_i32_199 = arith.constant 210 : i32
    %737 = tpu.dynamic_rotate %97 by %c210_i32_199 dim 1 : vector<1x256xf32>, i32 -> vector<1x256xf32>
    %738 = vector.broadcast %734 : f32 to vector<1x256xf32>
    %739 = arith.mulf %736, %738 : vector<1x256xf32>
    %740 = vector.broadcast %735 : f32 to vector<1x256xf32>
    %741 = arith.mulf %737, %740 : vector<1x256xf32>
    %742 = arith.addf %739, %741 : vector<1x256xf32>
    %cst_200 = arith.constant 0.000000e+00 : f32
    %743 = vector.broadcast %cst_200 : f32 to vector<1x256xf32>
    %744 = arith.select %733, %742, %743 : vector<1x256xi1>, vector<1x256xf32>
    %745 = arith.addf %615, %744 : vector<1x256xf32>
    %746 = arith.andi %166, %131 : vector<1x256xi1>
    %c44 = arith.constant 44 : index
    %747 = memref.load %arg8[%c44] : memref<98xf32, #tpu.memory_space<smem>>
    %c93 = arith.constant 93 : index
    %748 = memref.load %arg8[%c93] : memref<98xf32, #tpu.memory_space<smem>>
    %c209_i32 = arith.constant 209 : i32
    %749 = tpu.dynamic_rotate %99 by %c209_i32 dim 1 : vector<1x256xf32>, i32 -> vector<1x256xf32>
    %c209_i32_201 = arith.constant 209 : i32
    %750 = tpu.dynamic_rotate %97 by %c209_i32_201 dim 1 : vector<1x256xf32>, i32 -> vector<1x256xf32>
    %751 = vector.broadcast %747 : f32 to vector<1x256xf32>
    %752 = arith.mulf %749, %751 : vector<1x256xf32>
    %753 = vector.broadcast %748 : f32 to vector<1x256xf32>
    %754 = arith.mulf %750, %753 : vector<1x256xf32>
    %755 = arith.addf %752, %754 : vector<1x256xf32>
    %cst_202 = arith.constant 0.000000e+00 : f32
    %756 = vector.broadcast %cst_202 : f32 to vector<1x256xf32>
    %757 = arith.select %746, %755, %756 : vector<1x256xi1>, vector<1x256xf32>
    %758 = arith.addf %732, %757 : vector<1x256xf32>
    %759 = arith.andi %166, %141 : vector<1x256xi1>
    %c45 = arith.constant 45 : index
    %760 = memref.load %arg8[%c45] : memref<98xf32, #tpu.memory_space<smem>>
    %c94 = arith.constant 94 : index
    %761 = memref.load %arg8[%c94] : memref<98xf32, #tpu.memory_space<smem>>
    %c208_i32 = arith.constant 208 : i32
    %762 = tpu.dynamic_rotate %99 by %c208_i32 dim 1 : vector<1x256xf32>, i32 -> vector<1x256xf32>
    %c208_i32_203 = arith.constant 208 : i32
    %763 = tpu.dynamic_rotate %97 by %c208_i32_203 dim 1 : vector<1x256xf32>, i32 -> vector<1x256xf32>
    %764 = vector.broadcast %760 : f32 to vector<1x256xf32>
    %765 = arith.mulf %762, %764 : vector<1x256xf32>
    %766 = vector.broadcast %761 : f32 to vector<1x256xf32>
    %767 = arith.mulf %763, %766 : vector<1x256xf32>
    %768 = arith.addf %765, %767 : vector<1x256xf32>
    %cst_204 = arith.constant 0.000000e+00 : f32
    %769 = vector.broadcast %cst_204 : f32 to vector<1x256xf32>
    %770 = arith.select %759, %768, %769 : vector<1x256xi1>, vector<1x256xf32>
    %771 = arith.addf %745, %770 : vector<1x256xf32>
    %772 = arith.andi %166, %151 : vector<1x256xi1>
    %c46 = arith.constant 46 : index
    %773 = memref.load %arg8[%c46] : memref<98xf32, #tpu.memory_space<smem>>
    %c95 = arith.constant 95 : index
    %774 = memref.load %arg8[%c95] : memref<98xf32, #tpu.memory_space<smem>>
    %c207_i32 = arith.constant 207 : i32
    %775 = tpu.dynamic_rotate %99 by %c207_i32 dim 1 : vector<1x256xf32>, i32 -> vector<1x256xf32>
    %c207_i32_205 = arith.constant 207 : i32
    %776 = tpu.dynamic_rotate %97 by %c207_i32_205 dim 1 : vector<1x256xf32>, i32 -> vector<1x256xf32>
    %777 = vector.broadcast %773 : f32 to vector<1x256xf32>
    %778 = arith.mulf %775, %777 : vector<1x256xf32>
    %779 = vector.broadcast %774 : f32 to vector<1x256xf32>
    %780 = arith.mulf %776, %779 : vector<1x256xf32>
    %781 = arith.addf %778, %780 : vector<1x256xf32>
    %cst_206 = arith.constant 0.000000e+00 : f32
    %782 = vector.broadcast %cst_206 : f32 to vector<1x256xf32>
    %783 = arith.select %772, %781, %782 : vector<1x256xi1>, vector<1x256xf32>
    %784 = arith.addf %758, %783 : vector<1x256xf32>
    %785 = arith.andi %166, %161 : vector<1x256xi1>
    %c47 = arith.constant 47 : index
    %786 = memref.load %arg8[%c47] : memref<98xf32, #tpu.memory_space<smem>>
    %c96 = arith.constant 96 : index
    %787 = memref.load %arg8[%c96] : memref<98xf32, #tpu.memory_space<smem>>
    %c206_i32 = arith.constant 206 : i32
    %788 = tpu.dynamic_rotate %99 by %c206_i32 dim 1 : vector<1x256xf32>, i32 -> vector<1x256xf32>
    %c206_i32_207 = arith.constant 206 : i32
    %789 = tpu.dynamic_rotate %97 by %c206_i32_207 dim 1 : vector<1x256xf32>, i32 -> vector<1x256xf32>
    %790 = vector.broadcast %786 : f32 to vector<1x256xf32>
    %791 = arith.mulf %788, %790 : vector<1x256xf32>
    %792 = vector.broadcast %787 : f32 to vector<1x256xf32>
    %793 = arith.mulf %789, %792 : vector<1x256xf32>
    %794 = arith.addf %791, %793 : vector<1x256xf32>
    %cst_208 = arith.constant 0.000000e+00 : f32
    %795 = vector.broadcast %cst_208 : f32 to vector<1x256xf32>
    %796 = arith.select %785, %794, %795 : vector<1x256xi1>, vector<1x256xf32>
    %797 = arith.addf %771, %796 : vector<1x256xf32>
    %798 = arith.andi %166, %171 : vector<1x256xi1>
    %c48 = arith.constant 48 : index
    %799 = memref.load %arg8[%c48] : memref<98xf32, #tpu.memory_space<smem>>
    %c97 = arith.constant 97 : index
    %800 = memref.load %arg8[%c97] : memref<98xf32, #tpu.memory_space<smem>>
    %c205_i32 = arith.constant 205 : i32
    %801 = tpu.dynamic_rotate %99 by %c205_i32 dim 1 : vector<1x256xf32>, i32 -> vector<1x256xf32>
    %c205_i32_209 = arith.constant 205 : i32
    %802 = tpu.dynamic_rotate %97 by %c205_i32_209 dim 1 : vector<1x256xf32>, i32 -> vector<1x256xf32>
    %803 = vector.broadcast %799 : f32 to vector<1x256xf32>
    %804 = arith.mulf %801, %803 : vector<1x256xf32>
    %805 = vector.broadcast %800 : f32 to vector<1x256xf32>
    %806 = arith.mulf %802, %805 : vector<1x256xf32>
    %807 = arith.addf %804, %806 : vector<1x256xf32>
    %cst_210 = arith.constant 0.000000e+00 : f32
    %808 = vector.broadcast %cst_210 : f32 to vector<1x256xf32>
    %809 = arith.select %798, %807, %808 : vector<1x256xi1>, vector<1x256xf32>
    %810 = arith.addf %784, %809 : vector<1x256xf32>
    %811 = arith.addf %810, %797 : vector<1x256xf32>
    %812 = arith.addf %719, %706 : vector<1x256xf32>
    %813 = arith.addf %811, %812 : vector<1x256xf32>
    %c0_211 = arith.constant 0 : index
    %814 = memref.load %arg9[%c0_211] : memref<2xf32, #tpu.memory_space<smem>>
    %815 = vector.broadcast %814 : f32 to vector<1x256xf32>
    %816 = arith.mulf %813, %815 : vector<1x256xf32>
    %c1_212 = arith.constant 1 : index
    %817 = memref.load %arg9[%c1_212] : memref<2xf32, #tpu.memory_space<smem>>
    %818 = vector.broadcast %817 : f32 to vector<1x256xf32>
    %819 = arith.addf %816, %818 : vector<1x256xf32>
    %820 = arith.negf %819 : vector<1x256xf32>
    %821 = math.exp %820 : vector<1x256xf32>
    %cst_213 = arith.constant 1.000000e+00 : f32
    %822 = vector.broadcast %cst_213 : f32 to vector<1x256xf32>
    %823 = arith.addf %822, %821 : vector<1x256xf32>
    %824 = arith.divf %822, %823 : vector<1x256xf32>
    %c0_214 = arith.constant 0 : index
    %c0_215 = arith.constant 0 : index
    %c0_216 = arith.constant 0 : index
    %825 = vector.load %arg1[%c0_214, %c0_215, %c0_216] : memref<1x32x256xf32, #tpu.memory_space<vmem>>, vector<1x8x256xf32>
    %826 = vector.shape_cast %825 : vector<1x8x256xf32> to vector<8x256xf32>
    %c0_217 = arith.constant 0 : index
    %c0_218 = arith.constant 0 : index
    %827 = vector.load %arg13[%c0_217, %c0_218] : memref<32x1xf32, #tpu.memory_space<vmem>>, vector<8x1xf32>
    %828 = vector.broadcast %827 : vector<8x1xf32> to vector<8x256xf32>
    %829 = arith.mulf %826, %828 : vector<8x256xf32>
    %830 = vector.broadcast %824 : vector<1x256xf32> to vector<8x256xf32>
    %831 = arith.mulf %829, %830 : vector<8x256xf32>
    %c0_219 = arith.constant 0 : index
    %c0_220 = arith.constant 0 : index
    %c0_221 = arith.constant 0 : index
    %832 = vector.load %arg10[%c0_219, %c0_220, %c0_221] : memref<1x32x256xf32, #tpu.memory_space<vmem>>, vector<1x8x256xf32>
    %833 = vector.shape_cast %832 : vector<1x8x256xf32> to vector<8x256xf32>
    %834 = vector.shape_cast %831 : vector<8x256xf32> to vector<1x8x256xf32>
    tpu.vector_store %arg10[%c0_219, %c0_220, %c0_221], %834 {strides = array<i32>} : memref<1x32x256xf32, #tpu.memory_space<vmem>>, vector<1x8x256xf32>,
    %c0_222 = arith.constant 0 : index
    %c8_223 = arith.constant 8 : index
    %c0_224 = arith.constant 0 : index
    %835 = vector.load %arg1[%c0_222, %c8_223, %c0_224] : memref<1x32x256xf32, #tpu.memory_space<vmem>>, vector<1x8x256xf32>
    %836 = vector.shape_cast %835 : vector<1x8x256xf32> to vector<8x256xf32>
    %c8_225 = arith.constant 8 : index
    %c0_226 = arith.constant 0 : index
    %837 = vector.load %arg13[%c8_225, %c0_226] : memref<32x1xf32, #tpu.memory_space<vmem>>, vector<8x1xf32>
    %838 = vector.broadcast %837 : vector<8x1xf32> to vector<8x256xf32>
    %839 = arith.mulf %836, %838 : vector<8x256xf32>
    %840 = vector.broadcast %824 : vector<1x256xf32> to vector<8x256xf32>
    %841 = arith.mulf %839, %840 : vector<8x256xf32>
    %c0_227 = arith.constant 0 : index
    %c8_228 = arith.constant 8 : index
    %c0_229 = arith.constant 0 : index
    %842 = vector.load %arg10[%c0_227, %c8_228, %c0_229] : memref<1x32x256xf32, #tpu.memory_space<vmem>>, vector<1x8x256xf32>
    %843 = vector.shape_cast %842 : vector<1x8x256xf32> to vector<8x256xf32>
    %844 = vector.shape_cast %841 : vector<8x256xf32> to vector<1x8x256xf32>
    tpu.vector_store %arg10[%c0_227, %c8_228, %c0_229], %844 {strides = array<i32>} : memref<1x32x256xf32, #tpu.memory_space<vmem>>, vector<1x8x256xf32>,
    %c0_230 = arith.constant 0 : index
    %c16_231 = arith.constant 16 : index
    %c0_232 = arith.constant 0 : index
    %845 = vector.load %arg1[%c0_230, %c16_231, %c0_232] : memref<1x32x256xf32, #tpu.memory_space<vmem>>, vector<1x8x256xf32>
    %846 = vector.shape_cast %845 : vector<1x8x256xf32> to vector<8x256xf32>
    %c16_233 = arith.constant 16 : index
    %c0_234 = arith.constant 0 : index
    %847 = vector.load %arg13[%c16_233, %c0_234] : memref<32x1xf32, #tpu.memory_space<vmem>>, vector<8x1xf32>
    %848 = vector.broadcast %847 : vector<8x1xf32> to vector<8x256xf32>
    %849 = arith.mulf %846, %848 : vector<8x256xf32>
    %850 = vector.broadcast %824 : vector<1x256xf32> to vector<8x256xf32>
    %851 = arith.mulf %849, %850 : vector<8x256xf32>
    %c0_235 = arith.constant 0 : index
    %c16_236 = arith.constant 16 : index
    %c0_237 = arith.constant 0 : index
    %852 = vector.load %arg10[%c0_235, %c16_236, %c0_237] : memref<1x32x256xf32, #tpu.memory_space<vmem>>, vector<1x8x256xf32>
    %853 = vector.shape_cast %852 : vector<1x8x256xf32> to vector<8x256xf32>
    %854 = vector.shape_cast %851 : vector<8x256xf32> to vector<1x8x256xf32>
    tpu.vector_store %arg10[%c0_235, %c16_236, %c0_237], %854 {strides = array<i32>} : memref<1x32x256xf32, #tpu.memory_space<vmem>>, vector<1x8x256xf32>,
    %c0_238 = arith.constant 0 : index
    %c24_239 = arith.constant 24 : index
    %c0_240 = arith.constant 0 : index
    %855 = vector.load %arg1[%c0_238, %c24_239, %c0_240] : memref<1x32x256xf32, #tpu.memory_space<vmem>>, vector<1x8x256xf32>
    %856 = vector.shape_cast %855 : vector<1x8x256xf32> to vector<8x256xf32>
    %c24_241 = arith.constant 24 : index
    %c0_242 = arith.constant 0 : index
    %857 = vector.load %arg13[%c24_241, %c0_242] : memref<32x1xf32, #tpu.memory_space<vmem>>, vector<8x1xf32>
    %858 = vector.broadcast %857 : vector<8x1xf32> to vector<8x256xf32>
    %859 = arith.mulf %856, %858 : vector<8x256xf32>
    %860 = vector.broadcast %824 : vector<1x256xf32> to vector<8x256xf32>
    %861 = arith.mulf %859, %860 : vector<8x256xf32>
    %c0_243 = arith.constant 0 : index
    %c24_244 = arith.constant 24 : index
    %c0_245 = arith.constant 0 : index
    %862 = vector.load %arg10[%c0_243, %c24_244, %c0_245] : memref<1x32x256xf32, #tpu.memory_space<vmem>>, vector<1x8x256xf32>
    %863 = vector.shape_cast %862 : vector<1x8x256xf32> to vector<8x256xf32>
    %864 = vector.shape_cast %861 : vector<8x256xf32> to vector<1x8x256xf32>
    tpu.vector_store %arg10[%c0_243, %c24_244, %c0_245], %864 {strides = array<i32>} : memref<1x32x256xf32, #tpu.memory_space<vmem>>, vector<1x8x256xf32>,
    return
  }
  func.func @transform_0(%arg0: i32) -> (i32, i32, i32) {
    %c0_i32 = arith.constant 0 : i32
    %c0_i32_0 = arith.constant 0 : i32
    %c0_i32_1 = arith.constant 0 : i32
    return %arg0, %c0_i32, %c0_i32_0 : i32, i32, i32
  }
  func.func @transform_1(%arg0: i32) -> (i32, i32) {
    %c0_i32 = arith.constant 0 : i32
    %c0_i32_0 = arith.constant 0 : i32
    %c0_i32_1 = arith.constant 0 : i32
    return %c0_i32, %c0_i32_0 : i32, i32
  }
  func.func @transform_2(%arg0: i32) -> (i32, i32) {
    %c0_i32 = arith.constant 0 : i32
    %c0_i32_0 = arith.constant 0 : i32
    %c0_i32_1 = arith.constant 0 : i32
    return %c0_i32, %c0_i32_0 : i32, i32
  }
  func.func @transform_3(%arg0: i32) -> (i32, i32) {
    %c0_i32 = arith.constant 0 : i32
    %c0_i32_0 = arith.constant 0 : i32
    %c0_i32_1 = arith.constant 0 : i32
    return %c0_i32, %c0_i32_0 : i32, i32
  }
  func.func @transform_4(%arg0: i32) -> (i32, i32) {
    %c0_i32 = arith.constant 0 : i32
    %c0_i32_0 = arith.constant 0 : i32
    %c0_i32_1 = arith.constant 0 : i32
    return %c0_i32, %c0_i32_0 : i32, i32
  }
  func.func @transform_5(%arg0: i32) -> (i32, i32) {
    %c0_i32 = arith.constant 0 : i32
    %c0_i32_0 = arith.constant 0 : i32
    %c0_i32_1 = arith.constant 0 : i32
    return %c0_i32, %c0_i32_0 : i32, i32
  }
  func.func @transform_6(%arg0: i32) -> (i32, i32) {
    %c0_i32 = arith.constant 0 : i32
    %c0_i32_0 = arith.constant 0 : i32
    %c0_i32_1 = arith.constant 0 : i32
    return %c0_i32, %c0_i32_0 : i32, i32
  }
  func.func @transform_7(%arg0: i32) -> i32 {
    %c0_i32 = arith.constant 0 : i32
    %c0_i32_0 = arith.constant 0 : i32
    return %c0_i32 : i32
  }
  func.func @transform_8(%arg0: i32) -> i32 {
    %c0_i32 = arith.constant 0 : i32
    %c0_i32_0 = arith.constant 0 : i32
    return %c0_i32 : i32
  }
  func.func @transform_9(%arg0: i32) -> (i32, i32, i32) {
    %c0_i32 = arith.constant 0 : i32
    %c0_i32_0 = arith.constant 0 : i32
    %c0_i32_1 = arith.constant 0 : i32
    return %arg0, %c0_i32, %c0_i32_0 : i32, i32, i32
  }
}

</mosaic_0001>

<bundles_post_ra>
// kernel: tpu_custom_call.1
= control target key start
LH: loop header
LB: loop body
LE: loop exit
PB: predicated region body
PF: predicated region fallthrough
CT: control target
= control target key end

     0   :  { %s6646_s0 = inlined_call_operand.hbm [shape: f32[2,32,256], index: 0, kind: input, shape index: {}]   ;;  %s6647_s1 = inlined_call_operand.vmem [shape: f32[2,32], index: 1, kind: input, shape index: {}]   ;;  %s6648_s2 = inlined_call_operand.vmem [shape: f32[2,1], index: 2, kind: input, shape index: {}]   ;;  %s6649_s3 = inlined_call_operand.vmem [shape: f32[32,2], index: 3, kind: input, shape index: {}]   ;;  %s6650_s4 = inlined_call_operand.vmem [shape: f32[32,1], index: 4, kind: input, shape index: {}]   ;;  %s6651_s5 = inlined_call_operand.vmem [shape: s32[1,256], index: 5, kind: input, shape index: {}]   ;;  %s6652_s6 = inlined_call_operand.vmem [shape: s32[1,256], index: 6, kind: input, shape index: {}]   ;;  %s6653_s7 = inlined_call_operand.vmem [shape: f32[98], index: 7, kind: input, shape index: {}]   ;;  %s6654_s8 = inlined_call_operand.vmem [shape: f32[2], index: 8, kind: input, shape index: {}]   ;;  %s6655_s9 = inlined_call_operand.hbm [shape: f32[2,32,256], index: 9, kind: output, shape index: {}]  }
   0x1   :  { %6843 = sst [smem:[#allocation95_spill]] %s6646_s0 }
   0x2   :  { %6844 = sst [smem:[#allocation96_spill]] %s6647_s1 }
   0x3   :  { %6845 = sst [smem:[#allocation97_spill]] %s6648_s2 }
   0x4   :  { %6846 = sst [smem:[#allocation98_spill]] %s6649_s3 }
   0x5   :  { %6847 = sst [smem:[#allocation99_spill]] %s6650_s4 }
   0x6   :  { %6848 = sst [smem:[#allocation100_spill]] %s6651_s5 }
   0x7   :  { %6849 = sst [smem:[#allocation101_spill]] %s6652_s6 }
   0x8   :  { %6850 = sst [smem:[#allocation102_spill]] %s6653_s7 }
   0x9   :  { %6851 = sst [smem:[#allocation103_spill]] %s6654_s8 }
   0xa   :  { %6852 = sst [smem:[#allocation104_spill]] %s6655_s9 }
   0xb   :  { %14 = vsyncpa [#allocation6], 0 }
   0xc   :  { %16 = vsyncpa [#allocation6 + $0x1], 0 }
   0xd   :  { %17 = vsyncpa [#allocation8], 0 }
   0xe   :  { %18 = vsyncpa [#allocation11], 0 }
   0xf   :  { %19 = vsyncpa [#allocation7], 0 }
  0x10   :  { %21 = vsyncpa [#allocation7 + $0x1], 0  ;;  %s3727_s30 = smov 0   ;;  %s3729_s10 = smov 0  }
  0x11   :  { %s3731_s11 = smov 0   ;;  %s3733_s12 = smov 0  }
  0x12 LB: > { %6853 = sst [smem:[#allocation17_spill]] %s3603_s30  ;;  %s3748_s13 = sadd.s32 4294967295, %s3615_s12   ;;  %s3615_s12 = sphi %s3733_s12, %s7321_s12   ;;  %s3611_s11 = sphi %s3731_s11, %s7324_s11   ;;  %s3607_s10 = sphi %s3729_s10, %s7323_s10   ;;  %s3603_s30 = sphi %s3727_s30, %s7322_s30  }
  0x13   : > { %6854 = sst [smem:[#allocation18_spill]] %s3607_s10  ;;  %s3161_s14 = sadd.s32 4294967294, %s3615_s12  }
  0x14   : > { %6855 = sst [smem:[#allocation19_spill]] %s3611_s11  ;;  %s3752_s15 = sadd.s32 1, %s3615_s12  }
  0x15   : > { %6856 = sst [smem:[#allocation20_spill]] %s3615_s12  ;;  %s34_s16 = sadd.s32 1, %s3611_s11 }
  0x16   : > { %6857 = sst [smem:[#allocation21_spill]] %s3748_s13  ;;  %s31_s17 = ssub.s32 %s3615_s12, %s3752_s15 }
  0x17   : > { %6858 = sst [smem:[#allocation22_spill]] %s3752_s15  ;;  %p41_p0 = scmp.ne.s32.totalorder %s3611_s11, %s3607_s10 }
  0x18   : > { %p32_p1 = scmp.eq.s32.totalorder %s31_s17, 0  ;;  %p42_p2 = scmp.eq.s32.totalorder %s3615_s12, 0 }
  0x19   : > { %p47_p3 = scmp.ne.s32.totalorder %s3607_s10, %s3603_s30  ;;  %p6656_p4 = scmp.eq.s32.totalorder %s3748_s13, 0 }
  0x1a   : > { %s3764_s18 = scalar_select %p32_p1, %s3611_s11, %s34_s16  }
  0x1b   : > { %p3766_p5 = por %p42_p2, %p41_p0  ;;  %p3772_p6 = por %p6656_p4, %p47_p3 }
  0x1c   : > { %6859 = sst [smem:[#allocation23_spill]] %s3764_s18  ;;  %p239_p7 = scmp.eq.s32.totalorder %s3748_s13, 1 }
  0x1d   : > { %s6861_s20 = scalar_select %p3772_p6, 1, 0 }
  0x1e   : > { %p245_p8 = scmp.eq.s32.totalorder %s3161_s14, 1  ;;  %p3162_p9 = scmp.ge.s32.totalorder %s3615_s12, 1 }
  0x1f   : > { %p252_p10 = scmp.lt.s32.totalorder %s3615_s12, 3  ;;  %p3779_p11 = por %p239_p7, %p41_p0 }
  0x20   : > { %p3783_p12 = por %p245_p8, %p47_p3  ;;  %s6867_s7 = sld [smem:[#allocation102_spill]] }
  0x21   : > { %s6862_s21 = scalar_select %p3779_p11, 1, 0 }
  0x22   : > { %s6864_s22 = scalar_select %p3783_p12, 1, 0 }
  0x23   : > { %6863 = sst [smem:[#allocation24_spill]] %s6862_s21  ;;  %p3787_p13 = pnand %p3162_p9, %p252_p10 }
  0x24   : > { %6865 = sst [smem:[#allocation25_spill]] %s6864_s22  ;;  %p3354_p2 = scmp.lt.s32.totalorder %s3615_s12, 2 }
  0x25   : > { %s6866_s23 = scalar_select %p3787_p13, 1, 0 }
  0x26   : > { %s283_s26 = sshll.u32 %s6867_s7, 4  ;;  %p3337_p1 = pneg %p3787_p13  ;;  %s284_s26 = int_to_ptr.vmem [resolvable:$true] %s283_s26 }
  0x27   : > { %s6869_s8 = sld [smem:[#allocation103_spill]]  ;;  %p3809_p3 = pnand %p3354_p2, %p3766_p5 }
  0x28   : > { %p3800_p7 = pnand %p3337_p1, %p6656_p4  ;;  %s3481_s17 = scalar_lea.vmem %s284_s26, 16 }
  0x29   : > { %s6870_s16 = scalar_select %p3809_p3, 1, 0 }
  0x2a   : > { %p3482_p8 = scmp.ne.s32.totalorder %s284_s26, %s3481_s17  ;;  %p3483_p9 = pneg %p3800_p7 }
  0x2b   : > { %p3489_p0 = scmp.lt.s32.totalorder %s284_s26, %s284_s26  ;;  %p3490_p4 = scmp.lt.s32.totalorder %s3481_s17, %s3481_s17 }
  0x2c   : > { %p3484_p10 = pnand %p3483_p9, %p3482_p8 }
  0x2d   : > { %s294_s14 = sshll.u32 %s6869_s8, 4  ;;  %p3491_p12 = por %p3490_p4, %p3489_p0  ;;  %s295_s14 = int_to_ptr.vmem [resolvable:$true] %s294_s14 }
  0x2e   : > { %p3485_p1 = pneg %p3484_p10 }
  0x30   : > { %p3492_p11 = pnand %p3491_p12, %p3485_p1 }
  0x32   : > { %3495 = shalt.err (!%p3492_p11)
}
  0x33   : > { %s3617_s24 = smov [#allocation9]   ;;  %s305_s19 = sand.u32 1, %s3611_s11  }
  0x34   : > { %3340 = dma.vmem_to_smem (!%p3800_p7), %s284_s26, 16, %s3617_s24, [#allocation8]  }
  0x35   : > { %s3496_s25 = scalar_lea.vmem %s295_s14, 16  ;;  %p3504_p8 = scmp.lt.s32.totalorder %s295_s14, %s295_s14 }
  0x36   : > { %p3497_p5 = scmp.ne.s32.totalorder %s295_s14, %s3496_s25  ;;  %p3505_p10 = scmp.lt.s32.totalorder %s3496_s25, %s3496_s25 }
  0x38   : > { %p3499_p2 = pnand %p3497_p5, %p3483_p9  ;;  %p3506_p13 = por %p3505_p10, %p3504_p8 }
  0x3a   : > { %p3500_p6 = pneg %p3499_p2 }
  0x3c   : > { %p3507_p3 = pnand %p3506_p13, %p3500_p6 }
  0x3e   : > { %3510 = shalt.err (!%p3507_p3)
}
  0x3f   : > { %s3618_s28 = smov [#allocation10]   ;;  %s3166_s26 = sshll.u32 %s305_s19, 6 }
  0x40   : > { %3343 = dma.vmem_to_smem (!%p3800_p7), %s295_s14, 16, %s3618_s28, [#allocation11]  }
  0x41   : > { %s3288_s29 = sshll.u32 %s3615_s12, 10  ;;  %s6871_s0 = sld [smem:[#allocation95_spill]] }
  0x42   : > { %s309_s25 = scalar_lea.vmem [#allocation5], %s3166_s26  ;;  %s3834_s27 = scalar_lea.sflag [#allocation6], %s305_s19 }
  0x43   : > { %s316_s8 = sshll.u32 %s309_s25, 4  ;;  %p6872_p6 = scmp.ne.s32.totalorder %s6870_s16, 0  ;;  %s3832_s8 = int_to_ptr.vmem [resolvable:$true] %s316_s8 }
  0x45   : > { %p3513_p11 = pneg %p6872_p6 }
  0x47   : > { %s3830_s7 = scalar_lea.hbm %s6871_s0, %s3288_s29  ;;  %s3516_s29 = scalar_lea.hbm %s6871_s0, 2048 }
  0x48   : > { %s3511_s18 = scalar_lea.hbm %s3830_s7, 1024  ;;  %p3517_p0 = scmp.lt.u32.totalorder %s3830_s7, %s6871_s0 }
  0x49   : > { %p3512_p4 = scmp.ne.s32.totalorder %s3830_s7, %s3511_s18  ;;  %p3518_p7 = scmp.lt.u32.totalorder %s3516_s29, %s3511_s18 }
  0x4a   : > { %p3520_p9 = scmp.lt.u32.totalorder %s3511_s18, %s3830_s7 }
  0x4b   : > { %p3514_p12 = pnand %p3513_p11, %p3512_p4  ;;  %p3519_p3 = por %p3518_p7, %p3517_p0 }
  0x4d   : > { %p3515_p13 = pneg %p3514_p12  ;;  %p3521_p1 = por %p3520_p9, %p3519_p3 }
  0x4f   : > { %p3522_p5 = pnand %p3521_p1, %p3515_p13 }
  0x51   : > { %3525 = shalt.err (!%p3522_p5)
}
  0x52   : > { %s3526_s19 = scalar_lea.vmem %s3832_s8, 1024  ;;  %s3619_s26 = smov [#allocation5]  }
  0x53   : > { %p3527_p2 = scmp.ne.s32.totalorder %s3832_s8, %s3526_s19  ;;  %s3531_s25 = sshll.u32 %s3619_s26, 4  ;;  %s3532_s25 = int_to_ptr.vmem [resolvable:$false] %s3531_s25 }
  0x54   : > { %s3533_s14 = scalar_lea.vmem %s3532_s25, 2048  ;;  %p3534_p4 = scmp.lt.s32.totalorder %s3832_s8, %s3532_s25 }
  0x55   : > { %p3529_p8 = pnand %p3527_p2, %p3513_p11  ;;  %p3535_p12 = scmp.lt.s32.totalorder %s3533_s14, %s3526_s19 }
  0x57   : > { %p3530_p10 = pneg %p3529_p8  ;;  %p3536_p0 = por %p3535_p12, %p3534_p4 }
  0x59   : > { %p3537_p7 = pnand %p3536_p0, %p3530_p10 }
  0x5b   : > { %3540 = shalt.err (!%p3537_p7)
}
  0x5c   : > { %s3620_s18 = smov 256   ;;  %s3621_s28 = smov 16  }
  0x5d   : > { %3347 = dma.hbm_to_vmem [thread:$0]  (!%p6872_p6), %s3830_s7, 1024, %s3832_s8, %s3834_s27, %s3620_s18, %s3620_s18, %s3621_s28  }
  0x5e   : > { %p6873_p11 = scmp.ne.s32.totalorder %s6866_s23, 0 }
  0x60   : > { %328 = sbr.rel (%p6873_p11) target bundleno = 1734 (0x6c6), region = 56 }
  0x67   : > { %s3865_s29 = sand.u32 1, %s3607_s10   ;;  %p6876_p13 = scmp.ne.s32.totalorder %s6861_s20, 0 }
  0x68   : > { %6874 = sst [smem:[#allocation26_spill]] %s3865_s29  ;;  %s6661_s17 = sshll.u32 %s3865_s29, 6 }
  0x69   : > { %s331_s24 = scalar_lea.sflag [#allocation6], %s3865_s29  ;;  %s3871_s19 = scalar_lea.vmem [#allocation5], %s6661_s17 }
  0x6a   : > { %6875 = sst [smem:[#allocation27_spill]] %s3871_s19 }
  0x6b   : > { %3586 = dma.done.wait (%p6876_p13), %s331_s24, 1024  }
  0x6c   : > { %3588 = vsyncadd (%p6876_p13), %s331_s24, 4294966272  ;;  %p6877_p6 = scmp.eq.s32.totalorder %s3748_s13, 0 }
  0x6e   : > { %3590 = dma.done.wait (%p6877_p6), [#allocation8], 16   ;;  %p6878_p3 = pmov %p6877_p6 }
  0x70   : > { %3592 = vsyncadd (%p6878_p3), [#allocation8], 4294967280  ;;  %p6879_p9 = pmov %p6878_p3 }
  0x71   : > { %p6880_p1 = pmov %p6878_p3 }
  0x72   : > { %3594 = dma.done.wait (%p6879_p9), [#allocation11], 16  }
  0x73   : > { %3596 = vsyncadd (%p6880_p1), [#allocation11], 4294967280 }
  0x74   : > { %347 = sfence }
  0x75   : > { %v3886_v0 = vld [vmem:[%s3871_s19 + $0x20] sm:$0xff]  ;;  %v3889_v1 = vld [vmem:[%s3871_s19 + $0x28] sm:$0xff]  ;;  %v3900_v5 = vld [vmem:[%s3871_s19 + $0x30] sm:$0xff]  ;;  %vm384_vm0 = vcmask 7168   ;;  %v3622_v19 = vmov 0.0|0.0   ;;  %vm3623_vm1 = vmmov 0  }
  0x76   : > { %v3892_v2 = vld [vmem:[%s3871_s19] sm:$0xff]  ;;  %v408_v3 = vmax.f32 %v3886_v0, %v3889_v1  ;;  %v3897_v4 = vld [vmem:[%s3871_s19 + $0x8] sm:$0xff]  ;;  %v3903_v6 = vld [vmem:[%s3871_s19 + $0x38] sm:$0xff]  ;;  %v403_v15 = vadd.f32 %v3889_v1, %v3886_v0  ;;  %3319 = vmatprep.subr.bf16.mxu0 %v3622_v19  ;;  %v3624_v33 = vmov 0.0   ;;  %s6690_s7 = smov 1   ;;  %v3626_v36 = vmov 0  }
  0x77   : > { %v386_v7 = vmax.f32 %v3892_v2, %v3897_v4  ;;  %v3908_v8 = vld [vmem:[%s3871_s19 + $0x10] sm:$0xff]  ;;  %v3911_v9 = vld [vmem:[%s3871_s19 + $0x18] sm:$0xff]  ;;  %v419_v10 = vmax.f32 %v3900_v5, %v3903_v6  ;;  %v380_v13 = vadd.f32 %v3897_v4, %v3892_v2  ;;  %v414_v14 = vadd.f32 %v3903_v6, %v3900_v5  ;;  %3308 = vmatprep.mubr.msk.f32.mxu0 %vm3623_vm1, %v3624_v33  ;;  %s6881_s2 = sld [smem:[#allocation97_spill]]  ;;  %s6882_s4 = sld [smem:[#allocation99_spill]] }
  0x78   : > { %409 = vmax.xlane.f32.xlu1 %v408_v3  ;;  %v397_v11 = vmax.f32 %v3908_v8, %v3911_v9  ;;  %v392_v12 = vadd.f32 %v3911_v9, %v3908_v8  ;;  %3459 = vset.pattern.permute.xlu0 %v3626_v36  ;;  %s6883_s1 = sld [smem:[#allocation96_spill]]  ;;  %vm458_vm2 = vcmask 261120   ;;  %s6884_s3 = sld [smem:[#allocation98_spill]]  ;;  %vm561_vm3 = vcmask 15360  }
  0x79   : > { %387 = vmax.xlane.f32.xlu0 %v386_v7  ;;  %3458 = vset.pattern.permute.xlu1 %v3626_v36  ;;  %vm574_vm4 = vcmask 1041408   ;;  %s6692_s28 = smov 127   ;;  %s3628_s24 = smov 51  }
  0x7a   : > { %s3629_s8 = smov 50   ;;  %s3630_s20 = smov 49  }
  0x7b   : > { %s3631_s23 = smov 48   ;;  %s3632_s16 = smov 47  }
  0x7c   : > { %420 = vmax.xlane.f32.xlu1 %v419_v10  ;;  %s3633_s27 = smov 46   ;;  %s3634_s26 = smov 45  }
  0x7d   : > { %398 = vmax.xlane.f32.xlu0 %v397_v11  ;;  %v452_v37 = vld [vmem:[%s6881_s2] sm:$0x3]  ;;  %v539_v39 = vld [vmem:[%s6882_s4 + $0x10] sm:$0xff]  ;;  %v540_v40 = vld [vmem:[%s6882_s4 + $0x18] sm:$0xff]  ;;  %s6662_s25 = smov 35   ;;  %s6664_s14 = smov 34  }
  0x7e   : > { %v537_v38 = vld [vmem:[%s6882_s4] sm:$0xff]  ;;  %v538_v59 = vld [vmem:[%s6882_s4 + $0x8] sm:$0xff]  ;;  %v535_v10 = vld [vmem:[%s6884_s3 + $0x10] sm:$0xff]  ;;  %s6666_s18 = smov 33   ;;  %s6668_s17 = smov 32  }
  0x7f   : > { %v451_v57 = vld [vmem:[%s6883_s1] sm:$0x3]  ;;  %v534_v7 = vld [vmem:[%s6884_s3 + $0x8] sm:$0xff]  ;;  %v536_v11 = vld [vmem:[%s6884_s3 + $0x18] sm:$0xff]  ;;  %s6952_s5 = sld [smem:[#allocation100_spill]]  ;;  %s4515_s2 = sld [smem:[#allocation9 + $0xc]] }
  0x80   : > { %393 = vadd.xlane.f32.xlu1 %v392_v12  ;;  %v533_v58 = vld [vmem:[%s6884_s3] sm:$0xff]  ;;  %s4517_s3 = sld [smem:[#allocation9 + $0xd]]  ;;  %s6953_s4 = smov 127  }
  0x81   : > { %381 = vadd.xlane.f32.xlu0 %v380_v13  ;;  %3313 = vmatprep.mubr.msk.f32.mxu1 %vm561_vm3, %v533_v58  ;;  %s6954_s6 = sld [smem:[#allocation101_spill]]  ;;  %s4530_s0 = sld [smem:[#allocation9 + $0xe]] }
  0x82   : > { %s4532_s1 = sld [smem:[#allocation9 + $0xf]]  ;;  %s4534_s15 = sld [smem:[#allocation9 + $0x10]] }
  0x83   : > { %s4536_s12 = sld [smem:[#allocation9 + $0x11]]  ;;  %s4544_s10 = sld [smem:[#allocation9 + $0x13]] }
  0x84   : > { %415 = vadd.xlane.f32.xlu1 %v414_v14  ;;  %s4547_s11 = sld [smem:[#allocation9 + $0x14]]  ;;  %s6959_s22 = smov 126  }
  0x85   : > { %404 = vadd.xlane.f32.xlu0 %v403_v15  ;;  %s4561_s30 = sld [smem:[#allocation9 + $0x16]]  ;;  %s4572_s21 = sld [smem:[#allocation9 + $0x1a]] }
  0x86   : > { %s4582_s9 = sld [smem:[#allocation9 + $0x1b]]  ;;  %s4584_s29 = sld [smem:[#allocation9 + $0x1c]] }
  0x87   : > { %6955 = sst [smem:[#allocation80_spill]] %s4530_s0  ;;  %s4589_s13 = sld [smem:[#allocation9 + $0x1d]] }
  0x88   : > { %s4591_s19 = sld [smem:[#allocation9 + $0x1e]]  ;;  %s6972_s0 = smov 115  }
  0x8a   : > { %6958 = sst [smem:[#allocation83_spill]] %s4547_s11  ;;  %s4649_s11 = sld [smem:[#allocation9 + $0x32]] }
  0x8e   : > { %6963 = sst [smem:[#allocation87_spill]] %s4591_s19  ;;  %s4704_s19 = sld [smem:[#allocation9 + $0x33]] }
 0x105   : > { %v410_v16 = vpop.xlane.xlu1 %409 }
 0x106   : > { %411 = vst.msk [vmem:[#allocation3 + $0x10] sm:$0xff] %vm384_vm0, %v410_v16  ;;  %v388_v17 = vpop.xlane.xlu0 %387 }
 0x107   : > { %389 = vst.msk [vmem:[#allocation3] sm:$0xff] %vm384_vm0, %v388_v17 }
 0x109   : > { %v421_v18 = vpop.xlane.xlu1 %420 }
 0x10a   : > { %422 = vst.msk [vmem:[#allocation3 + $0x18] sm:$0xff] %vm384_vm0, %v421_v18  ;;  %v399_v20 = vpop.xlane.xlu0 %398 }
 0x10b   : > { %400 = vst.msk [vmem:[#allocation3 + $0x8] sm:$0xff] %vm384_vm0, %v399_v20 }
 0x10d   : > { %v394_v21 = vpop.xlane.xlu1 %393  ;;  %v429_v24 = vld [vmem:[#allocation3 + $0x10] sm:$0xff] }
 0x10e   : > { %v395_v22 = vmul.f32 0.00390625, %v394_v21  ;;  %v382_v23 = vpop.xlane.xlu0 %381  ;;  %v427_v29 = vld [vmem:[#allocation3] sm:$0xff] }
 0x10f   : > { %v383_v25 = vmul.f32 0.00390625, %v382_v23 }
 0x110   : > { %396 = vst.msk [vmem:[#allocation2 + $0x8] sm:$0xff] %vm384_vm0, %v395_v22 }
 0x111   : > { %v430_v26 = vld [vmem:[#allocation3 + $0x18] sm:$0xff]  ;;  %385 = vst.msk [vmem:[#allocation2] sm:$0xff] %vm384_vm0, %v383_v25  ;;  %v416_v27 = vpop.xlane.xlu1 %415 }
 0x112   : > { %v3453_v28 = vpack.i.bf16 %v430_v26, %v429_v24  ;;  %v428_v30 = vld [vmem:[#allocation3 + $0x8] sm:$0xff]  ;;  %v417_v31 = vmul.f32 0.00390625, %v416_v27  ;;  %v405_v32 = vpop.xlane.xlu0 %404 }
 0x113   : > { %v3448_v34 = vpack.i.bf16 %v428_v30, %v427_v29  ;;  %v406_v35 = vmul.f32 0.00390625, %v405_v32 }
 0x114   : > { %3454 = vrot.lane.b32.xlu1 %v3453_v28, %s6690_s7  ;;  %418 = vst.msk [vmem:[#allocation2 + $0x18] sm:$0xff] %vm384_vm0, %v417_v31 }
 0x115   : > { %3449 = vrot.lane.b32.xlu0 %v3448_v34, %s6690_s7  ;;  %407 = vst.msk [vmem:[#allocation2 + $0x10] sm:$0xff] %vm384_vm0, %v406_v35 }
 0x117   : > { %v424_v44 = vld [vmem:[#allocation2 + $0x8] sm:$0xff] }
 0x118   : > { %455 = vperm.xlu1 %3458, %v452_v37   ;;  %v423_v43 = vld [vmem:[#allocation2] sm:$0xff] }
 0x119   : > { %548 = vperm.xlu0 %3459, %v538_v59  }
 0x11b   : > { %v426_v50 = vld [vmem:[#allocation2 + $0x18] sm:$0xff] }
 0x11c   : > { %543 = vperm.xlu1 %3458, %v537_v38   ;;  %v425_v49 = vld [vmem:[#allocation2 + $0x10] sm:$0xff] }
 0x120   : > { %553 = vperm.xlu1 %3458, %v539_v39  }
 0x124   : > { %558 = vperm.xlu1 %3458, %v540_v40  }
 0x186   : > { %v3455_v41 = vpop.permute.xlu1 %3454 }
 0x187   : > { %v3450_v42 = vpop.permute.xlu0 %3449  ;;  %v3457_v45 = vunpack.i.h.bf16 %v3455_v41  ;;  %v3456_v46 = vunpack.i.l.bf16 %v3455_v41 }
 0x188   : > { %v3452_v47 = vunpack.i.h.bf16 %v3450_v42  ;;  %v3451_v48 = vunpack.i.l.bf16 %v3450_v42 }
 0x189   : > { %v449_v54 = vsel %vm384_vm0, %v425_v49, %v3456_v46  ;;  %v450_v55 = vsel %vm384_vm0, %v426_v50, %v3457_v45 }
 0x18a   : > { %v447_v51 = vsel %vm384_vm0, %v423_v43, %v3451_v48  ;;  %v448_v52 = vsel %vm384_vm0, %v424_v44, %v3452_v47  ;;  %v3323_v56 = vpack.c.bf16 %v450_v55, %v449_v54 }
 0x18b   : > { %v3320_v53 = vpack.c.bf16 %v448_v52, %v447_v51 }
 0x18d   : > { %3321 = vmatpush3.bf16.msra.mxu0 %v3320_v53 }
 0x18e   : > { %3322 = vmatprep.subr.bf16.mxu0 %v3622_v19 }
 0x191   : > { %3324 = vmatpush3.bf16.msra.mxu0 %v3323_v56 }
 0x194   : > { %3309 = vmatmul.mubr.msk.f32.vlgmr.msra.gmra.mrb[0].mxu0 %vm458_vm2, %v451_v57 }
 0x197   : > { %v456_v60 = vpop.permute.xlu1 %455 }
 0x198   : > { %v549_v14 = vpop.permute.xlu0 %548 }
 0x19b   : > { %v544_v12 = vpop.permute.xlu1 %543 }
 0x19f   : > { %v554_v13 = vpop.permute.xlu1 %553 }
 0x1a3   : > { %v559_v19 = vpop.permute.xlu1 %558 }
 0x267   : > { %v528_v61 = vpop.f32.mrb[0].mxu0 }
 0x268   : > { %v529_v62 = vadd.f32 %v528_v61, %v456_v60  ;;  %v3310_v63 = vpop.f32.mrb[1].mxu0 }
 0x26a   : > { %v532_v3 = vmax.f32 %v529_v62, 0.0 }
 0x26c   : > { %3311 = vmatprep.subr.msk.mxu1 %vm574_vm4, %v532_v3 }
 0x26d   : > { %3312 = vmatpush3.msk.msra.mxu1 %vm574_vm4, %v532_v3 }
 0x26e   : > { %3314 = vmatmul.mubr.msk.f32.vlgmr.msra.gmra.mrb[0].mxu1 %vm561_vm3, %v534_v7 }
 0x26f   : > { %3316 = vmatprep.mubr.msk.f32.mxu1 %vm561_vm3, %v535_v10 }
 0x272   : > { %3317 = vmatmul.mubr.msk.f32.gmra.mrb[2].mxu1 %vm561_vm3, %v536_v11 }
 0x341   : > { %v3315_v15 = vpop.f32.mrb[0].mxu1 }
 0x342   : > { %v650_v16 = vadd.f32 %v3315_v15, %v549_v14  ;;  %v644_v17 = vpop.f32.mrb[1].mxu1 }
 0x343   : > { %v645_v18 = vadd.f32 %v644_v17, %v544_v12 }
 0x344   : > { %669 = vrot.lane.b32.xlu1 %v650_v16, %s6692_s28 }
 0x345   : > { %v3318_v20 = vpop.f32.mrb[2].mxu1  ;;  %667 = vrot.lane.b32.xlu0 %v645_v18, %s6692_s28 }
 0x346   : > { %v660_v21 = vadd.f32 %v3318_v20, %v559_v19  ;;  %v654_v22 = vpop.f32.mrb[3].mxu1 }
 0x347   : > { %v655_v23 = vadd.f32 %v654_v22, %v554_v13 }
 0x348   : > { %673 = vrot.lane.b32.xlu1 %v660_v21, %s6692_s28 }
 0x349   : > { %671 = vrot.lane.b32.xlu0 %v655_v23, %s6692_s28 }
 0x3b6   : > { %v670_v24 = vpop.permute.xlu1 %669 }
 0x3b7   : > { %v680_v25 = vadd.f32 %v670_v24, %v650_v16  ;;  %v668_v26 = vpop.permute.xlu0 %667 }
 0x3b8   : > { %v679_v27 = vadd.f32 %v668_v26, %v645_v18 }
 0x3b9   : > { %v3181_v28 = vmul.f32 -1.442695, %v680_v25 }
 0x3ba   : > { %v3180_v29 = vmul.f32 -1.442695, %v679_v27  ;;  %v674_v30 = vpop.permute.xlu1 %673 }
 0x3bb   : > { %3460 = vpow2.f32 %v3181_v28  ;;  %v682_v31 = vadd.f32 %v674_v30, %v660_v21  ;;  %v672_v32 = vpop.permute.xlu0 %671 }
 0x3bc   : > { %3462 = vpow2.f32 %v3180_v29  ;;  %v681_v33 = vadd.f32 %v672_v32, %v655_v23 }
 0x3bd   : > { %v3183_v34 = vmul.f32 -1.442695, %v682_v31 }
 0x3be   : > { %v3182_v35 = vmul.f32 -1.442695, %v681_v33 }
 0x3bf   : > { %3464 = vpow2.f32 %v3183_v34 }
 0x3c0   : > { %3466 = vpow2.f32 %v3182_v35 }
 0x3c5   : > { %v3461_v36 = vpop.eup %3460 }
 0x3c6   : > { %v3463_v37 = vpop.eup %3462  ;;  %v696_v38 = vadd.f32 1.0, %v3461_v36 }
 0x3c7   : > { %v695_v39 = vadd.f32 1.0, %v3463_v37 }
 0x3c8   : > { %3468 = vrcp.f32 %v696_v38 }
 0x3c9   : > { %v3465_v40 = vpop.eup %3464  ;;  %3470 = vrcp.f32 %v695_v39 }
 0x3ca   : > { %v3467_v41 = vpop.eup %3466  ;;  %v698_v42 = vadd.f32 1.0, %v3465_v40 }
 0x3cb   : > { %v697_v43 = vadd.f32 1.0, %v3467_v41 }
 0x3cc   : > { %3472 = vrcp.f32 %v698_v42 }
 0x3cd   : > { %3474 = vrcp.f32 %v697_v43 }
 0x3d2   : > { %v3469_v44 = vpop.eup %3468 }
 0x3d3   : > { %v3471_v45 = vpop.eup %3470  ;;  %708 = vst.msk [vmem:[#allocation4 + $0x8] sm:$0xff] %vm384_vm0, %v3469_v44 }
 0x3d4   : > { %707 = vst.msk [vmem:[#allocation4] sm:$0xff] %vm384_vm0, %v3471_v45 }
 0x3d6   : > { %v3473_v46 = vpop.eup %3472 }
 0x3d7   : > { %v3475_v47 = vpop.eup %3474  ;;  %710 = vst.msk [vmem:[#allocation4 + $0x18] sm:$0xff] %vm384_vm0, %v3473_v46 }
 0x3d8   : > { %709 = vst.msk [vmem:[#allocation4 + $0x10] sm:$0xff] %vm384_vm0, %v3475_v47 }
 0x3da   : > { %v725_v48 = vld [vmem:[#allocation4 + $0x8] sm:$0xff] }
 0x3db   : > { %728 = vperm.xlu1 %3458, %v725_v48   ;;  %v713_v49 = vld [vmem:[#allocation4] sm:$0xff] }
 0x3dc   : > { %716 = vperm.xlu0 %3459, %v713_v49  }
 0x3de   : > { %v753_v50 = vld [vmem:[#allocation4 + $0x18] sm:$0xff] }
 0x3df   : > { %756 = vperm.xlu1 %3458, %v753_v50   ;;  %v739_v51 = vld [vmem:[#allocation4 + $0x10] sm:$0xff] }
 0x3e0   : > { %742 = vperm.xlu0 %3459, %v739_v51  }
 0x45a   : > { %v729_v52 = vpop.permute.xlu1 %728 }
 0x45b   : > { %v731_v53 = vmul.f32 %v729_v52, %v3908_v8  ;;  %v732_v54 = vmul.f32 %v729_v52, %v3911_v9  ;;  %v717_v55 = vpop.permute.xlu0 %716 }
 0x45c   : > { %v3984_v56 = vmul.f32 %v717_v55, %v3892_v2  ;;  %v3987_v57 = vmul.f32 %v717_v55, %v3897_v4 }
 0x45e   : > { %6885 = vst [vmem:[#allocation28_spill] sm:$0xff] %v3984_v56  ;;  %6886 = vst [vmem:[#allocation29_spill] sm:$0xff] %v3987_v57  ;;  %v757_v58 = vpop.permute.xlu1 %756  ;;  %v733_v59 = vadd.f32 %v731_v53, %v3984_v56  ;;  %v734_v60 = vadd.f32 %v732_v54, %v3987_v57  ;;  %v735_v62 = vmax.f32 %v3984_v56, %v731_v53 }
 0x45f   : > { %v743_v61 = vpop.permute.xlu0 %742  ;;  %v736_v63 = vmax.f32 %v3987_v57, %v732_v54  ;;  %v759_v2 = vmul.f32 %v757_v58, %v3900_v5  ;;  %v760_v3 = vmul.f32 %v757_v58, %v3903_v6 }
 0x460   : > { %v745_v8 = vmul.f32 %v743_v61, %v3886_v0  ;;  %v746_v9 = vmul.f32 %v743_v61, %v3889_v1 }
 0x462   : > { %v747_v4 = vadd.f32 %v745_v8, %v733_v59  ;;  %v748_v7 = vadd.f32 %v746_v9, %v734_v60  ;;  %v749_v10 = vmax.f32 %v735_v62, %v745_v8  ;;  %v750_v11 = vmax.f32 %v736_v63, %v746_v9 }
 0x464   : > { %v3997_v12 = vadd.f32 %v759_v2, %v747_v4  ;;  %v3999_v13 = vadd.f32 %v760_v3, %v748_v7  ;;  %v763_v14 = vmax.f32 %v749_v10, %v759_v2  ;;  %v764_v15 = vmax.f32 %v750_v11, %v760_v3 }
 0x466   : > { %v779_v16 = vrot.slane %v763_v14, 4  ;;  %v785_v17 = vrot.slane %v764_v15, 4  ;;  %v765_v50 = vrot.slane %v3997_v12, 4  ;;  %v771_v51 = vrot.slane %v3999_v13, 4 }
 0x468   : > { %v780_v18 = vmax.f32 %v763_v14, %v779_v16  ;;  %v786_v0 = vmax.f32 %v764_v15, %v785_v17  ;;  %v766_v54 = vadd.f32 %v765_v50, %v3997_v12  ;;  %v772_v55 = vadd.f32 %v771_v51, %v3999_v13 }
 0x46a   : > { %v781_v19 = vrot.slane %v780_v18, 2  ;;  %v787_v1 = vrot.slane %v786_v0, 2  ;;  %v767_v60 = vrot.slane %v766_v54, 2  ;;  %v773_v61 = vrot.slane %v772_v55, 2 }
 0x46c   : > { %v782_v20 = vmax.f32 %v780_v18, %v781_v19  ;;  %v788_v5 = vmax.f32 %v786_v0, %v787_v1  ;;  %v768_v8 = vadd.f32 %v767_v60, %v766_v54  ;;  %v774_v9 = vadd.f32 %v773_v61, %v772_v55 }
 0x46e   : > { %v783_v21 = vrot.slane %v782_v20, 1  ;;  %v789_v6 = vrot.slane %v788_v5, 1  ;;  %v769_v4 = vrot.slane %v768_v8, 1  ;;  %v775_v7 = vrot.slane %v774_v9, 1 }
 0x470   : > { %v4001_v22 = vmax.f32 %v782_v20, %v783_v21  ;;  %v4003_v23 = vmax.f32 %v788_v5, %v789_v6  ;;  %v770_v12 = vadd.f32 %v769_v4, %v768_v8  ;;  %v776_v13 = vadd.f32 %v775_v7, %v774_v9 }
 0x472   : > { %840 = vrot.lane.b32.xlu1 %v4003_v23, %s3628_s24  ;;  %838 = vrot.lane.b32.xlu0 %v4001_v22, %s3628_s24  ;;  %v4277_v16 = vmul.f32 0.03125, %v770_v12  ;;  %v4279_v17 = vmul.f32 0.03125, %v776_v13 }
 0x476   : > { %886 = vrot.lane.b32.xlu1 %v4003_v23, %s3629_s8  ;;  %884 = vrot.lane.b32.xlu0 %v4001_v22, %s3629_s8 }
 0x47a   : > { %930 = vrot.lane.b32.xlu1 %v4003_v23, %s3630_s20  ;;  %928 = vrot.lane.b32.xlu0 %v4001_v22, %s3630_s20 }
 0x47e   : > { %974 = vrot.lane.b32.xlu1 %v4003_v23, %s3631_s23  ;;  %972 = vrot.lane.b32.xlu0 %v4001_v22, %s3631_s23 }
 0x482   : > { %1018 = vrot.lane.b32.xlu1 %v4003_v23, %s3632_s16  ;;  %1016 = vrot.lane.b32.xlu0 %v4001_v22, %s3632_s16 }
 0x486   : > { %1062 = vrot.lane.b32.xlu1 %v4003_v23, %s3633_s27  ;;  %1060 = vrot.lane.b32.xlu0 %v4001_v22, %s3633_s27 }
 0x48a   : > { %1106 = vrot.lane.b32.xlu1 %v4003_v23, %s3634_s26  ;;  %1104 = vrot.lane.b32.xlu0 %v4001_v22, %s3634_s26 }
 0x48e   : > { %1150 = vrot.lane.b32.xlu1 %v4003_v23, %s6662_s25  ;;  %1148 = vrot.lane.b32.xlu0 %v4001_v22, %s6662_s25  ;;  %s6670_s25 = smov 31  }
 0x492   : > { %1194 = vrot.lane.b32.xlu1 %v4003_v23, %s6664_s14  ;;  %1192 = vrot.lane.b32.xlu0 %v4001_v22, %s6664_s14  ;;  %s6672_s14 = smov 30  }
 0x496   : > { %1238 = vrot.lane.b32.xlu1 %v4003_v23, %s6666_s18  ;;  %1236 = vrot.lane.b32.xlu0 %v4001_v22, %s6666_s18  ;;  %s6674_s18 = smov 29  }
 0x49a   : > { %1282 = vrot.lane.b32.xlu1 %v4003_v23, %s6668_s17  ;;  %1280 = vrot.lane.b32.xlu0 %v4001_v22, %s6668_s17  ;;  %s6676_s17 = smov 19  }
 0x49e   : > { %1326 = vrot.lane.b32.xlu1 %v4003_v23, %s6670_s25  ;;  %1324 = vrot.lane.b32.xlu0 %v4001_v22, %s6670_s25  ;;  %s6678_s25 = smov 18  }
 0x4a2   : > { %1370 = vrot.lane.b32.xlu1 %v4003_v23, %s6672_s14  ;;  %1368 = vrot.lane.b32.xlu0 %v4001_v22, %s6672_s14  ;;  %s6680_s14 = smov 17  }
 0x4a6   : > { %1414 = vrot.lane.b32.xlu1 %v4003_v23, %s6674_s18  ;;  %1412 = vrot.lane.b32.xlu0 %v4001_v22, %s6674_s18  ;;  %s6682_s18 = smov 16  }
 0x4aa   : > { %1458 = vrot.lane.b32.xlu1 %v4003_v23, %s6676_s17  ;;  %1456 = vrot.lane.b32.xlu0 %v4001_v22, %s6676_s17  ;;  %s6684_s17 = smov 15  }
 0x4ae   : > { %1502 = vrot.lane.b32.xlu1 %v4003_v23, %s6678_s25  ;;  %1500 = vrot.lane.b32.xlu0 %v4001_v22, %s6678_s25  ;;  %s3647_s25 = smov 14  }
 0x4b2   : > { %1546 = vrot.lane.b32.xlu1 %v4003_v23, %s6680_s14  ;;  %1544 = vrot.lane.b32.xlu0 %v4001_v22, %s6680_s14  ;;  %s3648_s14 = smov 13  }
 0x4b6   : > { %1590 = vrot.lane.b32.xlu1 %v4003_v23, %s6682_s18  ;;  %1588 = vrot.lane.b32.xlu0 %v4001_v22, %s6682_s18  ;;  %s6686_s18 = smov 3  }
 0x4ba   : > { %1634 = vrot.lane.b32.xlu1 %v4003_v23, %s6684_s17  ;;  %1632 = vrot.lane.b32.xlu0 %v4001_v22, %s6684_s17  ;;  %s6688_s17 = smov 2  }
 0x4be   : > { %1678 = vrot.lane.b32.xlu1 %v4003_v23, %s3647_s25  ;;  %1676 = vrot.lane.b32.xlu0 %v4001_v22, %s3647_s25 }
 0x4c2   : > { %1722 = vrot.lane.b32.xlu1 %v4003_v23, %s3648_s14  ;;  %1720 = vrot.lane.b32.xlu0 %v4001_v22, %s3648_s14 }
 0x4c6   : > { %1766 = vrot.lane.b32.xlu1 %v4003_v23, %s6686_s18  ;;  %1764 = vrot.lane.b32.xlu0 %v4001_v22, %s6686_s18  ;;  %s6694_s18 = smov 126  }
 0x4ca   : > { %1810 = vrot.lane.b32.xlu1 %v4003_v23, %s6688_s17  ;;  %1808 = vrot.lane.b32.xlu0 %v4001_v22, %s6688_s17  ;;  %s6777_s17 = smov 125  }
 0x4ce   : > { %1854 = vrot.lane.b32.xlu1 %v4003_v23, %s6690_s7  ;;  %1852 = vrot.lane.b32.xlu0 %v4001_v22, %s6690_s7  ;;  %s6696_s7 = smov 115  }
 0x4d2   : > { %1929 = vrot.lane.b32.xlu1 %v4003_v23, %s6692_s28  ;;  %1927 = vrot.lane.b32.xlu0 %v4001_v22, %s6692_s28  ;;  %s6698_s28 = smov 114  }
 0x4d6   : > { %1973 = vrot.lane.b32.xlu1 %v4003_v23, %s6694_s18  ;;  %1971 = vrot.lane.b32.xlu0 %v4001_v22, %s6694_s18  ;;  %s6700_s18 = smov 113  }
 0x4da   : > { %2017 = vrot.lane.b32.xlu1 %v4003_v23, %s6777_s17  ;;  %2015 = vrot.lane.b32.xlu0 %v4001_v22, %s6777_s17  ;;  %s4508_s17 = sld [smem:[#allocation9 + $0xb]] }
 0x4de   : > { %2061 = vrot.lane.b32.xlu1 %v4003_v23, %s6696_s7  ;;  %2059 = vrot.lane.b32.xlu0 %v4001_v22, %s6696_s7  ;;  %s6702_s7 = smov 112  }
 0x4e2   : > { %2105 = vrot.lane.b32.xlu1 %v4003_v23, %s6698_s28  ;;  %2103 = vrot.lane.b32.xlu0 %v4001_v22, %s6698_s28  ;;  %s6704_s28 = smov 111  }
 0x4e4   : > { %v4121_v24 = vpop.permute.xlu1 %840  ;;  %v4123_v25 = vpop.permute.xlu0 %838 }
 0x4e6   : > { %2149 = vrot.lane.b32.xlu1 %v4003_v23, %s6700_s18  ;;  %2147 = vrot.lane.b32.xlu0 %v4001_v22, %s6700_s18  ;;  %s6706_s18 = smov 110  }
 0x4e8   : > { %v4129_v26 = vpop.permute.xlu1 %886  ;;  %v4131_v27 = vpop.permute.xlu0 %884 }
 0x4ea   : > { %2193 = vrot.lane.b32.xlu1 %v4003_v23, %s6702_s7  ;;  %2191 = vrot.lane.b32.xlu0 %v4001_v22, %s6702_s7  ;;  %s6708_s7 = smov 109  }
 0x4ec   : > { %v4137_v28 = vpop.permute.xlu1 %930  ;;  %v4139_v29 = vpop.permute.xlu0 %928 }
 0x4ee   : > { %2237 = vrot.lane.b32.xlu1 %v4003_v23, %s6704_s28  ;;  %2235 = vrot.lane.b32.xlu0 %v4001_v22, %s6704_s28  ;;  %s6710_s28 = smov 99  }
 0x4f0   : > { %v4145_v30 = vpop.permute.xlu1 %974  ;;  %v4147_v31 = vpop.permute.xlu0 %972 }
 0x4f2   : > { %2281 = vrot.lane.b32.xlu1 %v4003_v23, %s6706_s18  ;;  %2279 = vrot.lane.b32.xlu0 %v4001_v22, %s6706_s18  ;;  %s6712_s18 = smov 83  }
 0x4f4   : > { %v4153_v32 = vpop.permute.xlu1 %1018  ;;  %v4155_v33 = vpop.permute.xlu0 %1016 }
 0x4f6   : > { %2325 = vrot.lane.b32.xlu1 %v4003_v23, %s6708_s7  ;;  %2323 = vrot.lane.b32.xlu0 %v4001_v22, %s6708_s7  ;;  %s6714_s7 = smov 98  }
 0x4f8   : > { %v4161_v34 = vpop.permute.xlu1 %1062  ;;  %v4163_v35 = vpop.permute.xlu0 %1060 }
 0x4fa   : > { %2369 = vrot.lane.b32.xlu1 %v4003_v23, %s6710_s28  ;;  %2367 = vrot.lane.b32.xlu0 %v4001_v22, %s6710_s28  ;;  %s6716_s28 = smov 97  }
 0x4fc   : > { %v4169_v36 = vpop.permute.xlu1 %1106  ;;  %v4171_v37 = vpop.permute.xlu0 %1104 }
 0x4fe   : > { %2677 = vrot.lane.b32.xlu1 %v4003_v23, %s6712_s18  ;;  %2675 = vrot.lane.b32.xlu0 %v4001_v22, %s6712_s18  ;;  %s6718_s18 = smov 82  }
 0x500   : > { %v4177_v38 = vpop.permute.xlu1 %1150  ;;  %v4179_v39 = vpop.permute.xlu0 %1148 }
 0x502   : > { %2413 = vrot.lane.b32.xlu1 %v4003_v23, %s6714_s7  ;;  %2411 = vrot.lane.b32.xlu0 %v4001_v22, %s6714_s7  ;;  %s6771_s7 = smov 81  }
 0x504   : > { %v4185_v40 = vpop.permute.xlu1 %1194  ;;  %v4187_v41 = vpop.permute.xlu0 %1192 }
 0x506   : > { %2457 = vrot.lane.b32.xlu1 %v4003_v23, %s6716_s28  ;;  %2455 = vrot.lane.b32.xlu0 %v4001_v22, %s6716_s28  ;;  %s6720_s28 = smov 96  }
 0x508   : > { %v4193_v42 = vpop.permute.xlu1 %1238  ;;  %v4195_v43 = vpop.permute.xlu0 %1236 }
 0x50a   : > { %2721 = vrot.lane.b32.xlu1 %v4003_v23, %s6718_s18  ;;  %2719 = vrot.lane.b32.xlu0 %v4001_v22, %s6718_s18  ;;  %s6722_s18 = smov 95  }
 0x50c   : > { %v4201_v44 = vpop.permute.xlu1 %1282  ;;  %v4203_v45 = vpop.permute.xlu0 %1280 }
 0x50e   : > { %2765 = vrot.lane.b32.xlu1 %v4003_v23, %s6771_s7  ;;  %2763 = vrot.lane.b32.xlu0 %v4001_v22, %s6771_s7  ;;  %s4496_s7 = sld [smem:[#allocation9 + $0x9]] }
 0x510   : > { %v4209_v46 = vpop.permute.xlu1 %1326  ;;  %v4211_v47 = vpop.permute.xlu0 %1324 }
 0x512   : > { %2501 = vrot.lane.b32.xlu1 %v4003_v23, %s6720_s28  ;;  %2499 = vrot.lane.b32.xlu0 %v4001_v22, %s6720_s28  ;;  %s6724_s28 = smov 80  }
 0x514   : > { %v4217_v48 = vpop.permute.xlu1 %1370  ;;  %v4219_v49 = vpop.permute.xlu0 %1368 }
 0x516   : > { %2545 = vrot.lane.b32.xlu1 %v4003_v23, %s6722_s18  ;;  %2543 = vrot.lane.b32.xlu0 %v4001_v22, %s6722_s18  ;;  %s6726_s18 = smov 79  }
 0x518   : > { %v4227_v52 = vpop.permute.xlu1 %1414  ;;  %v4229_v53 = vpop.permute.xlu0 %1412 }
 0x51a   : > { %2809 = vrot.lane.b32.xlu1 %v4003_v23, %s6724_s28  ;;  %2807 = vrot.lane.b32.xlu0 %v4001_v22, %s6724_s28  ;;  %s6728_s28 = smov 94  }
 0x51c   : > { %v4237_v58 = vpop.permute.xlu1 %1458  ;;  %v4239_v59 = vpop.permute.xlu0 %1456 }
 0x51e   : > { %2853 = vrot.lane.b32.xlu1 %v4003_v23, %s6726_s18  ;;  %2851 = vrot.lane.b32.xlu0 %v4001_v22, %s6726_s18  ;;  %s6730_s18 = smov 93  }
 0x520   : > { %v4245_v62 = vpop.permute.xlu1 %1502  ;;  %v4247_v63 = vpop.permute.xlu0 %1500 }
 0x522   : > { %2589 = vrot.lane.b32.xlu1 %v4003_v23, %s6728_s28  ;;  %2587 = vrot.lane.b32.xlu0 %v4001_v22, %s6728_s28  ;;  %s6769_s28 = smov 78  }
 0x524   : > { %v4253_v2 = vpop.permute.xlu1 %1546  ;;  %v4255_v3 = vpop.permute.xlu0 %1544 }
 0x526   : > { %2633 = vrot.lane.b32.xlu1 %v4003_v23, %s6730_s18  ;;  %2631 = vrot.lane.b32.xlu0 %v4001_v22, %s6730_s18  ;;  %s6763_s18 = smov 77  }
 0x528   : > { %v4261_v10 = vpop.permute.xlu1 %1590  ;;  %v4263_v11 = vpop.permute.xlu0 %1588 }
 0x52a   : > { %2897 = vrot.lane.b32.xlu1 %v4003_v23, %s6769_s28  ;;  %2895 = vrot.lane.b32.xlu0 %v4001_v22, %s6769_s28  ;;  %s4492_s28 = sld [smem:[#allocation9 + $0x7]] }
 0x52c   : > { %v4269_v14 = vpop.permute.xlu1 %1634  ;;  %v4271_v15 = vpop.permute.xlu0 %1632 }
 0x52e   : > { %2941 = vrot.lane.b32.xlu1 %v4003_v23, %s6763_s18  ;;  %2939 = vrot.lane.b32.xlu0 %v4001_v22, %s6763_s18  ;;  %s4482_s18 = sld [smem:[#allocation9 + $0x5]] }
 0x530   : > { %v4281_v18 = vpop.permute.xlu1 %1678  ;;  %v4283_v0 = vpop.permute.xlu0 %1676 }
 0x532   : > { %849 = vrot.lane.b32.xlu1 %v4279_v17, %s3628_s24  ;;  %847 = vrot.lane.b32.xlu0 %v4277_v16, %s3628_s24  ;;  %s6901_s24 = smov 35  }
 0x534   : > { %v4289_v19 = vpop.permute.xlu1 %1722  ;;  %v4291_v1 = vpop.permute.xlu0 %1720 }
 0x535   : > { %6887 = vst [vmem:[#allocation30_spill] sm:$0xff] %v4289_v19  ;;  %6888 = vst [vmem:[#allocation31_spill] sm:$0xff] %v4291_v1  ;;  %v6988_v19 = vstv %s4482_s18 }
 0x536   : > { %893 = vrot.lane.b32.xlu1 %v4279_v17, %s3629_s8  ;;  %891 = vrot.lane.b32.xlu0 %v4277_v16, %s3629_s8  ;;  %s6904_s8 = smov 34  }
 0x538   : > { %v4297_v20 = vpop.permute.xlu1 %1766  ;;  %v4299_v5 = vpop.permute.xlu0 %1764 }
 0x539   : > { %6889 = vst [vmem:[#allocation32_spill] sm:$0xff] %v4297_v20  ;;  %6890 = vst [vmem:[#allocation33_spill] sm:$0xff] %v4299_v5 }
 0x53a   : > { %937 = vrot.lane.b32.xlu1 %v4279_v17, %s3630_s20  ;;  %935 = vrot.lane.b32.xlu0 %v4277_v16, %s3630_s20  ;;  %s6907_s20 = smov 33  }
 0x53c   : > { %v4305_v21 = vpop.permute.xlu1 %1810  ;;  %v4307_v6 = vpop.permute.xlu0 %1808 }
 0x53d   : > { %6891 = vst [vmem:[#allocation34_spill] sm:$0xff] %v4305_v21  ;;  %6892 = vst [vmem:[#allocation35_spill] sm:$0xff] %v4307_v6 }
 0x53e   : > { %981 = vrot.lane.b32.xlu1 %v4279_v17, %s3631_s23  ;;  %979 = vrot.lane.b32.xlu0 %v4277_v16, %s3631_s23  ;;  %s6910_s23 = smov 32  }
 0x540   : > { %v4313_v50 = vpop.permute.xlu1 %1854  ;;  %v4315_v51 = vpop.permute.xlu0 %1852 }
 0x541   : > { %6893 = vst [vmem:[#allocation36_spill] sm:$0xff] %v4313_v50  ;;  %6894 = vst [vmem:[#allocation37_spill] sm:$0xff] %v4315_v51 }
 0x542   : > { %1025 = vrot.lane.b32.xlu1 %v4279_v17, %s3632_s16  ;;  %1023 = vrot.lane.b32.xlu0 %v4277_v16, %s3632_s16  ;;  %s6913_s16 = smov 31  }
 0x544   : > { %v4321_v54 = vpop.permute.xlu1 %1929  ;;  %v4323_v55 = vpop.permute.xlu0 %1927 }
 0x545   : > { %6895 = vst [vmem:[#allocation38_spill] sm:$0xff] %v4321_v54  ;;  %6896 = vst [vmem:[#allocation39_spill] sm:$0xff] %v4323_v55 }
 0x546   : > { %1069 = vrot.lane.b32.xlu1 %v4279_v17, %s3633_s27  ;;  %1067 = vrot.lane.b32.xlu0 %v4277_v16, %s3633_s27  ;;  %s6916_s27 = smov 30  }
 0x548   : > { %v4329_v60 = vpop.permute.xlu1 %1973  ;;  %v4331_v61 = vpop.permute.xlu0 %1971 }
 0x549   : > { %6897 = vst [vmem:[#allocation40_spill] sm:$0xff] %v4329_v60  ;;  %6898 = vst [vmem:[#allocation41_spill] sm:$0xff] %v4331_v61 }
 0x54a   : > { %1113 = vrot.lane.b32.xlu1 %v4279_v17, %s3634_s26  ;;  %1111 = vrot.lane.b32.xlu0 %v4277_v16, %s3634_s26  ;;  %s6919_s26 = smov 29  }
 0x54c   : > { %v4337_v8 = vpop.permute.xlu1 %2017  ;;  %v4339_v9 = vpop.permute.xlu0 %2015 }
 0x54d   : > { %6899 = vst [vmem:[#allocation42_spill] sm:$0xff] %v4337_v8  ;;  %6900 = vst [vmem:[#allocation43_spill] sm:$0xff] %v4339_v9 }
 0x54e   : > { %1157 = vrot.lane.b32.xlu1 %v4279_v17, %s6901_s24  ;;  %1155 = vrot.lane.b32.xlu0 %v4277_v16, %s6901_s24  ;;  %s6922_s24 = smov 19  }
 0x550   : > { %v4345_v4 = vpop.permute.xlu1 %2061  ;;  %v4347_v7 = vpop.permute.xlu0 %2059 }
 0x551   : > { %6902 = vst [vmem:[#allocation44_spill] sm:$0xff] %v4345_v4  ;;  %6903 = vst [vmem:[#allocation45_spill] sm:$0xff] %v4347_v7 }
 0x552   : > { %1201 = vrot.lane.b32.xlu1 %v4279_v17, %s6904_s8  ;;  %1199 = vrot.lane.b32.xlu0 %v4277_v16, %s6904_s8  ;;  %s6925_s8 = smov 18  }
 0x554   : > { %v4353_v12 = vpop.permute.xlu1 %2105  ;;  %v4355_v13 = vpop.permute.xlu0 %2103 }
 0x555   : > { %6905 = vst [vmem:[#allocation46_spill] sm:$0xff] %v4353_v12  ;;  %6906 = vst [vmem:[#allocation47_spill] sm:$0xff] %v4355_v13 }
 0x556   : > { %1245 = vrot.lane.b32.xlu1 %v4279_v17, %s6907_s20  ;;  %1243 = vrot.lane.b32.xlu0 %v4277_v16, %s6907_s20  ;;  %s6928_s20 = smov 17  }
 0x558   : > { %v4361_v57 = vpop.permute.xlu1 %2149  ;;  %v4363_v56 = vpop.permute.xlu0 %2147 }
 0x559   : > { %6908 = vst [vmem:[#allocation48_spill] sm:$0xff] %v4361_v57  ;;  %6909 = vst [vmem:[#allocation49_spill] sm:$0xff] %v4363_v56 }
 0x55a   : > { %1289 = vrot.lane.b32.xlu1 %v4279_v17, %s6910_s23  ;;  %1287 = vrot.lane.b32.xlu0 %v4277_v16, %s6910_s23  ;;  %s6931_s23 = smov 16  }
 0x55c   : > { %v4369_v7 = vpop.permute.xlu1 %2193  ;;  %v4371_v12 = vpop.permute.xlu0 %2191 }
 0x55d   : > { %6911 = vst [vmem:[#allocation50_spill] sm:$0xff] %v4369_v7  ;;  %6912 = vst [vmem:[#allocation51_spill] sm:$0xff] %v4371_v12 }
 0x55e   : > { %1333 = vrot.lane.b32.xlu1 %v4279_v17, %s6913_s16  ;;  %1331 = vrot.lane.b32.xlu0 %v4277_v16, %s6913_s16  ;;  %s6934_s16 = smov 15  }
 0x560   : > { %v4377_v13 = vpop.permute.xlu1 %2237  ;;  %v4379_v57 = vpop.permute.xlu0 %2235 }
 0x561   : > { %6914 = vst [vmem:[#allocation52_spill] sm:$0xff] %v4377_v13  ;;  %6915 = vst [vmem:[#allocation53_spill] sm:$0xff] %v4379_v57 }
 0x562   : > { %1377 = vrot.lane.b32.xlu1 %v4279_v17, %s6916_s27  ;;  %1375 = vrot.lane.b32.xlu0 %v4277_v16, %s6916_s27  ;;  %s3232_s27 = sld [smem:[#allocation9 + $0x49]] }
 0x564   : > { %v4385_v56 = vpop.permute.xlu1 %2281  ;;  %v4387_v7 = vpop.permute.xlu0 %2279 }
 0x565   : > { %6917 = vst [vmem:[#allocation54_spill] sm:$0xff] %v4385_v56  ;;  %6918 = vst [vmem:[#allocation55_spill] sm:$0xff] %v4387_v7 }
 0x566   : > { %1421 = vrot.lane.b32.xlu1 %v4279_v17, %s6919_s26  ;;  %1419 = vrot.lane.b32.xlu0 %v4277_v16, %s6919_s26  ;;  %s4453_s26 = sld [smem:[#allocation9 + $0x18]] }
 0x568   : > { %v4393_v12 = vpop.permute.xlu1 %2325  ;;  %v4395_v13 = vpop.permute.xlu0 %2323 }
 0x569   : > { %6920 = vst [vmem:[#allocation56_spill] sm:$0xff] %v4393_v12  ;;  %6921 = vst [vmem:[#allocation57_spill] sm:$0xff] %v4395_v13 }
 0x56a   : > { %1465 = vrot.lane.b32.xlu1 %v4279_v17, %s6922_s24  ;;  %1463 = vrot.lane.b32.xlu0 %v4277_v16, %s6922_s24  ;;  %s6941_s24 = smov 3  }
 0x56c   : > { %v4401_v57 = vpop.permute.xlu1 %2369  ;;  %v4403_v56 = vpop.permute.xlu0 %2367 }
 0x56d   : > { %6923 = vst [vmem:[#allocation58_spill] sm:$0xff] %v4401_v57  ;;  %6924 = vst [vmem:[#allocation59_spill] sm:$0xff] %v4403_v56 }
 0x56e   : > { %1509 = vrot.lane.b32.xlu1 %v4279_v17, %s6925_s8  ;;  %1507 = vrot.lane.b32.xlu0 %v4277_v16, %s6925_s8  ;;  %s4469_s8 = sld [smem:[#allocation9 + $0x1]] }
 0x570   : > { %v4409_v7 = vpop.permute.xlu1 %2677  ;;  %v4411_v12 = vpop.permute.xlu0 %2675 }
 0x571   : > { %6926 = vst [vmem:[#allocation60_spill] sm:$0xff] %v4409_v7  ;;  %6927 = vst [vmem:[#allocation61_spill] sm:$0xff] %v4411_v12 }
 0x572   : > { %1553 = vrot.lane.b32.xlu1 %v4279_v17, %s6928_s20  ;;  %1551 = vrot.lane.b32.xlu0 %v4277_v16, %s6928_s20  ;;  %s4475_s20 = sld [smem:[#allocation9 + $0x2]] }
 0x574   : > { %v4417_v13 = vpop.permute.xlu1 %2413  ;;  %v4419_v57 = vpop.permute.xlu0 %2411 }
 0x575   : > { %6929 = vst [vmem:[#allocation62_spill] sm:$0xff] %v4417_v13  ;;  %6930 = vst [vmem:[#allocation63_spill] sm:$0xff] %v4419_v57 }
 0x576   : > { %1597 = vrot.lane.b32.xlu1 %v4279_v17, %s6931_s23  ;;  %1595 = vrot.lane.b32.xlu0 %v4277_v16, %s6931_s23  ;;  %s4563_s23 = sld [smem:[#allocation9 + $0x17]] }
 0x578   : > { %v4425_v56 = vpop.permute.xlu1 %2457  ;;  %v4427_v7 = vpop.permute.xlu0 %2455 }
 0x579   : > { %6932 = vst [vmem:[#allocation64_spill] sm:$0xff] %v4425_v56  ;;  %6933 = vst [vmem:[#allocation65_spill] sm:$0xff] %v4427_v7 }
 0x57a   : > { %1641 = vrot.lane.b32.xlu1 %v4279_v17, %s6934_s16  ;;  %1639 = vrot.lane.b32.xlu0 %v4277_v16, %s6934_s16  ;;  %s4477_s16 = sld [smem:[#allocation9 + $0x3]] }
 0x57c   : > { %v4433_v12 = vpop.permute.xlu1 %2721  ;;  %v4435_v13 = vpop.permute.xlu0 %2719 }
 0x57d   : > { %6935 = vst [vmem:[#allocation66_spill] sm:$0xff] %v4433_v12  ;;  %6936 = vst [vmem:[#allocation67_spill] sm:$0xff] %v4435_v13 }
 0x57e   : > { %1685 = vrot.lane.b32.xlu1 %v4279_v17, %s3647_s25  ;;  %1683 = vrot.lane.b32.xlu0 %v4277_v16, %s3647_s25  ;;  %s6944_s25 = smov 2  }
 0x580   : > { %v4441_v57 = vpop.permute.xlu1 %2765  ;;  %v4443_v56 = vpop.permute.xlu0 %2763 }
 0x581   : > { %6937 = vst [vmem:[#allocation68_spill] sm:$0xff] %v4441_v57  ;;  %6938 = vst [vmem:[#allocation69_spill] sm:$0xff] %v4443_v56 }
 0x582   : > { %1729 = vrot.lane.b32.xlu1 %v4279_v17, %s3648_s14  ;;  %1727 = vrot.lane.b32.xlu0 %v4277_v16, %s3648_s14  ;;  %s4467_s14 = sld [smem:[#allocation9]] }
 0x584   : > { %v4449_v12 = vpop.permute.xlu1 %2501  ;;  %v4451_v13 = vpop.permute.xlu0 %2499 }
 0x585   : > { %6939 = vst [vmem:[#allocation70_spill] sm:$0xff] %v4449_v12  ;;  %6940 = vst [vmem:[#allocation71_spill] sm:$0xff] %v4451_v13  ;;  %v1899_v13 = vstv %s3232_s27  ;;  %v842_v12 = vlaneseq  ;;  %s4490_s27 = sld [smem:[#allocation9 + $0x6]] }
 0x586   : > { %1773 = vrot.lane.b32.xlu1 %v4279_v17, %s6941_s24  ;;  %1771 = vrot.lane.b32.xlu0 %v4277_v16, %s6941_s24  ;;  %s4480_s24 = sld [smem:[#allocation9 + $0x4]] }
 0x587   : > { %v4502_v60 = vshrl.u32 %v842_v12, 7 }
 0x588   : > { %v4459_v56 = vpop.permute.xlu1 %2545  ;;  %v4461_v57 = vpop.permute.xlu0 %2543 }
 0x589   : > { %6942 = vst [vmem:[#allocation72_spill] sm:$0xff] %v4459_v56  ;;  %6943 = vst [vmem:[#allocation73_spill] sm:$0xff] %v4461_v57  ;;  %v1896_v57 = vstv %s4453_s26  ;;  %v3674_v56 = vmov 1966171168   ;;  %s4494_s26 = sld [smem:[#allocation9 + $0x8]] }
 0x58a   : > { %1817 = vrot.lane.b32.xlu1 %v4279_v17, %s6944_s25  ;;  %1815 = vrot.lane.b32.xlu0 %v4277_v16, %s6944_s25  ;;  %s6947_s25 = smov 1   ;;  %v865_v9 = vunpack.c.l.s4 %v3674_v56  ;;  %6951 = vst [vmem:[#allocation79_spill] sm:$0xff] %v4502_v60  ;;  %v1897_v56 = vmul.f32 %v1896_v57, %v4001_v22  ;;  %v1898_v55 = vmul.f32 %v1896_v57, %v4003_v23  ;;  %v4526_v57 = vld [vmem:[%s6954_s6] sm:$0x3]  ;;  %s4549_s6 = sld [smem:[#allocation9 + $0x15]] }
 0x58b   : > { %6948 = sst [smem:[#allocation76_spill]] %s4490_s27  ;;  %vm814_vm5 = vcmp.ge.s32.totalorder %v4526_v57, 0  ;;  %vm815_vm6 = vcmp.lt.s32.totalorder %v4526_v57, 16  ;;  %s4602_s27 = sld [smem:[#allocation9 + $0x31]] }
 0x58c   : > { %v4471_v7 = vpop.permute.xlu1 %2809  ;;  %v4473_v4 = vpop.permute.xlu0 %2807  ;;  %v866_v22 = vunpack.c.0.s8 %v865_v9  ;;  %vm4608_vm14 = vmand %vm814_vm5, %vm815_vm6  ;;  %s6991_s18 = sld [smem:[#allocation76_spill]] }
 0x58d   : > { %6945 = vst [vmem:[#allocation74_spill] sm:$0xff] %v4471_v7  ;;  %6946 = vst [vmem:[#allocation75_spill] sm:$0xff] %v4473_v4  ;;  %v1901_v7 = vmul.f32 %v1899_v13, %v4279_v17  ;;  %v1900_v4 = vmul.f32 %v1899_v13, %v4277_v16  ;;  %v4513_v13 = vld [vmem:[%s6952_s5] sm:$0x3]  ;;  %s6964_s5 = smov 125  }
 0x58e   : > { %1861 = vrot.lane.b32.xlu1 %v4279_v17, %s6947_s25  ;;  %1859 = vrot.lane.b32.xlu0 %v4277_v16, %s6947_s25  ;;  %s4506_s25 = sld [smem:[#allocation9 + $0xa]]  ;;  %vm811_vm7 = vcmp.ge.s32.totalorder %v4513_v13, 0  ;;  %vm812_vm9 = vcmp.lt.s32.totalorder %v4513_v13, 16  ;;  %vm793_vm5 = vcmp.ge.s32.totalorder %v4513_v13, 3  ;;  %vm794_vm6 = vcmp.lt.s32.totalorder %v4513_v13, 19 }
 0x58f   : > { %v1903_v23 = vadd.f32 %v1901_v7, %v1898_v55  ;;  %v4556_v55 = vsub.s32 %v866_v22, %v4502_v60  ;;  %vm4624_vm15 = vmand %vm811_vm7, %vm812_vm9  ;;  %vm796_vm7 = vcmp.ge.s32.totalorder %v4526_v57, 3 }
 0x590   : > { %v4498_v8 = vpop.permute.xlu1 %2853  ;;  %v4500_v61 = vpop.permute.xlu0 %2851  ;;  %vm1893_vm1 = vmand %vm4624_vm15, %vm4608_vm14 }
 0x591   : > { %6949 = vst [vmem:[#allocation77_spill] sm:$0xff] %v4498_v8  ;;  %6950 = vst [vmem:[#allocation78_spill] sm:$0xff] %v4500_v61  ;;  %v1902_v61 = vadd.f32 %v1900_v4, %v1897_v56  ;;  %v4528_v8 = vand.u32 127, %v842_v12  ;;  %v6969_v56 = vmov 0  ;;  %v856_v22 = vstv %s4602_s27  ;;  %s7001_s27 = smov 110  }
 0x592   : > { %1936 = vrot.lane.b32.xlu1 %v4279_v17, %s6953_s4  ;;  %1934 = vrot.lane.b32.xlu0 %v4277_v16, %s6953_s4  ;;  %s4542_s4 = sld [smem:[#allocation9 + $0x12]]  ;;  %v6970_v56 = vsel %vm4624_vm15, 4294967295, %v6969_v56  ;;  %vm4818_vm9 = vmand %vm793_vm5, %vm794_vm6  ;;  %vm802_vm5 = vcmp.ge.s32.totalorder %v4526_v57, 2  ;;  %vm803_vm6 = vcmp.lt.s32.totalorder %v4526_v57, 18 }
 0x593   : > { %v1906_v9 = vcombine.low %v1902_v61, %v1903_v23  ;;  %vm844_vm8 = vcmp.lt.s32.totalorder %v4528_v8, 51  ;;  %vm888_vm10 = vcmp.lt.s32.totalorder %v4528_v8, 50  ;;  %vm932_vm11 = vcmp.lt.s32.totalorder %v4528_v8, 49  ;;  %6971 = vst [vmem:[#allocation90_spill] sm:$0xff] %v6970_v56 }
 0x594   : > { %v4538_v54 = vpop.permute.xlu1 %2589  ;;  %v4540_v51 = vpop.permute.xlu0 %2587  ;;  %vm976_vm12 = vcmp.lt.s32.totalorder %v4528_v8, 48  ;;  %vm1020_vm13 = vcmp.lt.s32.totalorder %v4528_v8, 47  ;;  %vm1064_vm0 = vcmp.lt.s32.totalorder %v4528_v8, 46  ;;  %vm1108_vm2 = vcmp.lt.s32.totalorder %v4528_v8, 45 }
 0x595   : > { %6956 = vst [vmem:[#allocation81_spill] sm:$0xff] %v4538_v54  ;;  %6957 = vst [vmem:[#allocation82_spill] sm:$0xff] %v4540_v51  ;;  %v1913_v23 = vrot.slane %v1906_v9, %v4556_v55  ;;  %v890_v9 = vsel %vm888_vm10, %v4129_v26, %v4131_v27  ;;  %vm6828_vm3 = vcmp.lt.s32.totalorder %v4528_v8, 35  ;;  %vm6829_vm4 = vcmp.lt.s32.totalorder %v4528_v8, 34 }
 0x596   : > { %1980 = vrot.lane.b32.xlu1 %v4279_v17, %s6959_s22  ;;  %1978 = vrot.lane.b32.xlu0 %v4277_v16, %s6959_s22  ;;  %s4570_s22 = sld [smem:[#allocation9 + $0x19]] }
 0x598   : > { %v4574_v61 = vpop.permute.xlu1 %2633  ;;  %v4576_v12 = vpop.permute.xlu0 %2631 }
 0x599   : > { %6961 = vst [vmem:[#allocation85_spill] sm:$0xff] %v4574_v61  ;;  %6962 = vst [vmem:[#allocation86_spill] sm:$0xff] %v4576_v12  ;;  %v846_v61 = vsel %vm844_vm8, %v4121_v24, %v4123_v25 }
 0x59a   : > { %2024 = vrot.lane.b32.xlu1 %v4279_v17, %s6964_s5  ;;  %2022 = vrot.lane.b32.xlu0 %v4277_v16, %s6964_s5  ;;  %s4635_s5 = sld [smem:[#allocation9 + $0x1f]] }
 0x59c   : > { %6960 = sst [smem:[#allocation84_spill]] %s4570_s22  ;;  %v4616_v7 = vpop.permute.xlu1 %2897  ;;  %v4618_v4 = vpop.permute.xlu0 %2895  ;;  %s6976_s22 = smov 114  }
 0x59d   : > { %6967 = vst [vmem:[#allocation88_spill] sm:$0xff] %v4616_v7  ;;  %6968 = vst [vmem:[#allocation89_spill] sm:$0xff] %v4618_v4  ;;  %v1920_v4 = vrot.slane %v1913_v23, %v4556_v55  ;;  %v845_v23 = vsel %vm844_vm8, %v4123_v25, %v4121_v24  ;;  %v889_v7 = vsel %vm888_vm10, %v4131_v27, %v4129_v26  ;;  %v6975_v27 = vstv %s4467_s14  ;;  %s6982_s14 = smov 113  }
 0x59e   : > { %2068 = vrot.lane.b32.xlu1 %v4279_v17, %s6972_s0  ;;  %2066 = vrot.lane.b32.xlu0 %v4277_v16, %s6972_s0  ;;  %v934_v25 = vsel %vm932_vm11, %v4137_v28, %v4139_v29  ;;  %v854_v50 = vmul.f32 %v6975_v27, %v846_v61  ;;  %s4684_s0 = sld [smem:[#allocation9 + $0x20]]  ;;  %v6978_v26 = vmov %v6975_v27  ;;  %v6979_v61 = vstv %s4469_s8  ;;  %s4755_s8 = sld [smem:[#allocation9 + $0x34]] }
 0x59f   : > { %v4695_v51 = vsel %vm1893_vm1, %v1920_v4, 0.0  ;;  %v855_v54 = vmul.f32 %v6978_v26, %v845_v23  ;;  %v898_v27 = vmul.f32 %v6979_v61, %v890_v9  ;;  %v6980_v6 = vmov %v6979_v61 }
 0x5a0   : > { %v4669_v12 = vpop.permute.xlu1 %2941  ;;  %v4671_v24 = vpop.permute.xlu0 %2939  ;;  %6977 = vst [vmem:[#allocation93_spill] sm:$0xff] %v4695_v51  ;;  %v899_v21 = vmul.f32 %v6980_v6, %v889_v7  ;;  %v977_v4 = vsel %vm976_vm12, %v4147_v31, %v4145_v30  ;;  %v978_v6 = vsel %vm976_vm12, %v4145_v30, %v4147_v31  ;;  %v6984_v61 = vstv %s4477_s16  ;;  %s4796_s16 = sld [smem:[#allocation9 + $0x35]] }
 0x5a1   : > { %6973 = vst [vmem:[#allocation91_spill] sm:$0xff] %v4669_v12  ;;  %6974 = vst [vmem:[#allocation92_spill] sm:$0xff] %v4671_v24  ;;  %v933_v24 = vsel %vm932_vm11, %v4139_v29, %v4137_v28  ;;  %v6981_v12 = vstv %s4475_s20  ;;  %v1021_v28 = vsel %vm1020_vm13, %v4155_v33, %v4153_v32  ;;  %v1022_v29 = vsel %vm1020_vm13, %v4153_v32, %v4155_v33 }
 0x5a2   : > { %2112 = vrot.lane.b32.xlu1 %v4279_v17, %s6976_s22  ;;  %2110 = vrot.lane.b32.xlu0 %v4277_v16, %s6976_s22  ;;  %v4712_v56 = vmul.f32 %v6981_v12, %v934_v25  ;;  %v1066_v12 = vsel %vm1064_vm0, %v4161_v34, %v4163_v35  ;;  %v6983_v32 = vstv %s4475_s20  ;;  %v6986_v23 = vstv %s4480_s24  ;;  %s6990_s20 = smov 112   ;;  %s6993_s24 = smov 111  }
 0x5a3   : > { %v943_v33 = vmul.f32 %v6983_v32, %v933_v24  ;;  %v4763_v51 = vmul.f32 %v6986_v23, %v1022_v29  ;;  %v4771_v1 = vmul.f32 %v6988_v19, %v1066_v12  ;;  %s4924_s22 = sld [smem:[#allocation9 + $0x38]] }
 0x5a4   : > { %v850_v7 = vpop.permute.xlu1 %849  ;;  %v848_v9 = vpop.permute.xlu0 %847 }
 0x5a5   : > { %v851_v30 = vsel %vm844_vm8, %v848_v9, %v850_v7  ;;  %v852_v31 = vsel %vm844_vm8, %v850_v7, %v848_v9  ;;  %v4748_v7 = vmul.f32 %v6984_v61, %v978_v6  ;;  %v1065_v9 = vsel %vm1064_vm0, %v4163_v35, %v4161_v34 }
 0x5a6   : > { %v857_v25 = vmul.f32 %v856_v22, %v852_v31  ;;  %v858_v26 = vmul.f32 %v856_v22, %v851_v30  ;;  %2156 = vrot.lane.b32.xlu1 %v4279_v17, %s6982_s14  ;;  %2154 = vrot.lane.b32.xlu0 %v4277_v16, %s6982_s14  ;;  %v900_v31 = vstv %s4649_s11  ;;  %v6985_v22 = vmov %v6984_v61  ;;  %s4878_s11 = sld [smem:[#allocation9 + $0x37]]  ;;  %s7010_s14 = smov 99  }
 0x5a7   : > { %v4759_v30 = vmul.f32 %v6985_v22, %v977_v4  ;;  %v6987_v61 = vmov %v6986_v23  ;;  %v6989_v4 = vmov %v6988_v19  ;;  %v1109_v19 = vsel %vm1108_vm2, %v4171_v37, %v4169_v36 }
 0x5a8   : > { %v859_v5 = vadd.f32 %v857_v25, %v854_v50  ;;  %v860_v24 = vadd.f32 %v858_v26, %v855_v54  ;;  %v894_v32 = vpop.permute.xlu1 %893  ;;  %v892_v6 = vpop.permute.xlu0 %891  ;;  %v4767_v20 = vmul.f32 %v6987_v61, %v1021_v28  ;;  %v4779_v29 = vmul.f32 %v6989_v4, %v1065_v9 }
 0x5a9   : > { %v895_v34 = vsel %vm888_vm10, %v892_v6, %v894_v32  ;;  %v896_v35 = vsel %vm888_vm10, %v894_v32, %v892_v6  ;;  %v2248_v50 = vstv %s4684_s0  ;;  %v1110_v28 = vsel %vm1108_vm2, %v4169_v36, %v4171_v37  ;;  %s6011_s0 = sld [smem:[#allocation9 + $0x51]] }
 0x5aa   : > { %v901_v54 = vmul.f32 %v900_v31, %v896_v35  ;;  %v902_v23 = vmul.f32 %v900_v31, %v895_v34  ;;  %2200 = vrot.lane.b32.xlu1 %v4279_v17, %s6990_s20  ;;  %2198 = vrot.lane.b32.xlu0 %v4277_v16, %s6990_s20  ;;  %v863_v12 = vcombine.low %v859_v5, %v860_v24  ;;  %v944_v25 = vstv %s4704_s19  ;;  %s4806_s19 = sld [smem:[#allocation9 + $0x36]]  ;;  %s7014_s20 = smov 83  }
 0x5ab   : > { %vm797_vm8 = vcmp.lt.s32.totalorder %v4526_v57, 19  ;;  %v6992_v5 = vstv %s6991_s18  ;;  %vm808_vm10 = vcmp.ge.s32.totalorder %v4526_v57, 1  ;;  %v988_v34 = vstv %s4755_s8  ;;  %s4972_s8 = sld [smem:[#allocation9 + $0x39]]  ;;  %s5015_s18 = sld [smem:[#allocation9 + $0x3a]] }
 0x5ac   : > { %v903_v26 = vadd.f32 %v901_v54, %v898_v27  ;;  %v904_v9 = vadd.f32 %v902_v23, %v899_v21  ;;  %v938_v31 = vpop.permute.xlu1 %937  ;;  %v936_v22 = vpop.permute.xlu0 %935  ;;  %v4810_v24 = vmul.f32 %v6992_v5, %v1110_v28  ;;  %v870_v61 = vrot.slane %v863_v12, %v4556_v55  ;;  %vm4840_vm1 = vmand %vm796_vm7, %vm797_vm8 }
 0x5ad   : > { %v939_v36 = vsel %vm932_vm11, %v936_v22, %v938_v31  ;;  %v940_v37 = vsel %vm932_vm11, %v938_v31, %v936_v22  ;;  %vm809_vm11 = vcmp.lt.s32.totalorder %v4526_v57, 17  ;;  %v1153_v35 = vsel %vm6828_vm3, %v4179_v39, %v4177_v38 }
 0x5ae   : > { %v907_v27 = vcombine.low %v903_v26, %v904_v9  ;;  %v945_v21 = vmul.f32 %v944_v25, %v940_v37  ;;  %v946_v32 = vmul.f32 %v944_v25, %v939_v36  ;;  %2244 = vrot.lane.b32.xlu1 %v4279_v17, %s6993_s24  ;;  %2242 = vrot.lane.b32.xlu0 %v4277_v16, %s6993_s24  ;;  %vm4859_vm7 = vmand %vm808_vm10, %vm809_vm11  ;;  %v7002_v36 = vstv %s4492_s28  ;;  %s7007_s28 = smov 109   ;;  %s7031_s24 = smov 82  }
 0x5af   : > { %v1154_v4 = vsel %vm6828_vm3, %v4177_v38, %v4179_v39  ;;  %v6998_v26 = vmov %v6992_v5  ;;  %vm1240_vm8 = vcmp.lt.s32.totalorder %v4528_v8, 33  ;;  %vm4889_vm10 = vmand %vm802_vm5, %vm803_vm6  ;;  %vm820_vm5 = vcmp.ge.s32.totalorder %v4526_v57, 4294967295 }
 0x5b0   : > { %v947_v23 = vadd.f32 %v945_v21, %v4712_v56  ;;  %v948_v28 = vadd.f32 %v946_v32, %v943_v33  ;;  %v982_v12 = vpop.permute.xlu1 %981  ;;  %v980_v25 = vpop.permute.xlu0 %979  ;;  %v4853_v9 = vmul.f32 %v6998_v26, %v1109_v19  ;;  %v4867_v37 = vmul.f32 %v7002_v36, %v1154_v4  ;;  %vm925_vm11 = vmand %vm4818_vm9, %vm4859_vm7 }
 0x5b1   : > { %v983_v38 = vsel %vm976_vm12, %v980_v25, %v982_v12  ;;  %v984_v39 = vsel %vm976_vm12, %v982_v12, %v980_v25  ;;  %vm835_vm12 = vmand %vm4818_vm9, %vm4840_vm1  ;;  %v877_v19 = vrot.slane %v870_v61, %v4556_v55  ;;  %v914_v5 = vrot.slane %v907_v27, %v4556_v55 }
 0x5b2   : > { %v951_v33 = vcombine.low %v947_v23, %v948_v28  ;;  %v989_v31 = vmul.f32 %v988_v34, %v984_v39  ;;  %v990_v22 = vmul.f32 %v988_v34, %v983_v38  ;;  %2288 = vrot.lane.b32.xlu1 %v4279_v17, %s7001_s27  ;;  %2286 = vrot.lane.b32.xlu0 %v4277_v16, %s7001_s27  ;;  %v1032_v21 = vstv %s4796_s16  ;;  %vm881_vm3 = vmand %vm4818_vm9, %vm4889_vm10  ;;  %s7019_s16 = smov 98   ;;  %s5126_s27 = sld [smem:[#allocation9 + $0x3d]] }
 0x5b3   : > { %v7003_v32 = vmov %v7002_v36  ;;  %v7004_v61 = vmov 0  ;;  %vm1416_vm6 = vcmp.lt.s32.totalorder %v4528_v8, 29 }
 0x5b4   : > { %v4882_v34 = vmul.f32 %v7003_v32, %v1153_v35  ;;  %v7005_v61 = vsel %vm4889_vm10, 4294967295, %v7004_v61  ;;  %v958_v27 = vrot.slane %v951_v33, %v4556_v55  ;;  %v991_v4 = vadd.f32 %v989_v31, %v4748_v7  ;;  %v1026_v28 = vpop.permute.xlu1 %1025  ;;  %v1024_v12 = vpop.permute.xlu0 %1023 }
 0x5b5   : > { %7006 = vst [vmem:[#allocation94_spill] sm:$0xff] %v7005_v61  ;;  %v992_v23 = vadd.f32 %v990_v22, %v4759_v30  ;;  %v4900_v35 = vsel %vm6829_vm4, %v4187_v41, %v4185_v40  ;;  %v1027_v25 = vsel %vm1020_vm13, %v1024_v12, %v1026_v28  ;;  %v1028_v7 = vsel %vm1020_vm13, %v1026_v28, %v1024_v12  ;;  %v7219_v61 = vld [vmem:[#allocation89_spill] sm:$0xff] }
 0x5b6   : > { %v1076_v30 = vstv %s4806_s19  ;;  %v965_v38 = vrot.slane %v958_v27, %v4556_v55  ;;  %v1033_v26 = vmul.f32 %v1032_v21, %v1028_v7  ;;  %v1034_v33 = vmul.f32 %v1032_v21, %v1027_v25  ;;  %2332 = vrot.lane.b32.xlu1 %v4279_v17, %s7007_s28  ;;  %2330 = vrot.lane.b32.xlu0 %v4277_v16, %s7007_s28  ;;  %s5057_s19 = sld [smem:[#allocation9 + $0x3b]]  ;;  %s7052_s28 = smov 95  }
 0x5b7   : > { %v995_v39 = vcombine.low %v991_v4, %v992_v23  ;;  %v879_v31 = vsel %vm835_vm12, %v877_v19, 0.0  ;;  %v921_v22 = vrot.slane %v914_v5, %v4556_v55  ;;  %vm821_vm13 = vcmp.lt.s32.totalorder %v4526_v57, 15  ;;  %vm969_vm12 = vmand %vm4818_vm9, %vm4608_vm14 }
 0x5b8   : > { %v967_v36 = vsel %vm925_vm11, %v965_v38, 0.0  ;;  %v1035_v5 = vadd.f32 %v1033_v26, %v4763_v51  ;;  %v1036_v21 = vadd.f32 %v1034_v33, %v4767_v20  ;;  %v1070_v32 = vpop.permute.xlu1 %1069  ;;  %v1068_v27 = vpop.permute.xlu0 %1067  ;;  %v1198_v4 = vsel %vm6829_vm4, %v4185_v40, %v4187_v41  ;;  %vm4956_vm11 = vmand %vm820_vm5, %vm821_vm13 }
 0x5b9   : > { %v1002_v19 = vrot.slane %v995_v39, %v4556_v55  ;;  %v968_v23 = vadd.f32 %v967_v36, %v879_v31  ;;  %v1071_v28 = vsel %vm1064_vm0, %v1068_v27, %v1070_v32  ;;  %v1072_v20 = vsel %vm1064_vm0, %v1070_v32, %v1068_v27 }
 0x5ba   : > { %v1039_v41 = vcombine.low %v1035_v5, %v1036_v21  ;;  %v1077_v12 = vmul.f32 %v1076_v30, %v1072_v20  ;;  %v1078_v25 = vmul.f32 %v1076_v30, %v1071_v28  ;;  %2376 = vrot.lane.b32.xlu1 %v4279_v17, %s7010_s14  ;;  %v923_v7 = vsel %vm881_vm3, %v921_v22, 0.0  ;;  %2374 = vrot.lane.b32.xlu0 %v4277_v16, %s7010_s14  ;;  %vm1013_vm3 = vmand %vm4818_vm9, %vm4956_vm11  ;;  %s7056_s14 = smov 80  }
 0x5bb   : > { %v1009_v51 = vrot.slane %v1002_v19, %v4556_v55  ;;  %vm826_vm0 = vcmp.ge.s32.totalorder %v4526_v57, 4294967294  ;;  %vm827_vm5 = vcmp.lt.s32.totalorder %v4526_v57, 14  ;;  %v1120_v38 = vstv %s4878_s11  ;;  %s7051_s11 = sld [smem:[#allocation80_spill]] }
 0x5bc   : > { %v1046_v39 = vrot.slane %v1039_v41, %v4556_v55  ;;  %v1079_v26 = vadd.f32 %v1077_v12, %v4771_v1  ;;  %v1080_v33 = vadd.f32 %v1078_v25, %v4779_v29  ;;  %v1114_v31 = vpop.permute.xlu1 %1113  ;;  %v1112_v22 = vpop.permute.xlu0 %1111  ;;  %v7011_v36 = vstv %s4494_s26  ;;  %s5095_s26 = sld [smem:[#allocation9 + $0x3c]] }
 0x5bd   : > { %v1011_v30 = vsel %vm969_vm12, %v1009_v51, 0.0  ;;  %v4985_v19 = vmul.f32 %v7011_v36, %v1198_v4  ;;  %v1115_v21 = vsel %vm1108_vm2, %v1112_v22, %v1114_v31  ;;  %v1116_v1 = vsel %vm1108_vm2, %v1114_v31, %v1112_v22  ;;  %vm5000_vm12 = vmand %vm826_vm0, %vm827_vm5 }
 0x5be   : > { %v1012_v5 = vadd.f32 %v1011_v30, %v923_v7  ;;  %v1053_v29 = vrot.slane %v1046_v39, %v4556_v55  ;;  %v1083_v27 = vcombine.low %v1079_v26, %v1080_v33  ;;  %v1121_v4 = vmul.f32 %v1120_v38, %v1116_v1  ;;  %2684 = vrot.lane.b32.xlu1 %v4279_v17, %s7014_s20  ;;  %vm1057_vm5 = vmand %vm4818_vm9, %vm5000_vm12 }
 0x5bf   : > { %v1122_v28 = vmul.f32 %v1120_v38, %v1115_v21  ;;  %v1242_v20 = vsel %vm1240_vm8, %v4193_v42, %v4195_v43  ;;  %vm832_vm2 = vcmp.ge.s32.totalorder %v4526_v57, 4294967293  ;;  %vm833_vm13 = vcmp.lt.s32.totalorder %v4526_v57, 13  ;;  %2682 = vrot.lane.b32.xlu0 %v4277_v16, %s7014_s20  ;;  %s5309_s20 = sld [smem:[#allocation9 + $0x42]] }
 0x5c0   : > { %v1164_v51 = vstv %s4924_s22  ;;  %v1055_v41 = vsel %vm1013_vm3, %v1053_v29, 0.0  ;;  %v1090_v12 = vrot.slane %v1083_v27, %v4556_v55  ;;  %v1123_v25 = vadd.f32 %v1121_v4, %v4810_v24  ;;  %v1158_v38 = vpop.permute.xlu1 %1157  ;;  %v1156_v30 = vpop.permute.xlu0 %1155  ;;  %vm5039_vm0 = vmand %vm832_vm2, %vm833_vm13  ;;  %s5253_s22 = sld [smem:[#allocation9 + $0x40]] }
 0x5c1   : > { %v1124_v7 = vadd.f32 %v1122_v28, %v4853_v9  ;;  %v1241_v39 = vsel %vm1240_vm8, %v4195_v43, %v4193_v42  ;;  %v1056_v26 = vadd.f32 %v1055_v41, %v968_v23  ;;  %vm7015_vm3 = vcmp.lt.s32.totalorder %v4528_v8, 35  ;;  %vm1101_vm13 = vmand %vm4818_vm9, %vm5039_vm0 }
 0x5c2   : > { %v1159_v24 = vsel %vm7015_vm3, %v1156_v30, %v1158_v38  ;;  %vm7016_vm4 = vmmov %vm7015_vm3  ;;  %v1097_v33 = vrot.slane %v1090_v12, %v4556_v55  ;;  %2420 = vrot.lane.b32.xlu1 %v4279_v17, %s7019_s16  ;;  %v7020_v22 = vmov %v7011_v36  ;;  %v7021_v21 = vstv %s4496_s7  ;;  %s7026_s7 = smov 97  }
 0x5c3   : > { %v1160_v9 = vsel %vm7016_vm4, %v1158_v38, %v1156_v30  ;;  %v1127_v43 = vcombine.low %v1123_v25, %v1124_v7  ;;  %v1166_v31 = vmul.f32 %v1164_v51, %v1159_v24  ;;  %v1207_v36 = vmul.f32 %v7020_v22, %v4900_v35  ;;  %2418 = vrot.lane.b32.xlu0 %v4277_v16, %s7019_s16  ;;  %s5350_s16 = sld [smem:[#allocation9 + $0x43]] }
 0x5c4   : > { %v1165_v23 = vmul.f32 %v1164_v51, %v1160_v9  ;;  %v1250_v1 = vmul.f32 %v7021_v21, %v1242_v20  ;;  %vm7022_vm4 = vcmp.lt.s32.totalorder %v4528_v8, 32  ;;  %v1208_v29 = vstv %s4972_s8  ;;  %v1202_v20 = vpop.permute.xlu1 %1201  ;;  %v1200_v51 = vpop.permute.xlu0 %1199  ;;  %s5280_s8 = sld [smem:[#allocation9 + $0x41]] }
 0x5c5   : > { %v1286_v57 = vsel %vm7022_vm4, %v4201_v44, %v4203_v45  ;;  %v1099_v27 = vsel %vm1057_vm5, %v1097_v33, 0.0  ;;  %v1134_v35 = vrot.slane %v1127_v43, %v4556_v55  ;;  %v1168_v28 = vadd.f32 %v1166_v31, %v4882_v34  ;;  %vm7027_vm3 = vmmov %vm7022_vm4 }
 0x5c6   : > { %v1167_v4 = vadd.f32 %v1165_v23, %v4867_v37  ;;  %v7023_v41 = vmov %v7021_v21  ;;  %v5069_v25 = vadd.f32 %v1099_v27, %v1012_v5  ;;  %vm7024_vm2 = vcmp.lt.s32.totalorder %v4528_v8, 34  ;;  %2464 = vrot.lane.b32.xlu1 %v4279_v17, %s7026_s7 }
 0x5c7   : > { %v1251_v12 = vmul.f32 %v7023_v41, %v1241_v39  ;;  %v1203_v7 = vsel %vm7024_vm2, %v1200_v51, %v1202_v20  ;;  %vm7025_vm5 = vmmov %vm7024_vm2  ;;  %v1141_v34 = vrot.slane %v1134_v35, %v4556_v55  ;;  %v1285_v5 = vsel %vm7027_vm3, %v4203_v45, %v4201_v44  ;;  %2462 = vrot.lane.b32.xlu0 %v4277_v16, %s7026_s7  ;;  %s5418_s7 = sld [smem:[#allocation9 + $0x45]] }
 0x5c8   : > { %v1204_v37 = vsel %vm7025_vm5, %v1202_v20, %v1200_v51  ;;  %v1171_v38 = vcombine.low %v1167_v4, %v1168_v28  ;;  %v1210_v24 = vmul.f32 %v1208_v29, %v1203_v7  ;;  %v7028_v39 = vstv %s4506_s25  ;;  %v1246_v22 = vpop.permute.xlu1 %1245  ;;  %v1244_v21 = vpop.permute.xlu0 %1243  ;;  %s5168_s25 = sld [smem:[#allocation9 + $0x3e]] }
 0x5c9   : > { %v1209_v30 = vmul.f32 %v1208_v29, %v1204_v37  ;;  %v1294_v9 = vmul.f32 %v7028_v39, %v1286_v57  ;;  %vm7029_vm4 = vcmp.lt.s32.totalorder %v4528_v8, 31  ;;  %v1252_v43 = vstv %s5015_s18  ;;  %s7068_s18 = smov 94  }
 0x5ca   : > { %v1329_v33 = vsel %vm7029_vm4, %v4211_v47, %v4209_v46  ;;  %vm7030_vm2 = vmmov %vm7029_vm4  ;;  %vm6830_vm5 = vcmp.lt.s32.totalorder %v4528_v8, 19  ;;  %v1143_v44 = vsel %vm1101_vm13, %v1141_v34, 0.0  ;;  %v1212_v31 = vadd.f32 %v1210_v24, %v1207_v36  ;;  %2728 = vrot.lane.b32.xlu1 %v4279_v17, %s7031_s24 }
 0x5cb   : > { %v1330_v23 = vsel %vm7030_vm2, %v4209_v46, %v4211_v47  ;;  %v1211_v45 = vadd.f32 %v1209_v30, %v4985_v19  ;;  %v5108_v57 = vadd.f32 %v1143_v44, %v1056_v26  ;;  %vm799_vm3 = vcmp.ge.s32.totalorder %v4513_v13, 2  ;;  %2726 = vrot.lane.b32.xlu0 %v4277_v16, %s7031_s24  ;;  %s5448_s24 = sld [smem:[#allocation9 + $0x46]] }
 0x5cc   : > { %v1247_v46 = vsel %vm1240_vm8, %v1244_v21, %v1246_v22  ;;  %v1248_v47 = vsel %vm1240_vm8, %v1246_v22, %v1244_v21  ;;  %vm800_vm9 = vcmp.lt.s32.totalorder %v4513_v13, 18  ;;  %v7032_v36 = vmov %v7028_v39  ;;  %v1290_v34 = vpop.permute.xlu1 %1289 }
 0x5cd   : > { %v1215_v6 = vcombine.low %v1211_v45, %v1212_v31  ;;  %v1253_v29 = vmul.f32 %v1252_v43, %v1248_v47  ;;  %v1254_v19 = vmul.f32 %v1252_v43, %v1247_v46  ;;  %v1295_v27 = vmul.f32 %v7032_v36, %v1285_v5  ;;  %vm5147_vm2 = vmand %vm799_vm3, %vm800_vm9 }
 0x5ce   : > { %v7033_v26 = vstv %s4508_s17  ;;  %v1178_v4 = vrot.slane %v1171_v38, %v4556_v55  ;;  %v1296_v28 = vstv %s5057_s19  ;;  %vm7035_vm8 = vcmp.lt.s32.totalorder %v4528_v8, 30  ;;  %v1288_v38 = vpop.permute.xlu0 %1287  ;;  %s7041_s17 = smov 81   ;;  %vm1145_vm3 = vmand %vm5147_vm2, %vm4840_vm1  ;;  %s5386_s19 = sld [smem:[#allocation9 + $0x44]] }
 0x5cf   : > { %v1338_v35 = vmul.f32 %v7033_v26, %v1330_v23  ;;  %v7034_v20 = vmov %v7033_v26  ;;  %v1374_v41 = vsel %vm7035_vm8, %v4217_v48, %v4219_v49  ;;  %v1255_v7 = vadd.f32 %v1253_v29, %v1250_v1  ;;  %vm7036_vm4 = vmmov %vm7035_vm8  ;;  %2772 = vrot.lane.b32.xlu1 %v4279_v17, %s7041_s17  ;;  %2770 = vrot.lane.b32.xlu0 %v4277_v16, %s7041_s17  ;;  %s5559_s17 = sld [smem:[#allocation9 + $0x4b]] }
 0x5d0   : > { %v1339_v51 = vmul.f32 %v7034_v20, %v1329_v33  ;;  %v1256_v37 = vadd.f32 %v1254_v19, %v1251_v12  ;;  %v1373_v30 = vsel %vm7036_vm4, %v4219_v49, %v4217_v48  ;;  %v1417_v24 = vsel %vm1416_vm6, %v4229_v53, %v4227_v52  ;;  %v1334_v47 = vpop.permute.xlu1 %1333  ;;  %vm1233_vm9 = vmand %vm5147_vm2, %vm4859_vm7 }
 0x5d1   : > { %vm7039_vm8 = vcmp.lt.s32.totalorder %v4528_v8, 32  ;;  %v1418_v49 = vsel %vm1416_vm6, %v4227_v52, %v4229_v53  ;;  %v7042_v43 = vstv %s4515_s2  ;;  %v1185_v44 = vrot.slane %v1178_v4, %v4556_v55  ;;  %s7048_s2 = smov 96  }
 0x5d2   : > { %v1291_v12 = vsel %vm7039_vm8, %v1288_v38, %v1290_v34  ;;  %vm7040_vm13 = vmmov %vm7039_vm8  ;;  %v1259_v5 = vcombine.low %v1255_v7, %v1256_v37  ;;  %v1382_v23 = vmul.f32 %v7042_v43, %v1374_v41  ;;  %v1222_v45 = vrot.slane %v1215_v6, %v4556_v55  ;;  %v1332_v29 = vpop.permute.xlu0 %1331 }
 0x5d3   : > { %v1292_v48 = vsel %vm7040_vm13, %v1290_v34, %v1288_v38  ;;  %v1298_v33 = vmul.f32 %v1296_v28, %v1291_v12  ;;  %v1340_v31 = vstv %s5095_s26  ;;  %v7043_v52 = vmov %v7042_v43  ;;  %2508 = vrot.lane.b32.xlu1 %v4279_v17, %s7048_s2  ;;  %2506 = vrot.lane.b32.xlu0 %v4277_v16, %s7048_s2  ;;  %s7091_s26 = smov 77   ;;  %s5666_s2 = sld [smem:[#allocation9 + $0x22]] }
 0x5d4   : > { %v1297_v39 = vmul.f32 %v1296_v28, %v1292_v48  ;;  %v1383_v53 = vmul.f32 %v7043_v52, %v1373_v30  ;;  %v1266_v22 = vrot.slane %v1259_v5, %v4556_v55  ;;  %v7044_v6 = vstv %s4517_s3  ;;  %s5210_s3 = sld [smem:[#allocation9 + $0x3f]] }
 0x5d5   : > { %v1300_v46 = vadd.f32 %v1298_v33, %v1295_v27  ;;  %v5179_v19 = vmul.f32 %v7044_v6, %v1418_v49  ;;  %v7045_v36 = vmov %v7044_v6  ;;  %vm7046_vm13 = vcmp.lt.s32.totalorder %v4528_v8, 31  ;;  %v1378_v49 = vpop.permute.xlu1 %1377 }
 0x5d6   : > { %v1299_v21 = vadd.f32 %v1297_v39, %v1294_v9  ;;  %v5183_v26 = vmul.f32 %v7045_v36, %v1417_v24  ;;  %v1335_v4 = vsel %vm7046_vm13, %v1332_v29, %v1334_v47  ;;  %vm7047_vm4 = vmmov %vm7046_vm13  ;;  %vm6831_vm8 = vcmp.lt.s32.totalorder %v4528_v8, 17  ;;  %v1376_v5 = vpop.permute.xlu0 %1375 }
 0x5d7   : > { %v1336_v9 = vsel %vm7047_vm4, %v1334_v47, %v1332_v29  ;;  %v1273_v27 = vrot.slane %v1266_v22, %v4556_v55  ;;  %v1342_v41 = vmul.f32 %v1340_v31, %v1335_v4  ;;  %v1461_v7 = vsel %vm6830_vm5, %v4239_v59, %v4237_v58  ;;  %vm1189_vm13 = vmand %vm5147_vm2, %vm4889_vm10  ;;  %2552 = vrot.lane.b32.xlu1 %v4279_v17, %s7052_s28 }
 0x5d8   : > { %v1303_v28 = vcombine.low %v1299_v21, %v1300_v46  ;;  %v1341_v20 = vmul.f32 %v1340_v31, %v1336_v9  ;;  %v1187_v37 = vsel %vm1145_vm3, %v1185_v44, 0.0  ;;  %v1229_v34 = vrot.slane %v1222_v45, %v4556_v55  ;;  %vm1277_vm3 = vmand %vm5147_vm2, %vm4608_vm14  ;;  %2550 = vrot.lane.b32.xlu0 %v4277_v16, %s7052_s28  ;;  %s5687_s28 = sld [smem:[#allocation9 + $0x25]] }
 0x5d9   : > { %v1384_v38 = vstv %s5126_s27  ;;  %v1275_v30 = vsel %vm1233_vm9, %v1273_v27, 0.0  ;;  %v1344_v48 = vadd.f32 %v1342_v41, %v1339_v51  ;;  %v1462_v39 = vsel %vm6830_vm5, %v4237_v58, %v4239_v59  ;;  %s5505_s27 = sld [smem:[#allocation9 + $0x48]] }
 0x5da   : > { %v1310_v24 = vrot.slane %v1303_v28, %v4556_v55  ;;  %v1343_v12 = vadd.f32 %v1341_v20, %v1338_v35  ;;  %v1276_v33 = vadd.f32 %v1275_v30, %v1187_v37  ;;  %vm7049_vm9 = vcmp.lt.s32.totalorder %v4528_v8, 30  ;;  %v1420_v29 = vpop.permute.xlu0 %1419 }
 0x5db   : > { %v1379_v43 = vsel %vm7049_vm9, %v1376_v5, %v1378_v49  ;;  %vm7050_vm4 = vmmov %vm7049_vm9  ;;  %vm7053_vm5 = vcmp.lt.s32.totalorder %v4528_v8, 18  ;;  %v1231_v52 = vsel %vm1189_vm13, %v1229_v34, 0.0  ;;  %v1428_v22 = vstv %s5168_s25  ;;  %2816 = vrot.lane.b32.xlu1 %v4279_v17, %s7056_s14  ;;  %s5614_s25 = sld [smem:[#allocation9 + $0x4d]] }
 0x5dc   : > { %v1380_v35 = vsel %vm7050_vm4, %v1378_v49, %v1376_v5  ;;  %v1317_v51 = vrot.slane %v1310_v24, %v4556_v55  ;;  %v1347_v44 = vcombine.low %v1343_v12, %v1344_v48  ;;  %v1386_v31 = vmul.f32 %v1384_v38, %v1379_v43  ;;  %vm7054_vm9 = vmmov %vm7053_vm5  ;;  %2814 = vrot.lane.b32.xlu0 %v4277_v16, %s7056_s14  ;;  %s5692_s14 = sld [smem:[#allocation9 + $0x2c]] }
 0x5dd   : > { %v1385_v45 = vmul.f32 %v1384_v38, %v1380_v35  ;;  %v1505_v58 = vsel %vm7053_vm5, %v4247_v63, %v4245_v62  ;;  %v1506_v59 = vsel %vm7054_vm9, %v4245_v62, %v4247_v63  ;;  %v1422_v63 = vpop.permute.xlu1 %1421  ;;  %v7055_v6 = vstv %s7051_s11  ;;  %vm1321_vm5 = vmand %vm5147_vm2, %vm4956_vm11  ;;  %s5685_s11 = sld [smem:[#allocation9 + $0x24]] }
 0x5de   : > { %v1319_v21 = vsel %vm1277_vm3, %v1317_v51, 0.0  ;;  %v1354_v46 = vrot.slane %v1347_v44, %v4556_v55  ;;  %v1388_v62 = vadd.f32 %v1386_v31, %v1383_v53  ;;  %v1470_v36 = vmul.f32 %v7055_v6, %v1462_v39 }
 0x5df   : > { %v1387_v47 = vadd.f32 %v1385_v45, %v1382_v23  ;;  %v1320_v4 = vadd.f32 %v1319_v21, %v1231_v52  ;;  %v1423_v9 = vsel %vm1416_vm6, %v1420_v29, %v1422_v63  ;;  %v1424_v23 = vsel %vm1416_vm6, %v1422_v63, %v1420_v29  ;;  %vm1365_vm6 = vmand %vm5147_vm2, %vm5000_vm12 }
 0x5e0   : > { %v1361_v53 = vrot.slane %v1354_v46, %v4556_v55  ;;  %v1429_v28 = vmul.f32 %v1428_v22, %v1424_v23  ;;  %v1430_v20 = vmul.f32 %v1428_v22, %v1423_v9  ;;  %v7057_v41 = vmov %v7055_v6 }
 0x5e1   : > { %v1391_v27 = vcombine.low %v1387_v47, %v1388_v62  ;;  %v1471_v37 = vmul.f32 %v7057_v41, %v1461_v7  ;;  %v7058_v34 = vstv %s4532_s1  ;;  %v1472_v12 = vstv %s5210_s3  ;;  %v1466_v43 = vpop.permute.xlu1 %1465  ;;  %v1464_v7 = vpop.permute.xlu0 %1463  ;;  %s7062_s1 = smov 79   ;;  %s5675_s3 = sld [smem:[#allocation9 + $0x2a]] }
 0x5e2   : > { %v1514_v38 = vmul.f32 %v7058_v34, %v1506_v59  ;;  %v7059_v30 = vmov %v7058_v34  ;;  %v1363_v48 = vsel %vm1321_vm5, %v1361_v53, 0.0  ;;  %v1431_v5 = vadd.f32 %v1429_v28, %v5179_v19  ;;  %2860 = vrot.lane.b32.xlu1 %v4279_v17, %s7062_s1  ;;  %2858 = vrot.lane.b32.xlu0 %v4277_v16, %s7062_s1  ;;  %s3281_s1 = sld [smem:[#allocation10 + $0x1]] }
 0x5e3   : > { %v1515_v24 = vmul.f32 %v7059_v30, %v1505_v58  ;;  %v1398_v49 = vrot.slane %v1391_v27, %v4556_v55  ;;  %v1432_v39 = vadd.f32 %v1430_v20, %v5183_v26  ;;  %v1550_v35 = vsel %vm6831_vm8, %v4253_v2, %v4255_v3 }
 0x5e4   : > { %v1364_v51 = vadd.f32 %v1363_v48, %v1276_v33  ;;  %vm7060_vm3 = vcmp.lt.s32.totalorder %v4528_v8, 19  ;;  %v1549_v33 = vsel %vm6831_vm8, %v4255_v3, %v4253_v2  ;;  %vm805_vm5 = vcmp.ge.s32.totalorder %v4513_v13, 1  ;;  %vm1409_vm8 = vmand %vm5147_vm2, %vm5039_vm0 }
 0x5e5   : > { %v1467_v44 = vsel %vm7060_vm3, %v1464_v7, %v1466_v43  ;;  %vm7061_vm9 = vmmov %vm7060_vm3  ;;  %v1405_v26 = vrot.slane %v1398_v49, %v4556_v55  ;;  %v1435_v45 = vcombine.low %v1431_v5, %v1432_v39  ;;  %vm806_vm3 = vcmp.lt.s32.totalorder %v4513_v13, 17  ;;  %v1510_v47 = vpop.permute.xlu1 %1509  ;;  %v1508_v2 = vpop.permute.xlu0 %1507 }
 0x5e6   : > { %v1468_v19 = vsel %vm7061_vm9, %v1466_v43, %v1464_v7  ;;  %v1474_v58 = vmul.f32 %v1472_v12, %v1467_v44  ;;  %v1516_v59 = vstv %s5253_s22  ;;  %v7063_v3 = vstv %s4534_s15  ;;  %vm5331_vm4 = vmand %vm805_vm5, %vm806_vm3  ;;  %2596 = vrot.lane.b32.xlu1 %v4279_v17, %s7068_s18  ;;  %2594 = vrot.lane.b32.xlu0 %v4277_v16, %s7068_s18  ;;  %s7075_s15 = smov 93   ;;  %s5690_s22 = sld [smem:[#allocation9 + $0x2b]] }
 0x5e7   : > { %v1473_v31 = vmul.f32 %v1472_v12, %v1468_v19  ;;  %v1407_v52 = vsel %vm1365_vm6, %v1405_v26, 0.0  ;;  %v1442_v22 = vrot.slane %v1435_v45, %v4556_v55  ;;  %v1558_v62 = vmul.f32 %v7063_v3, %v1550_v35  ;;  %vm1453_vm2 = vmand %vm5331_vm4, %vm4840_vm1  ;;  %s5703_s18 = sld [smem:[#allocation9 + $0x26]] }
 0x5e8   : > { %v1476_v46 = vadd.f32 %v1474_v58, %v1471_v37  ;;  %v5315_v63 = vadd.f32 %v1407_v52, %v1320_v4  ;;  %vm7064_vm9 = vcmp.lt.s32.totalorder %v4528_v8, 18  ;;  %vm1724_vm13 = vcmp.lt.s32.totalorder %v4528_v8, 13 }
 0x5e9   : > { %v1475_v21 = vadd.f32 %v1473_v31, %v1470_v36  ;;  %v1511_v29 = vsel %vm7064_vm9, %v1508_v2, %v1510_v47  ;;  %vm7065_vm6 = vmmov %vm7064_vm9  ;;  %v1449_v36 = vrot.slane %v1442_v22, %v4556_v55  ;;  %v7069_v27 = vmov %v7063_v3  ;;  %v1554_v48 = vpop.permute.xlu1 %1553 }
 0x5ea   : > { %v1512_v6 = vsel %vm7065_vm6, %v1510_v47, %v1508_v2  ;;  %v1518_v53 = vmul.f32 %v1516_v59, %v1511_v29  ;;  %v1559_v28 = vmul.f32 %v7069_v27, %v1549_v33  ;;  %vm7070_vm9 = vcmp.lt.s32.totalorder %v4528_v8, 16  ;;  %2640 = vrot.lane.b32.xlu1 %v4279_v17, %s7075_s15  ;;  %2638 = vrot.lane.b32.xlu0 %v4277_v16, %s7075_s15  ;;  %s5717_s15 = sld [smem:[#allocation9 + $0x2d]] }
 0x5eb   : > { %v1479_v9 = vcombine.low %v1475_v21, %v1476_v46  ;;  %v1517_v23 = vmul.f32 %v1516_v59, %v1512_v6  ;;  %v1593_v20 = vsel %vm7070_vm9, %v4263_v11, %v4261_v10  ;;  %vm7071_vm5 = vmmov %vm7070_vm9  ;;  %v1560_v41 = vstv %s5280_s8  ;;  %s2983_s8 = sld [smem:[#allocation10]] }
 0x5ec   : > { %v1594_v13 = vsel %vm7071_vm5, %v4261_v10, %v4263_v11  ;;  %v1451_v37 = vsel %vm1409_vm8, %v1449_v36, 0.0  ;;  %v1520_v12 = vadd.f32 %v1518_v53, %v1515_v24  ;;  %v1552_v10 = vpop.permute.xlu0 %1551  ;;  %vm7072_vm3 = vcmp.lt.s32.totalorder %v4528_v8, 15 }
 0x5ed   : > { %v1486_v34 = vrot.slane %v1479_v9, %v4556_v55  ;;  %v1519_v30 = vadd.f32 %v1517_v23, %v1514_v38  ;;  %v1638_v11 = vsel %vm7072_vm3, %v4269_v14, %v4271_v15  ;;  %v5362_v49 = vadd.f32 %v1451_v37, %v1364_v51  ;;  %vm7078_vm9 = vmmov %vm7072_vm3  ;;  %v1598_v59 = vpop.permute.xlu1 %1597  ;;  %v7087_v37 = vld [vmem:[#allocation30_spill] sm:$0xff] }
 0x5ee   : > { %vm7073_vm8 = vcmp.lt.s32.totalorder %v4528_v8, 17  ;;  %v7076_v7 = vstv %s4536_s12  ;;  %v1637_v19 = vsel %vm7078_vm9, %v4271_v15, %v4269_v14  ;;  %v1604_v26 = vstv %s5309_s20  ;;  %vm1497_vm3 = vmand %vm5331_vm4, %vm4889_vm10  ;;  %s7082_s12 = smov 78   ;;  %s7139_s20 = sld [smem:[#allocation100_spill]] }
 0x5ef   : > { %v1555_v1 = vsel %vm7073_vm8, %v1552_v10, %v1554_v48  ;;  %vm7074_vm6 = vmmov %vm7073_vm8  ;;  %v1493_v24 = vrot.slane %v1486_v34, %v4556_v55  ;;  %v1523_v5 = vcombine.low %v1519_v30, %v1520_v12  ;;  %v1602_v35 = vmul.f32 %v7076_v7, %v1594_v13  ;;  %2904 = vrot.lane.b32.xlu1 %v4279_v17, %s7082_s12 }
 0x5f0   : > { %v1556_v38 = vsel %vm7074_vm6, %v1554_v48, %v1552_v10  ;;  %v1562_v43 = vmul.f32 %v1560_v41, %v1555_v1  ;;  %v7077_v51 = vmov %v7076_v7  ;;  %vm1768_vm5 = vcmp.lt.s32.totalorder %v4528_v8, 3  ;;  %v1596_v52 = vpop.permute.xlu0 %1595  ;;  %2902 = vrot.lane.b32.xlu0 %v4277_v16, %s7082_s12  ;;  %s5733_s12 = sld [smem:[#allocation9 + $0x29]] }
 0x5f1   : > { %v1561_v39 = vmul.f32 %v1560_v41, %v1556_v38  ;;  %v1603_v44 = vmul.f32 %v7077_v51, %v1593_v20  ;;  %v1495_v45 = vsel %vm1453_vm2, %v1493_v24, 0.0  ;;  %v1530_v31 = vrot.slane %v1523_v5, %v4556_v55  ;;  %v1642_v20 = vpop.permute.xlu1 %1641  ;;  %v7086_v41 = vld [vmem:[#allocation31_spill] sm:$0xff] }
 0x5f2   : > { %v1564_v33 = vadd.f32 %v1562_v43, %v1559_v28  ;;  %v7079_v22 = vstv %s4542_s4  ;;  %v1496_v14 = vadd.f32 %v1495_v45, %v5108_v57  ;;  %vm7080_vm8 = vcmp.lt.s32.totalorder %v4528_v8, 16  ;;  %s7090_s4 = sld [smem:[#allocation83_spill]] }
 0x5f3   : > { %v1563_v58 = vadd.f32 %v1561_v39, %v1558_v62  ;;  %v1646_v21 = vmul.f32 %v7079_v22, %v1638_v11  ;;  %v1599_v15 = vsel %vm7080_vm8, %v1596_v52, %v1598_v59  ;;  %vm7081_vm2 = vmmov %vm7080_vm8  ;;  %vm1812_vm6 = vcmp.lt.s32.totalorder %v4528_v8, 2  ;;  %2948 = vrot.lane.b32.xlu1 %v4279_v17, %s7091_s26 }
 0x5f4   : > { %v1600_v46 = vsel %vm7081_vm2, %v1598_v59, %v1596_v52  ;;  %v1537_v47 = vrot.slane %v1530_v31, %v4556_v55  ;;  %v1606_v62 = vmul.f32 %v1604_v26, %v1599_v15  ;;  %v7083_v57 = vmov %v7079_v22  ;;  %v1640_v13 = vpop.permute.xlu0 %1639  ;;  %2946 = vrot.lane.b32.xlu0 %v4277_v16, %s7091_s26  ;;  %s7147_s26 = sld [smem:[#allocation87_spill]] }
 0x5f5   : > { %v1567_v2 = vcombine.low %v1563_v58, %v1564_v33  ;;  %v1605_v3 = vmul.f32 %v1604_v26, %v1600_v46  ;;  %v1647_v29 = vmul.f32 %v7083_v57, %v1637_v19  ;;  %vm7084_vm9 = vcmp.lt.s32.totalorder %v4528_v8, 14  ;;  %v1686_v51 = vpop.permute.xlu1 %1685  ;;  %v3026_v58 = vld [vmem:[#allocation4 + $0x10] sm:$0xff]  ;;  %v7098_v46 = vld [vmem:[#allocation32_spill] sm:$0xff] }
 0x5f6   : > { %v1681_v6 = vsel %vm7084_vm9, %v4283_v0, %v4281_v18  ;;  %vm7085_vm8 = vmmov %vm7084_vm9  ;;  %v1648_v9 = vstv %s5350_s16  ;;  %v1539_v23 = vsel %vm1497_vm3, %v1537_v47, 0.0  ;;  %v1608_v28 = vadd.f32 %v1606_v62, %v1603_v44  ;;  %v7099_v47 = vld [vmem:[#allocation33_spill] sm:$0xff]  ;;  %s5705_s16 = sld [smem:[#allocation9 + $0x27]] }
 0x5f7   : > { %v1682_v36 = vsel %vm7085_vm8, %v4281_v18, %v4283_v0  ;;  %v1574_v53 = vrot.slane %v1567_v2, %v4556_v55  ;;  %v1607_v27 = vadd.f32 %v1605_v3, %v1602_v35  ;;  %v1726_v18 = vsel %vm1724_vm13, %v7087_v37, %v7086_v41  ;;  %vm1541_vm3 = vmand %vm5331_vm4, %vm4859_vm7  ;;  %3029 = vperm.xlu1 %3458, %v3026_v58  }
 0x5f8   : > { %v1540_v0 = vadd.f32 %v1539_v23, %v5069_v25  ;;  %vm7088_vm2 = vcmp.lt.s32.totalorder %v4528_v8, 15  ;;  %v7092_v25 = vstv %s4544_s10  ;;  %v1725_v5 = vsel %vm1724_vm13, %v7086_v41, %v7087_v37  ;;  %v1684_v44 = vpop.permute.xlu0 %1683  ;;  %s5475_s10 = sld [smem:[#allocation9 + $0x47]] }
 0x5f9   : > { %v1643_v34 = vsel %vm7088_vm2, %v1640_v13, %v1642_v20  ;;  %vm7089_vm9 = vmmov %vm7088_vm2  ;;  %v1581_v12 = vrot.slane %v1574_v53, %v4556_v55  ;;  %v1611_v48 = vcombine.low %v1607_v27, %v1608_v28  ;;  %v1690_v1 = vmul.f32 %v7092_v25, %v1682_v36  ;;  %v7100_v53 = vld [vmem:[#allocation35_spill] sm:$0xff]  ;;  %v7101_v27 = vld [vmem:[#allocation34_spill] sm:$0xff] }
 0x5fa   : > { %v1644_v30 = vsel %vm7089_vm9, %v1642_v20, %v1640_v13  ;;  %v1650_v11 = vmul.f32 %v1648_v9, %v1643_v34  ;;  %v7093_v38 = vmov %v7092_v25  ;;  %v1692_v39 = vstv %s5386_s19  ;;  %vm1585_vm2 = vmand %vm5331_vm4, %vm4608_vm14  ;;  %s5719_s19 = sld [smem:[#allocation9 + $0x2e]] }
 0x5fb   : > { %v1649_v10 = vmul.f32 %v1648_v9, %v1644_v30  ;;  %v1691_v24 = vmul.f32 %v7093_v38, %v1681_v6  ;;  %v1583_v43 = vsel %vm1541_vm3, %v1581_v12, 0.0  ;;  %v1618_v17 = vrot.slane %v1611_v48, %v4556_v55  ;;  %vm7095_vm9 = vmmov %vm7085_vm8  ;;  %v1730_v9 = vpop.permute.xlu1 %1729  ;;  %v3040_v12 = vld [vmem:[#allocation4 + $0x18] sm:$0xff] }
 0x5fc   : > { %v1652_v35 = vadd.f32 %v1650_v11, %v1647_v29  ;;  %v7094_v19 = vstv %s7090_s4  ;;  %v1584_v45 = vadd.f32 %v1583_v43, %v1496_v14  ;;  %v1687_v16 = vsel %vm7095_vm9, %v1684_v44, %v1686_v51  ;;  %vm7096_vm3 = vmmov %vm7085_vm8  ;;  %v1728_v23 = vpop.permute.xlu0 %1727  ;;  %s5750_s4 = sld [smem:[#allocation9 + $0x30]] }
 0x5fd   : > { %v1651_v7 = vadd.f32 %v1649_v10, %v1646_v21  ;;  %v1734_v26 = vmul.f32 %v7094_v19, %v1726_v18  ;;  %v1688_v31 = vsel %vm7096_vm3, %v1686_v51, %v1684_v44  ;;  %vm1931_vm8 = vcmp.lt.s32.totalorder %v4528_v8, 127  ;;  %v3012_v21 = vld [vmem:[#allocation4 + $0x8] sm:$0xff]  ;;  %vm1673_vm9 = vmand %vm5331_vm4, %vm5000_vm12 }
 0x5fe   : > { %v1625_v33 = vrot.slane %v1618_v17, %v4556_v55  ;;  %v1693_v52 = vmul.f32 %v1692_v39, %v1688_v31  ;;  %v1694_v22 = vmul.f32 %v1692_v39, %v1687_v16  ;;  %v7097_v14 = vmov %v7094_v19  ;;  %3015 = vperm.xlu0 %3459, %v3012_v21  }
 0x5ff   : > { %v1655_v59 = vcombine.low %v1651_v7, %v1652_v35  ;;  %v1735_v15 = vmul.f32 %v7097_v14, %v1725_v5  ;;  %v1769_v2 = vsel %vm1768_vm5, %v7099_v47, %v7098_v46  ;;  %v1770_v3 = vsel %vm1768_vm5, %v7098_v46, %v7099_v47  ;;  %v1774_v43 = vpop.permute.xlu1 %1773 }
 0x600   : > { %v1736_v62 = vstv %s5418_s7  ;;  %v1627_v57 = vsel %vm1585_vm2, %v1625_v33, 0.0  ;;  %v1695_v6 = vadd.f32 %v1693_v52, %v1690_v1  ;;  %v1696_v36 = vadd.f32 %v1694_v22, %v1691_v24  ;;  %vm1629_vm2 = vmand %vm5331_vm4, %vm4956_vm11  ;;  %v1772_v17 = vpop.permute.xlu0 %1771  ;;  %v7107_v52 = vld [vmem:[#allocation37_spill] sm:$0xff]  ;;  %s5748_s7 = sld [smem:[#allocation9 + $0x2f]] }
 0x601   : > { %v1662_v29 = vrot.slane %v1655_v59, %v4556_v55  ;;  %v1814_v28 = vsel %vm1812_vm6, %v7101_v27, %v7100_v53  ;;  %v1628_v20 = vadd.f32 %v1627_v57, %v1540_v0  ;;  %v1731_v13 = vsel %vm1724_vm13, %v1728_v23, %v1730_v9  ;;  %v7106_v59 = vld [vmem:[#allocation36_spill] sm:$0xff]  ;;  %v7110_v57 = vld [vmem:[#allocation38_spill] sm:$0xff] }
 0x602   : > { %v1732_v41 = vsel %vm1724_vm13, %v1730_v9, %v1728_v23  ;;  %v1699_v18 = vcombine.low %v1695_v6, %v1696_v36  ;;  %v1738_v30 = vmul.f32 %v1736_v62, %v1731_v13  ;;  %v7102_v48 = vstv %s4549_s6  ;;  %3043 = vperm.xlu0 %3459, %v3040_v12   ;;  %s5532_s6 = sld [smem:[#allocation9 + $0x4a]] }
 0x603   : > { %v1669_v37 = vrot.slane %v1662_v29, %v4556_v55  ;;  %v1737_v34 = vmul.f32 %v1736_v62, %v1732_v41  ;;  %v1778_v0 = vmul.f32 %v7102_v48, %v1770_v3  ;;  %v7103_v10 = vmov %v7102_v48  ;;  %v1818_v3 = vpop.permute.xlu1 %1817  ;;  %v7111_v29 = vld [vmem:[#allocation39_spill] sm:$0xff] }
 0x604   : > { %v1779_v11 = vmul.f32 %v7103_v10, %v1769_v2  ;;  %v1813_v25 = vsel %vm1812_vm6, %v7100_v53, %v7101_v27  ;;  %v1780_v1 = vstv %s5448_s24  ;;  %v1706_v24 = vrot.slane %v1699_v18, %v4556_v55  ;;  %v1816_v62 = vpop.permute.xlu0 %1815  ;;  %s6029_s24 = sld [smem:[#allocation9 + $0x50]] }
 0x605   : > { %v1671_v38 = vsel %vm1629_vm2, %v1669_v37, 0.0  ;;  %v1739_v5 = vadd.f32 %v1737_v34, %v1734_v26  ;;  %v1740_v39 = vadd.f32 %v1738_v30, %v1735_v15  ;;  %v7104_v7 = vstv %s4561_s30  ;;  %s7112_s30 = sld [smem:[#allocation84_spill]] }
 0x606   : > { %v1822_v35 = vmul.f32 %v7104_v7, %v1814_v28  ;;  %v1672_v51 = vadd.f32 %v1671_v38, %v1584_v45  ;;  %v1775_v44 = vsel %vm1768_vm5, %v1772_v17, %v1774_v43  ;;  %v1776_v19 = vsel %vm1768_vm5, %v1774_v43, %v1772_v17  ;;  %vm1717_vm5 = vmand %vm5331_vm4, %vm5039_vm0 }
 0x607   : > { %vm2019_vm3 = vcmp.lt.s32.totalorder %v4528_v8, 125  ;;  %v1713_v26 = vrot.slane %v1706_v24, %v4556_v55  ;;  %v1743_v16 = vcombine.low %v1739_v5, %v1740_v39  ;;  %v1781_v31 = vmul.f32 %v1780_v1, %v1776_v19  ;;  %v1862_v10 = vpop.permute.xlu1 %1861  ;;  %v7120_v19 = vld [vmem:[#allocation40_spill] sm:$0xff] }
 0x608   : > { %v1782_v58 = vmul.f32 %v1780_v1, %v1775_v44  ;;  %v7105_v33 = vmov %v7104_v7  ;;  %vm7108_vm2 = vcmp.lt.s32.totalorder %v4528_v8, 1  ;;  %v1824_v14 = vstv %s5475_s10  ;;  %s6047_s10 = sld [smem:[#allocation9 + $0x52]] }
 0x609   : > { %v1823_v45 = vmul.f32 %v7105_v33, %v1813_v25  ;;  %v1857_v22 = vsel %vm7108_vm2, %v7107_v52, %v7106_v59  ;;  %vm7109_vm13 = vmmov %vm7108_vm2  ;;  %v1715_v15 = vsel %vm1673_vm9, %v1713_v26, 0.0  ;;  %v1750_v46 = vrot.slane %v1743_v16, %v4556_v55  ;;  %v7121_v26 = vld [vmem:[#allocation41_spill] sm:$0xff] }
 0x60a   : > { %v1858_v21 = vsel %vm7109_vm13, %v7106_v59, %v7107_v52  ;;  %v1783_v47 = vadd.f32 %v1781_v31, %v1778_v0  ;;  %v1784_v2 = vadd.f32 %v1782_v58, %v1779_v11  ;;  %v1932_v6 = vsel %vm1931_vm8, %v7111_v29, %v7110_v57  ;;  %v1860_v11 = vpop.permute.xlu0 %1859  ;;  %vm7117_vm13 = vmmov %vm7108_vm2 }
 0x60b   : > { %v5539_v36 = vadd.f32 %v1715_v15, %v1628_v20  ;;  %v1819_v9 = vsel %vm1812_vm6, %v1816_v62, %v1818_v3  ;;  %v1820_v23 = vsel %vm1812_vm6, %v1818_v3, %v1816_v62  ;;  %v1757_v53 = vrot.slane %v1750_v46, %v4556_v55  ;;  %vm1761_vm6 = vmand %vm4624_vm15, %vm4840_vm1  ;;  %v7125_v15 = vld [vmem:[#allocation43_spill] sm:$0xff] }
 0x60c   : > { %v1787_v27 = vcombine.low %v1783_v47, %v1784_v2  ;;  %v1825_v28 = vmul.f32 %v1824_v14, %v1820_v23  ;;  %v1826_v13 = vmul.f32 %v1824_v14, %v1819_v9  ;;  %v7113_v41 = vstv %s4563_s23  ;;  %vm7118_vm9 = vmmov %vm7108_vm2  ;;  %s5588_s23 = sld [smem:[#allocation9 + $0x4c]]  ;;  %v7124_v14 = vld [vmem:[#allocation42_spill] sm:$0xff] }
 0x60d   : > { %v1866_v20 = vmul.f32 %v7113_v41, %v1858_v21  ;;  %v7114_v37 = vmov %v7113_v41  ;;  %v1933_v4 = vsel %vm1931_vm8, %v7110_v57, %v7111_v29  ;;  %v1868_v34 = vstv %s5505_s27  ;;  %s6078_s27 = sld [smem:[#allocation9 + $0x53]] }
 0x60e   : > { %v1867_v18 = vmul.f32 %v7114_v37, %v1857_v22  ;;  %vm2063_vm4 = vcmp.lt.s32.totalorder %v4528_v8, 115  ;;  %v1759_v30 = vsel %vm1717_vm5, %v1757_v53, 0.0  ;;  %v1794_v12 = vrot.slane %v1787_v27, %v4556_v55  ;;  %v1937_v22 = vpop.permute.xlu1 %1936  ;;  %v1935_v21 = vpop.permute.xlu0 %1934 }
 0x60f   : > { %v1827_v48 = vadd.f32 %v1825_v28, %v1822_v35  ;;  %v1828_v0 = vadd.f32 %v1826_v13, %v1823_v45  ;;  %v7115_v25 = vstv %s7112_s30  ;;  %v5565_v38 = vadd.f32 %v1759_v30, %v1672_v51  ;;  %s6139_s30 = sld [smem:[#allocation9 + $0x5b]] }
 0x610   : > { %v1941_v1 = vmul.f32 %v7115_v25, %v1932_v6  ;;  %v1863_v5 = vsel %vm7117_vm13, %v1860_v11, %v1862_v10  ;;  %v1864_v39 = vsel %vm7118_vm9, %v1862_v10, %v1860_v11  ;;  %vm2107_vm2 = vcmp.lt.s32.totalorder %v4528_v8, 114 }
 0x611   : > { %v1801_v43 = vrot.slane %v1794_v12, %v4556_v55  ;;  %v1831_v17 = vcombine.low %v1827_v48, %v1828_v0  ;;  %v1869_v7 = vmul.f32 %v1868_v34, %v1864_v39  ;;  %v1870_v35 = vmul.f32 %v1868_v34, %v1863_v5 }
 0x612   : > { %v7119_v51 = vmov %v7115_v25  ;;  %vm7122_vm5 = vcmp.lt.s32.totalorder %v4528_v8, 126  ;;  %v1943_v58 = vstv %s5532_s6  ;;  %v2020_v46 = vsel %vm2019_vm3, %v7125_v15, %v7124_v14  ;;  %s6080_s6 = sld [smem:[#allocation9 + $0x54]] }
 0x613   : > { %v1942_v44 = vmul.f32 %v7119_v51, %v1933_v4  ;;  %v1976_v16 = vsel %vm7122_vm5, %v7121_v26, %v7120_v19  ;;  %vm7123_vm13 = vmmov %vm7122_vm5  ;;  %v1803_v33 = vsel %vm1761_vm6, %v1801_v43, 0.0  ;;  %v1838_v45 = vrot.slane %v1831_v17, %v4556_v55  ;;  %v1979_v4 = vpop.permute.xlu0 %1978  ;;  %v7131_v43 = vld [vmem:[#allocation44_spill] sm:$0xff] }
 0x614   : > { %v1977_v31 = vsel %vm7123_vm13, %v7120_v19, %v7121_v26  ;;  %v1871_v59 = vadd.f32 %v1869_v7, %v1866_v20  ;;  %v1872_v52 = vadd.f32 %v1870_v35, %v1867_v18  ;;  %v1804_v47 = vadd.f32 %v1803_v33, %v5362_v49  ;;  %vm1805_vm6 = vmand %vm4624_vm15, %vm4889_vm10  ;;  %v1981_v18 = vpop.permute.xlu1 %1980  ;;  %v7134_v33 = vld [vmem:[#allocation47_spill] sm:$0xff] }
 0x615   : > { %v1938_v2 = vsel %vm1931_vm8, %v1935_v21, %v1937_v22  ;;  %v1939_v3 = vsel %vm1931_vm8, %v1937_v22, %v1935_v21  ;;  %v1845_v62 = vrot.slane %v1838_v45, %v4556_v55  ;;  %v7126_v9 = vstv %s4572_s21  ;;  %vm1849_vm8 = vmand %vm4624_vm15, %vm4859_vm7  ;;  %s5640_s21 = sld [smem:[#allocation9 + $0x4e]] }
 0x616   : > { %v1875_v57 = vcombine.low %v1871_v59, %v1872_v52  ;;  %v1944_v29 = vmul.f32 %v1943_v58, %v1938_v2  ;;  %v1945_v6 = vmul.f32 %v1943_v58, %v1939_v3  ;;  %v1985_v23 = vmul.f32 %v7126_v9, %v1976_v16  ;;  %vm7129_vm9 = vmmov %vm7122_vm5  ;;  %v7133_v58 = vld [vmem:[#allocation46_spill] sm:$0xff] }
 0x617   : > { %v7127_v49 = vmov %v7126_v9  ;;  %v2021_v27 = vsel %vm2019_vm3, %v7124_v14, %v7125_v15  ;;  %v1987_v28 = vstv %s5559_s17  ;;  %v1847_v13 = vsel %vm1805_vm6, %v1845_v62, 0.0  ;;  %vm1924_vm13 = vmand %vm4624_vm15, %vm4956_vm11  ;;  %s6154_s17 = sld [smem:[#allocation9 + $0x55]] }
 0x618   : > { %v1986_v53 = vmul.f32 %v7127_v49, %v1977_v31  ;;  %v1882_v41 = vrot.slane %v1875_v57, %v4556_v55  ;;  %v1946_v20 = vadd.f32 %v1944_v29, %v1941_v1  ;;  %v1947_v37 = vadd.f32 %v1945_v6, %v1942_v44  ;;  %v2025_v16 = vpop.permute.xlu1 %2024  ;;  %v2023_v31 = vpop.permute.xlu0 %2022  ;;  %vm1968_vm6 = vmand %vm4624_vm15, %vm5000_vm12 }
 0x619   : > { %v7128_v34 = vstv %s4582_s9  ;;  %v1848_v12 = vadd.f32 %v1847_v13, %v5315_v63  ;;  %v1982_v48 = vsel %vm7129_vm9, %v1979_v4, %v1981_v18  ;;  %v1983_v0 = vsel %vm7122_vm5, %v1981_v18, %v1979_v4  ;;  %v7132_v63 = vld [vmem:[#allocation45_spill] sm:$0xff]  ;;  %s5664_s9 = sld [smem:[#allocation9 + $0x21]] }
 0x61a   : > { %v2029_v30 = vmul.f32 %v7128_v34, %v2020_v46  ;;  %v1889_v10 = vrot.slane %v1882_v41, %v4556_v55  ;;  %v1950_v11 = vcombine.low %v1946_v20, %v1947_v37  ;;  %v1988_v25 = vmul.f32 %v1987_v28, %v1982_v48  ;;  %v7138_v48 = vld [vmem:[#allocation93_spill] sm:$0xff] }
 0x61b   : > { %v1989_v1 = vmul.f32 %v1987_v28, %v1983_v0  ;;  %v7130_v5 = vmov %v7128_v34  ;;  %v2064_v17 = vsel %vm2063_vm4, %v7132_v63, %v7131_v43  ;;  %v2065_v7 = vsel %vm2063_vm4, %v7131_v43, %v7132_v63 }
 0x61c   : > { %v2030_v39 = vmul.f32 %v7130_v5, %v2021_v27  ;;  %v2031_v35 = vstv %s5588_s23  ;;  %v1891_v51 = vsel %vm1849_vm8, %v1889_v10, 0.0  ;;  %v1957_v44 = vrot.slane %v1950_v11, %v4556_v55  ;;  %v2067_v27 = vpop.permute.xlu0 %2066  ;;  %v5698_v10 = vld [vmem:[%s7139_s20] sm:$0x3]  ;;  %s6156_s23 = sld [smem:[#allocation9 + $0x56]]  ;;  %s7305_s20 = sld [smem:[#allocation27_spill]] }
 0x61d   : > { %v1990_v19 = vadd.f32 %v1988_v25, %v1985_v23  ;;  %v1991_v26 = vadd.f32 %v1989_v1, %v1986_v53  ;;  %v2108_v45 = vsel %vm2107_vm2, %v7134_v33, %v7133_v58  ;;  %v1892_v59 = vadd.f32 %v1891_v51, %v1804_v47  ;;  %v2069_v53 = vpop.permute.xlu1 %2068 }
 0x61e   : > { %v2026_v52 = vsel %vm2019_vm3, %v2023_v31, %v2025_v16  ;;  %v2027_v22 = vsel %vm2019_vm3, %v2025_v16, %v2023_v31  ;;  %v1964_v21 = vrot.slane %v1957_v44, %v4556_v55  ;;  %v7135_v2 = vstv %s4584_s29  ;;  %s5673_s29 = sld [smem:[#allocation9 + $0x23]] }
 0x61f   : > { %v1994_v14 = vcombine.low %v1990_v19, %v1991_v26  ;;  %v2032_v15 = vmul.f32 %v2031_v35, %v2026_v52  ;;  %v2033_v46 = vmul.f32 %v2031_v35, %v2027_v22  ;;  %v2073_v3 = vmul.f32 %v7135_v2, %v2064_v17 }
 0x620   : > { %v7136_v47 = vmov %v7135_v2  ;;  %v2109_v57 = vsel %vm2107_vm2, %v7133_v58, %v7134_v33  ;;  %v2075_v29 = vstv %s5614_s25  ;;  %v1966_v6 = vsel %vm1924_vm13, %v1964_v21, 0.0  ;;  %v2111_v43 = vpop.permute.xlu0 %2110  ;;  %vm2012_vm13 = vmand %vm4624_vm15, %vm5039_vm0  ;;  %s6195_s25 = sld [smem:[#allocation9 + $0x5c]] }
 0x621   : > { %v2074_v62 = vmul.f32 %v7136_v47, %v2065_v7  ;;  %v2001_v9 = vrot.slane %v1994_v14, %v4556_v55  ;;  %v2034_v23 = vadd.f32 %v2032_v15, %v2029_v30  ;;  %v2035_v49 = vadd.f32 %v2033_v46, %v2030_v39  ;;  %v2113_v39 = vpop.permute.xlu1 %2112 }
 0x622   : > { %v7137_v28 = vstv %s4589_s13  ;;  %vm6832_vm3 = vcmp.lt.s32.totalorder %v4528_v8, 113  ;;  %v1967_v41 = vadd.f32 %v1966_v6, %v1892_v59  ;;  %v2070_v20 = vsel %vm2063_vm4, %v2067_v27, %v2069_v53  ;;  %s5731_s13 = sld [smem:[#allocation9 + $0x28]]  ;;  %v7145_v6 = vld [vmem:[#allocation48_spill] sm:$0xff] }
 0x623   : > { %v2117_v13 = vmul.f32 %v7137_v28, %v2108_v45  ;;  %v2071_v37 = vsel %vm2063_vm4, %v2069_v53, %v2067_v27  ;;  %v2008_v18 = vrot.slane %v2001_v9, %v4556_v55  ;;  %v2038_v4 = vcombine.low %v2034_v23, %v2035_v49  ;;  %v7146_v9 = vld [vmem:[#allocation49_spill] sm:$0xff] }
 0x624   : > { %v2076_v34 = vmul.f32 %v2075_v29, %v2070_v20  ;;  %v2077_v30 = vmul.f32 %v2075_v29, %v2071_v37  ;;  %v1923_v0 = vadd.f32 %v7138_v48, %v1848_v12  ;;  %vm817_vm4 = vcmp.ge.s32.totalorder %v5698_v10, 4294967295  ;;  %v5760_v14 = vpop.permute.xlu0 %2154 }
 0x625   : > { %vm818_vm8 = vcmp.lt.s32.totalorder %v5698_v10, 15  ;;  %v2119_v11 = vstv %s5640_s21  ;;  %v2010_v12 = vsel %vm1968_vm6, %v2008_v18, 0.0  ;;  %v2045_v25 = vrot.slane %v2038_v4, %v4556_v55  ;;  %v5758_v21 = vpop.permute.xlu1 %2156  ;;  %s6197_s21 = sld [smem:[#allocation9 + $0x5d]] }
 0x626   : > { %v2078_v1 = vadd.f32 %v2076_v34, %v2073_v3  ;;  %v2079_v5 = vadd.f32 %v2077_v30, %v2074_v62  ;;  %v7140_v63 = vmov %v7137_v28  ;;  %vm6835_vm9 = vcmp.lt.s32.totalorder %v4528_v8, 112  ;;  %vm5740_vm6 = vmand %vm817_vm4, %vm818_vm8  ;;  %v7188_v30 = vld [vmem:[#allocation73_spill] sm:$0xff] }
 0x627   : > { %v2118_v17 = vmul.f32 %v7140_v63, %v2109_v57  ;;  %v5721_v7 = vadd.f32 %v2010_v12, %v1923_v0  ;;  %v2114_v35 = vsel %vm2107_vm2, %v2111_v43, %v2113_v39  ;;  %v2115_v51 = vsel %vm2107_vm2, %v2113_v39, %v2111_v43  ;;  %vm2056_vm15 = vmand %vm5740_vm6, %vm4840_vm1  ;;  %v7151_v39 = vld [vmem:[#allocation51_spill] sm:$0xff] }
 0x628   : > { %v2052_v44 = vrot.slane %v2045_v25, %v4556_v55  ;;  %v2082_v26 = vcombine.low %v2078_v1, %v2079_v5  ;;  %v2120_v16 = vmul.f32 %v2119_v11, %v2114_v35  ;;  %v2121_v31 = vmul.f32 %v2119_v11, %v2115_v51  ;;  %v7150_v5 = vld [vmem:[#allocation50_spill] sm:$0xff]  ;;  %v7153_v35 = vld [vmem:[#allocation53_spill] sm:$0xff] }
 0x629   : > { %7141 = vst [vmem:[#allocation31_spill] sm:$0xff] %v5721_v7  ;;  %vm6833_vm2 = vcmp.lt.s32.totalorder %v4528_v8, 110  ;;  %v2292_v58 = vstv %s5664_s9  ;;  %vm6834_vm5 = vcmp.lt.s32.totalorder %v4528_v8, 109  ;;  %v2336_v33 = vstv %s5666_s2  ;;  %v5789_v28 = vpop.permute.xlu1 %2200  ;;  %s6203_s9 = sld [smem:[#allocation9 + $0x57]]  ;;  %s6205_s2 = sld [smem:[#allocation9 + $0x58]] }
 0x62a   : > { %v2054_v45 = vsel %vm2012_vm13, %v2052_v44, 0.0  ;;  %v2089_v59 = vrot.slane %v2082_v26, %v4556_v55  ;;  %v2122_v52 = vadd.f32 %v2120_v16, %v2117_v13  ;;  %v2123_v22 = vadd.f32 %v2121_v31, %v2118_v17  ;;  %v5791_v13 = vpop.permute.xlu0 %2198  ;;  %v7152_v17 = vld [vmem:[#allocation52_spill] sm:$0xff]  ;;  %v7156_v31 = vld [vmem:[#allocation54_spill] sm:$0xff] }
 0x62b   : > { %v2380_v15 = vstv %s5673_s29  ;;  %v5765_v24 = vadd.f32 %v2054_v45, %v1967_v41  ;;  %v2688_v46 = vstv %s5675_s3  ;;  %v2424_v2 = vstv %s5685_s11  ;;  %v7157_v45 = vld [vmem:[#allocation55_spill] sm:$0xff]  ;;  %s6224_s29 = sld [smem:[#allocation9 + $0x5e]]  ;;  %s6226_s3 = sld [smem:[#allocation9 + $0x5f]] }
 0x62c   : > { %v2096_v3 = vrot.slane %v2089_v59, %v4556_v55  ;;  %v2126_v47 = vcombine.low %v2122_v52, %v2123_v22  ;;  %v2468_v62 = vstv %s5687_s28  ;;  %v2732_v57 = vstv %s5690_s22  ;;  %s6233_s11 = sld [smem:[#allocation9 + $0x59]]  ;;  %s6235_s28 = sld [smem:[#allocation9 + $0x5a]] }
 0x62d   : > { %7144 = vst [vmem:[#allocation30_spill] sm:$0xff] %v5765_v24  ;;  %v2776_v29 = vstv %s5692_s14  ;;  %v2152_v23 = vsel %vm6832_vm3, %v7146_v9, %v7145_v6  ;;  %v2153_v49 = vsel %vm6832_vm3, %v7145_v6, %v7146_v9  ;;  %vm6842_vm13 = vcmp.lt.s32.totalorder %v4528_v8, 82  ;;  %v5832_v26 = vpop.permute.xlu1 %2244  ;;  %v7160_v6 = vld [vmem:[#allocation57_spill] sm:$0xff]  ;;  %v7218_v24 = vld [vmem:[#allocation88_spill] sm:$0xff]  ;;  %s6241_s22 = sld [smem:[#allocation9 + $0x60]]  ;;  %s6266_s14 = sld [smem:[#allocation9 + $0x61]] }
 0x62e   : > { %v2098_v53 = vsel %vm2056_vm15, %v2096_v3, 0.0  ;;  %v2133_v27 = vrot.slane %v2126_v47, %v4556_v55  ;;  %vm6841_vm4 = vcmp.lt.s32.totalorder %v4528_v8, 81  ;;  %v2512_v41 = vstv %s5703_s18  ;;  %vm2100_vm15 = vmand %vm5740_vm6, %vm4889_vm10  ;;  %v5851_v3 = vpop.permute.xlu0 %2242  ;;  %v7159_v47 = vld [vmem:[#allocation56_spill] sm:$0xff]  ;;  %s7306_s18 = sld [smem:[#allocation21_spill]] }
 0x62f   : > { %v2556_v20 = vstv %s5705_s16  ;;  %v5799_v18 = vadd.f32 %v2098_v53, %v5565_v38  ;;  %v7148_v0 = vstv %s7147_s26  ;;  %v2196_v43 = vsel %vm6835_vm9, %v7151_v39, %v7150_v5  ;;  %v7162_v53 = vld [vmem:[#allocation59_spill] sm:$0xff]  ;;  %v7187_v38 = vld [vmem:[#allocation72_spill] sm:$0xff]  ;;  %s7308_s16 = sld [smem:[#allocation26_spill]]  ;;  %s7312_s26 = sld [smem:[#allocation104_spill]] }
 0x630   : > { %v2140_v48 = vrot.slane %v2133_v27, %v4556_v55  ;;  %v5812_v11 = vmul.f32 %v7148_v0, %v2152_v23  ;;  %v7149_v12 = vmov %v7148_v0  ;;  %v2197_v63 = vsel %vm6835_vm9, %v7150_v5, %v7151_v39 }
 0x631   : > { %v5816_v25 = vmul.f32 %v7149_v12, %v2153_v49  ;;  %vm7154_vm3 = vcmp.lt.s32.totalorder %v4528_v8, 111  ;;  %v2284_v59 = vsel %vm6833_vm2, %v7157_v45, %v7156_v31  ;;  %v2285_v52 = vsel %vm6833_vm2, %v7156_v31, %v7157_v45  ;;  %v7161_v49 = vld [vmem:[#allocation58_spill] sm:$0xff]  ;;  %v5903_v45 = vpop.permute.xlu1 %2288 }
 0x632   : > { %v2240_v51 = vsel %vm7154_vm3, %v7153_v35, %v7152_v17  ;;  %v2142_v44 = vsel %vm2100_vm15, %v2140_v48, 0.0  ;;  %vm7155_vm8 = vmmov %vm7154_vm3  ;;  %vm6840_vm3 = vcmp.lt.s32.totalorder %v4528_v8, 80  ;;  %vm6839_vm15 = vcmp.lt.s32.totalorder %v4528_v8, 79 }
 0x633   : > { %v2241_v16 = vsel %vm7155_vm8, %v7152_v17, %v7153_v35  ;;  %v5849_v22 = vadd.f32 %v2142_v44, %v5539_v36  ;;  %v2328_v9 = vsel %vm6834_vm5, %v7160_v6, %v7159_v47  ;;  %v2329_v23 = vsel %vm6834_vm5, %v7159_v47, %v7160_v6  ;;  %v7167_v17 = vld [vmem:[#allocation60_spill] sm:$0xff]  ;;  %v7168_v35 = vld [vmem:[#allocation61_spill] sm:$0xff]  ;;  %v7171_v6 = vld [vmem:[#allocation62_spill] sm:$0xff] }
 0x634   : > { %vm7163_vm8 = vcmp.lt.s32.totalorder %v4528_v8, 99  ;;  %v7165_v48 = vstv %s4635_s5  ;;  %v5879_v39 = vmul.f32 %v2248_v50, %v2240_v51  ;;  %vm7169_vm5 = vcmp.lt.s32.totalorder %v4528_v8, 83  ;;  %s5922_s5 = sld [smem:[#allocation9 + $0x4f]] }
 0x635   : > { %7158 = vst [vmem:[#allocation32_spill] sm:$0xff] %v5849_v22  ;;  %v2372_v36 = vsel %vm7163_vm8, %v7162_v53, %v7161_v49  ;;  %vm7164_vm2 = vmmov %vm7163_vm8  ;;  %v5871_v0 = vmul.f32 %v7165_v48, %v2196_v43  ;;  %v7166_v12 = vmov %v7165_v48  ;;  %v2680_v44 = vsel %vm7169_vm5, %v7168_v35, %v7167_v17  ;;  %v7179_v48 = vld [vmem:[#allocation66_spill] sm:$0xff] }
 0x636   : > { %v2373_v27 = vsel %vm7164_vm2, %v7161_v49, %v7162_v53  ;;  %v5875_v5 = vmul.f32 %v7166_v12, %v2197_v63  ;;  %v5889_v31 = vmul.f32 %v2248_v50, %v2241_v16  ;;  %v5893_v43 = vmul.f32 %v2292_v58, %v2284_v59  ;;  %vm7170_vm2 = vmmov %vm7169_vm5  ;;  %v7176_v49 = vld [vmem:[#allocation65_spill] sm:$0xff]  ;;  %v7180_v12 = vld [vmem:[#allocation67_spill] sm:$0xff] }
 0x637   : > { %v5897_v63 = vmul.f32 %v2292_v58, %v2285_v52  ;;  %v2681_v51 = vsel %vm7170_vm2, %v7167_v17, %v7168_v35  ;;  %v5907_v47 = vmul.f32 %v2336_v33, %v2328_v9  ;;  %v5911_v50 = vmul.f32 %v2336_v33, %v2329_v23  ;;  %v5924_v58 = vpop.permute.xlu0 %2286  ;;  %v7172_v33 = vld [vmem:[#allocation63_spill] sm:$0xff]  ;;  %v7175_v23 = vld [vmem:[#allocation64_spill] sm:$0xff] }
 0x638   : > { %v5915_v16 = vmul.f32 %v2380_v15, %v2372_v36  ;;  %v5919_v59 = vmul.f32 %v2380_v15, %v2373_v27  ;;  %v5928_v52 = vmul.f32 %v2688_v46, %v2680_v44  ;;  %vm7173_vm2 = vcmp.lt.s32.totalorder %v4528_v8, 98  ;;  %v7181_v44 = vld [vmem:[#allocation68_spill] sm:$0xff] }
 0x639   : > { %v2416_v9 = vsel %vm7173_vm2, %v7172_v33, %v7171_v6  ;;  %vm7174_vm9 = vmmov %vm7173_vm2  ;;  %vm7177_vm5 = vcmp.lt.s32.totalorder %v4528_v8, 97  ;;  %v5944_v36 = vmul.f32 %v2688_v46, %v2681_v51  ;;  %v2724_v17 = vsel %vm6842_vm13, %v7180_v12, %v7179_v48  ;;  %v7182_v46 = vld [vmem:[#allocation69_spill] sm:$0xff] }
 0x63a   : > { %v2417_v15 = vsel %vm7174_vm9, %v7171_v6, %v7172_v33  ;;  %v2460_v53 = vsel %vm7177_vm5, %v7176_v49, %v7175_v23  ;;  %vm7178_vm8 = vmmov %vm7177_vm5  ;;  %v2725_v35 = vsel %vm6842_vm13, %v7179_v48, %v7180_v12  ;;  %v2768_v51 = vsel %vm6841_vm4, %v7182_v46, %v7181_v44  ;;  %v7183_v33 = vld [vmem:[#allocation70_spill] sm:$0xff]  ;;  %v5975_v12 = vpop.permute.xlu1 %2332 }
 0x63b   : > { %v2461_v27 = vsel %vm7178_vm8, %v7175_v23, %v7176_v49  ;;  %v2769_v6 = vsel %vm6841_vm4, %v7181_v44, %v7182_v46  ;;  %v7184_v23 = vld [vmem:[#allocation71_spill] sm:$0xff]  ;;  %vm7185_vm9 = vcmp.lt.s32.totalorder %v4528_v8, 96  ;;  %vm6838_vm5 = vcmp.lt.s32.totalorder %v4528_v8, 77 }
 0x63c   : > { %v2504_v49 = vsel %vm7185_vm9, %v7184_v23, %v7183_v33  ;;  %vm7186_vm8 = vmmov %vm7185_vm9  ;;  %v5979_v44 = vmul.f32 %v2424_v2, %v2416_v9  ;;  %v5983_v46 = vmul.f32 %v2424_v2, %v2417_v15  ;;  %v5987_v1 = vmul.f32 %v2468_v62, %v2460_v53 }
 0x63d   : > { %v2505_v48 = vsel %vm7186_vm8, %v7183_v33, %v7184_v23  ;;  %vm7189_vm2 = vcmp.lt.s32.totalorder %v4528_v8, 95  ;;  %v5993_v23 = vpop.permute.xlu0 %2330  ;;  %v5997_v34 = vmul.f32 %v2468_v62, %v2461_v27  ;;  %v6001_v9 = vmul.f32 %v2732_v57, %v2724_v17 }
 0x63e   : > { %v2548_v33 = vsel %vm7189_vm2, %v7188_v30, %v7187_v38  ;;  %v6005_v2 = vmul.f32 %v2732_v57, %v2725_v35  ;;  %vm7192_vm9 = vmmov %vm7189_vm2  ;;  %v6015_v53 = vmul.f32 %v2776_v29, %v2768_v51  ;;  %v6019_v62 = vmul.f32 %v2776_v29, %v2769_v6  ;;  %v7199_v51 = vld [vmem:[#allocation77_spill] sm:$0xff]  ;;  %v7200_v6 = vld [vmem:[#allocation78_spill] sm:$0xff] }
 0x63f   : > { %7190 = vst [vmem:[#allocation33_spill] sm:$0xff] %v6001_v9  ;;  %v2549_v15 = vsel %vm7192_vm9, %v7187_v38, %v7188_v30  ;;  %v6023_v27 = vmul.f32 %v2512_v41, %v2504_v49  ;;  %v6027_v17 = vmul.f32 %v2512_v41, %v2505_v48  ;;  %v6033_v57 = vmul.f32 %v2556_v20, %v2548_v33  ;;  %v7197_v30 = vld [vmem:[#allocation74_spill] sm:$0xff]  ;;  %v7198_v38 = vld [vmem:[#allocation75_spill] sm:$0xff]  ;;  %v2377_v49 = vpop.permute.xlu1 %2376 }
 0x640   : > { %7191 = vst [vmem:[#allocation35_spill] sm:$0xff] %v6005_v2  ;;  %7193 = vst [vmem:[#allocation34_spill] sm:$0xff] %v6015_v53  ;;  %v2812_v35 = vsel %vm6840_vm3, %v7198_v38, %v7197_v30  ;;  %v2813_v29 = vsel %vm6840_vm3, %v7197_v30, %v7198_v38  ;;  %v2856_v41 = vsel %vm6839_vm15, %v7200_v6, %v7199_v51  ;;  %v2163_v33 = vstv %s5922_s5 }
 0x641   : > { %7194 = vst [vmem:[#allocation36_spill] sm:$0xff] %v6019_v62  ;;  %7195 = vst [vmem:[#allocation37_spill] sm:$0xff] %v6027_v17  ;;  %v6051_v48 = vmul.f32 %v2556_v20, %v2549_v15  ;;  %vm7202_vm8 = vcmp.lt.s32.totalorder %v4528_v8, 113  ;;  %v2375_v38 = vpop.permute.xlu0 %2374  ;;  %v2857_v37 = vsel %vm6839_vm15, %v7199_v51, %v7200_v6  ;;  %v7204_v20 = vld [vmem:[#allocation81_spill] sm:$0xff]  ;;  %v7205_v15 = vld [vmem:[#allocation82_spill] sm:$0xff]  ;;  %vm7206_vm9 = vcmp.lt.s32.totalorder %v4528_v8, 94 }
 0x642   : > { %7196 = vst [vmem:[#allocation38_spill] sm:$0xff] %v6033_v57  ;;  %v2158_v4 = vsel %vm7202_vm8, %v5760_v14, %v5758_v21  ;;  %vm7203_vm2 = vmmov %vm7202_vm8  ;;  %v2592_v22 = vsel %vm7206_vm9, %v7205_v15, %v7204_v20  ;;  %v7211_v51 = vstv %s5717_s15  ;;  %v7215_v9 = vstv %s5719_s19  ;;  %s3289_s15 = sshll.u32 %s7306_s18, 10 }
 0x643   : > { %7201 = vst [vmem:[#allocation39_spill] sm:$0xff] %v6051_v48  ;;  %v2159_v30 = vsel %vm7203_vm2, %v5758_v21, %v5760_v14  ;;  %vm7207_vm8 = vmmov %vm7206_vm9  ;;  %v7208_v21 = vld [vmem:[#allocation85_spill] sm:$0xff]  ;;  %v7209_v14 = vld [vmem:[#allocation86_spill] sm:$0xff]  ;;  %vm7210_vm2 = vcmp.lt.s32.totalorder %v4528_v8, 93  ;;  %v6084_v6 = vmul.f32 %v7211_v51, %v2812_v35  ;;  %v7213_v53 = vmov %v7211_v51  ;;  %s6599_s5 = scalar_lea.hbm %s7312_s26, %s3289_s15 }
 0x644   : > { %v2593_v7 = vsel %vm7207_vm8, %v7204_v20, %v7205_v15  ;;  %v2636_v62 = vsel %vm7210_vm2, %v7209_v14, %v7208_v21  ;;  %v6088_v2 = vmul.f32 %v7213_v53, %v2813_v29  ;;  %v6092_v20 = vmul.f32 %v7215_v9, %v2856_v41  ;;  %vm7217_vm9 = vmmov %vm7210_vm2  ;;  %v6106_v29 = vpop.permute.xlu1 %2684 }
 0x645   : > { %7212 = vst [vmem:[#allocation90_spill] sm:$0xff] %v6084_v6  ;;  %v2637_v15 = vsel %vm7217_vm9, %v7208_v21, %v7209_v14  ;;  %vm7220_vm8 = vcmp.lt.s32.totalorder %v4528_v8, 78  ;;  %v2164_v35 = vmul.f32 %v2163_v33, %v2158_v4  ;;  %v2165_v9 = vmul.f32 %v2163_v33, %v2159_v30  ;;  %v6124_v17 = vpop.permute.xlu0 %2682 }
 0x646   : > { %7214 = vst [vmem:[#allocation40_spill] sm:$0xff] %v6088_v2  ;;  %7216 = vst [vmem:[#allocation41_spill] sm:$0xff] %v6092_v20  ;;  %v2900_v48 = vsel %vm7220_vm8, %v7219_v61, %v7218_v24  ;;  %v7222_v41 = vstv %s5719_s19  ;;  %v7224_v21 = vstv %s5731_s13  ;;  %v7228_v6 = vstv %s5733_s12  ;;  %s7309_s19 = sshll.u32 %s7308_s16, 6 }
 0x647   : > { %vm7221_vm2 = vmmov %vm7220_vm8  ;;  %v6110_v51 = vmul.f32 %v7222_v41, %v2857_v37  ;;  %v6114_v14 = vmul.f32 %v7224_v21, %v2592_v22  ;;  %v7226_v20 = vmov %v7224_v21  ;;  %v6122_v57 = vmul.f32 %v7228_v6, %v2636_v62  ;;  %s377_s13 = scalar_lea.vmem [#allocation12], %s7309_s19 }
 0x648   : > { %v2901_v53 = vsel %vm7221_vm2, %v7218_v24, %v7219_v61  ;;  %v6118_v2 = vmul.f32 %v7226_v20, %v2593_v7  ;;  %v7230_v61 = vmov %v7228_v6  ;;  %v2251_v4 = vstv %s6011_s0  ;;  %v7238_v6 = vld [vmem:[#allocation91_spill] sm:$0xff]  ;;  %v7239_v20 = vld [vmem:[#allocation92_spill] sm:$0xff]  ;;  %v2421_v21 = vpop.permute.xlu1 %2420  ;;  %s3066_s12 = sshll.u32 %s377_s13, 4  ;;  %s7313_s0 = sld [smem:[#allocation24_spill]]  ;;  %s6601_s12 = int_to_ptr.vmem [resolvable:$true] %s3066_s12 }
 0x649   : > { %7223 = vst [vmem:[#allocation42_spill] sm:$0xff] %v6110_v51  ;;  %7225 = vst [vmem:[#allocation43_spill] sm:$0xff] %v6114_v14  ;;  %v6128_v24 = vmul.f32 %v7230_v61, %v2637_v15  ;;  %vm7232_vm9 = vcmp.lt.s32.totalorder %v4528_v8, 111  ;;  %v7234_v22 = vstv %s5748_s7  ;;  %v2944_v15 = vsel %vm6838_vm5, %v7239_v20, %v7238_v6 }
 0x64a   : > { %7227 = vst [vmem:[#allocation44_spill] sm:$0xff] %v6118_v2  ;;  %7229 = vst [vmem:[#allocation45_spill] sm:$0xff] %v6122_v57  ;;  %v2246_v37 = vsel %vm7232_vm9, %v5851_v3, %v5832_v26  ;;  %v6143_v62 = vmul.f32 %v7234_v22, %v2900_v48  ;;  %v7236_v33 = vmov %v7234_v22  ;;  %v2207_v41 = vstv %s6029_s24  ;;  %s3053_s24 = scalar_lea.sflag [#allocation7], %s7308_s16 }
 0x64b   : > { %7231 = vst [vmem:[#allocation46_spill] sm:$0xff] %v6128_v24  ;;  %vm7233_vm8 = vmmov %vm7232_vm9  ;;  %v6147_v30 = vmul.f32 %v7236_v33, %v2901_v53  ;;  %v2167_v48 = vadd.f32 %v2165_v9, %v5816_v25  ;;  %v2295_v53 = vstv %s6047_s10  ;;  %vm7240_vm2 = vcmp.lt.s32.totalorder %v4528_v8, 112  ;;  %s3541_s10 = scalar_lea.vmem %s6601_s12, 1024 }
 0x64c   : > { %v2247_v7 = vsel %vm7233_vm8, %v5832_v26, %v5851_v3  ;;  %7235 = vst [vmem:[#allocation47_spill] sm:$0xff] %v6143_v62  ;;  %v2945_v26 = vsel %vm6838_vm5, %v7238_v6, %v7239_v20  ;;  %v2166_v3 = vadd.f32 %v2164_v35, %v5812_v11  ;;  %v2202_v61 = vsel %vm7240_vm2, %v5791_v13, %v5789_v28  ;;  %vm7241_vm9 = vmmov %vm7240_vm2  ;;  %v2419_v6 = vpop.permute.xlu0 %2418  ;;  %p3542_p5 = scmp.ne.s32.totalorder %s6601_s12, %s3541_s10 }
 0x64d   : > { %7237 = vst [vmem:[#allocation93_spill] sm:$0xff] %v6147_v30  ;;  %v2203_v22 = vsel %vm7241_vm9, %v5789_v28, %v5791_v13  ;;  %v2252_v33 = vmul.f32 %v2251_v4, %v2246_v37  ;;  %v2253_v30 = vmul.f32 %v2251_v4, %v2247_v7  ;;  %vm7242_vm8 = vcmp.lt.s32.totalorder %v4528_v8, 110 }
 0x64e   : > { %v2290_v11 = vsel %vm7242_vm8, %v5924_v58, %v5903_v45  ;;  %vm7243_vm5 = vmmov %vm7242_vm8  ;;  %v2339_v35 = vstv %s6078_s27  ;;  %v2383_v9 = vstv %s6080_s6  ;;  %vm7244_vm2 = vcmp.lt.s32.totalorder %v4528_v8, 109  ;;  %p7314_p2 = scmp.ne.s32.totalorder %s7313_s0, 0  ;;  %s3675_s27 = smov [#allocation12]  }
 0x64f   : > { %v2291_v25 = vsel %vm7243_vm5, %v5903_v45, %v5924_v58  ;;  %v2334_v28 = vsel %vm7244_vm2, %v5993_v23, %v5975_v12  ;;  %vm7245_vm9 = vmmov %vm7244_vm2  ;;  %vm7246_vm15 = vcmp.lt.s32.totalorder %v4528_v8, 99  ;;  %v7248_v45 = vstv %s5750_s4  ;;  %s3545_s6 = sshll.u32 %s3675_s27, 4  ;;  %s3546_s6 = int_to_ptr.vmem [resolvable:$false] %s3545_s6 }
 0x650   : > { %v2335_v13 = vsel %vm7245_vm9, %v5975_v12, %v5993_v23  ;;  %v2378_v4 = vsel %vm7246_vm15, %v2375_v38, %v2377_v49  ;;  %vm7247_vm8 = vmmov %vm7246_vm15  ;;  %v6201_v58 = vmul.f32 %v7248_v45, %v2944_v15  ;;  %v2170_v7 = vcombine.low %v2166_v3, %v2167_v48  ;;  %v2465_v12 = vpop.permute.xlu1 %2464  ;;  %v2463_v15 = vpop.permute.xlu0 %2462  ;;  %p3543_p8 = pnand %p3542_p5, %p7314_p2  ;;  %p3548_p4 = scmp.lt.s32.totalorder %s6601_s12, %s3546_s6 }
 0x651   : > { %v2379_v37 = vsel %vm7247_vm8, %v2377_v49, %v2375_v38  ;;  %v2208_v20 = vmul.f32 %v2207_v41, %v2202_v61  ;;  %v2209_v62 = vmul.f32 %v2207_v41, %v2203_v22  ;;  %v2254_v23 = vadd.f32 %v2252_v33, %v5879_v39 }
 0x652   : > { %7249 = vst [vmem:[#allocation48_spill] sm:$0xff] %v6201_v58  ;;  %v2255_v49 = vadd.f32 %v2253_v30, %v5889_v31  ;;  %v2296_v38 = vmul.f32 %v2295_v53, %v2290_v11  ;;  %v2297_v24 = vmul.f32 %v2295_v53, %v2291_v25  ;;  %v2340_v45 = vmul.f32 %v2339_v35, %v2334_v28  ;;  %p3544_p10 = pneg %p3543_p8 }
 0x653   : > { %v2341_v58 = vmul.f32 %v2339_v35, %v2335_v13  ;;  %v2384_v3 = vmul.f32 %v2383_v9, %v2378_v4  ;;  %v2385_v48 = vmul.f32 %v2383_v9, %v2379_v37  ;;  %v7250_v61 = vstv %s5750_s4 }
 0x654   : > { %v6211_v57 = vmul.f32 %v7250_v61, %v2945_v26  ;;  %v2691_v41 = vstv %s6139_s30  ;;  %v2427_v22 = vstv %s6154_s17  ;;  %v2471_v2 = vstv %s6156_s23  ;;  %v6222_v30 = vpop.permute.xlu1 %2728  ;;  %v6231_v11 = vpop.permute.xlu0 %2726  ;;  %s3547_s30 = scalar_lea.vmem %s3546_s6, 2048 }
 0x655   : > { %v2177_v14 = vrot.slane %v2170_v7, %v4556_v55  ;;  %v2210_v51 = vadd.f32 %v2208_v20, %v5871_v0  ;;  %vm7251_vm15 = vcmp.lt.s32.totalorder %v4528_v8, 98  ;;  %v2211_v26 = vadd.f32 %v2209_v62, %v5875_v5  ;;  %p3549_p12 = scmp.lt.s32.totalorder %s3547_s30, %s3541_s10 }
 0x656   : > { %v2422_v39 = vsel %vm7251_vm15, %v2419_v6, %v2421_v21  ;;  %vm7252_vm5 = vmmov %vm7251_vm15  ;;  %v2258_v53 = vcombine.low %v2254_v23, %v2255_v49  ;;  %v2298_v33 = vadd.f32 %v2296_v38, %v5893_v43  ;;  %v2299_v0 = vadd.f32 %v2297_v24, %v5897_v63 }
 0x657   : > { %v2423_v31 = vsel %vm7252_vm5, %v2421_v21, %v2419_v6  ;;  %v2342_v21 = vadd.f32 %v2340_v45, %v5907_v47  ;;  %v2343_v6 = vadd.f32 %v2341_v58, %v5911_v50  ;;  %v2386_v5 = vadd.f32 %v2384_v3, %v5915_v16  ;;  %p3550_p0 = por %p3549_p12, %p3548_p4 }
 0x658   : > { %v2387_v62 = vadd.f32 %v2385_v48, %v5919_v59  ;;  %vm823_vm2 = vcmp.ge.s32.totalorder %v5698_v10, 4294967294  ;;  %vm824_vm9 = vcmp.lt.s32.totalorder %v5698_v10, 14  ;;  %v2428_v43 = vmul.f32 %v2427_v22, %v2422_v39  ;;  %v6255_v16 = vpop.permute.xlu1 %2772  ;;  %v6264_v37 = vpop.permute.xlu0 %2770 }
 0x659   : > { %v2429_v63 = vmul.f32 %v2427_v22, %v2423_v31  ;;  %v2735_v24 = vstv %s6195_s25  ;;  %v2779_v25 = vstv %s6197_s21  ;;  %vm7253_vm8 = vcmp.lt.s32.totalorder %v4528_v8, 83  ;;  %p3551_p7 = pnand %p3550_p0, %p3544_p10 }
 0x65a   : > { %v2686_v47 = vsel %vm7253_vm8, %v6124_v17, %v6106_v29  ;;  %vm7254_vm15 = vmmov %vm7253_vm8  ;;  %v2515_v59 = vstv %s6203_s9  ;;  %v2559_v35 = vstv %s6205_s2  ;;  %v2214_v9 = vcombine.low %v2210_v51, %v2211_v26 }
 0x65b   : > { %v2687_v50 = vsel %vm7254_vm15, %v6106_v29, %v6124_v17  ;;  %v2265_v28 = vrot.slane %v2258_v53, %v4556_v55  ;;  %vm7255_vm5 = vcmp.lt.s32.totalorder %v4528_v8, 97  ;;  %v2184_v17 = vrot.slane %v2177_v14, %v4556_v55  ;;  %vm2144_vm8 = vmand %vm5740_vm6, %vm4859_vm7 }
 0x65c   : > { %v2466_v13 = vsel %vm7255_vm5, %v2463_v15, %v2465_v12  ;;  %vm7256_vm3 = vmmov %vm7255_vm5  ;;  %v2302_v29 = vcombine.low %v2298_v33, %v2299_v0  ;;  %v2346_v58 = vcombine.low %v2342_v21, %v2343_v6  ;;  %v2390_v51 = vcombine.low %v2386_v5, %v2387_v62  ;;  %v2509_v14 = vpop.permute.xlu1 %2508  ;;  %v2507_v61 = vpop.permute.xlu0 %2506 }
 0x65d   : > { %v2467_v4 = vsel %vm7256_vm3, %v2465_v12, %v2463_v15  ;;  %v2692_v7 = vmul.f32 %v2691_v41, %v2686_v47  ;;  %v2693_v20 = vmul.f32 %v2691_v41, %v2687_v50  ;;  %v2430_v12 = vadd.f32 %v2428_v43, %v5979_v44  ;;  %vm2232_vm3 = vmand %vm5740_vm6, %vm4956_vm11 }
 0x65e   : > { %v2431_v23 = vadd.f32 %v2429_v63, %v5983_v46  ;;  %v2472_v49 = vmul.f32 %v2471_v2, %v2466_v13  ;;  %v2473_v38 = vmul.f32 %v2471_v2, %v2467_v4  ;;  %v2823_v15 = vstv %s6224_s29  ;;  %vm2188_vm15 = vmand %vm5740_vm6, %vm4608_vm14 }
 0x65f   : > { %v2867_v45 = vstv %s6226_s3  ;;  %v2221_v3 = vrot.slane %v2214_v9, %v4556_v55  ;;  %v2272_v48 = vrot.slane %v2265_v28, %v4556_v55  ;;  %v2603_v22 = vstv %s6233_s11  ;;  %vm2276_vm5 = vmand %vm5740_vm6, %vm5000_vm12 }
 0x660   : > { %v2647_v39 = vstv %s6235_s28  ;;  %v2186_v31 = vsel %vm2144_vm8, %v2184_v17, 0.0  ;;  %v2309_v44 = vrot.slane %v2302_v29, %v4556_v55  ;;  %v2353_v46 = vrot.slane %v2346_v58, %v4556_v55  ;;  %v2553_v6 = vpop.permute.xlu1 %2552  ;;  %vm2320_vm8 = vmand %vm5740_vm6, %vm5039_vm0 }
 0x661   : > { %v2911_v2 = vstv %s6241_s22  ;;  %v2397_v41 = vrot.slane %v2390_v51, %v4556_v55  ;;  %v2694_v26 = vadd.f32 %v2692_v7, %v5928_v52  ;;  %v2695_v53 = vadd.f32 %v2693_v20, %v5944_v36 }
 0x662   : > { %v2434_v33 = vcombine.low %v2430_v12, %v2431_v23  ;;  %v2474_v0 = vadd.f32 %v2472_v49, %v5987_v1  ;;  %v2475_v21 = vadd.f32 %v2473_v38, %v5997_v34  ;;  %vm7257_vm4 = vcmp.lt.s32.totalorder %v4528_v8, 96  ;;  %v2551_v34 = vpop.permute.xlu0 %2550 }
 0x663   : > { %v2510_v52 = vsel %vm7257_vm4, %v2507_v61, %v2509_v14  ;;  %vm7258_vm13 = vmmov %vm7257_vm4  ;;  %v2187_v5 = vadd.f32 %v2186_v31, %v5799_v18  ;;  %v2228_v62 = vrot.slane %v2221_v3, %v4556_v55  ;;  %v2274_v43 = vsel %vm2232_vm3, %v2272_v48, 0.0 }
 0x664   : > { %v2511_v36 = vsel %vm7258_vm13, %v2509_v14, %v2507_v61  ;;  %v2955_v1 = vstv %s6266_s14  ;;  %v2316_v63 = vrot.slane %v2309_v44, %v4556_v55  ;;  %v2360_v47 = vrot.slane %v2353_v46, %v4556_v55  ;;  %vm6321_vm4 = vmand %vm823_vm2, %vm824_vm9  ;;  %v2817_v20 = vpop.permute.xlu1 %2816  ;;  %v7267_v61 = vld [vmem:[#allocation37_spill] sm:$0xff] }
 0x665   : > { %vm7261_vm13 = vcmp.lt.s32.totalorder %v4528_v8, 95  ;;  %vm7263_vm2 = vcmp.lt.s32.totalorder %v4528_v8, 82  ;;  %v2516_v4 = vmul.f32 %v2515_v59, %v2510_v52  ;;  %v2517_v17 = vmul.f32 %v2515_v59, %v2511_v36 }
 0x666   : > { %v2554_v50 = vsel %vm7261_vm13, %v2551_v34, %v2553_v6  ;;  %vm7262_vm3 = vmmov %vm7261_vm13  ;;  %v2730_v28 = vsel %vm7263_vm2, %v6231_v11, %v6222_v30  ;;  %v2404_v29 = vrot.slane %v2397_v41, %v4556_v55  ;;  %v2698_v58 = vcombine.low %v2694_v26, %v2695_v53  ;;  %v2815_v59 = vpop.permute.xlu0 %2814  ;;  %v7268_v53 = vld [vmem:[#allocation38_spill] sm:$0xff] }
 0x667   : > { %v2555_v9 = vsel %vm7262_vm3, %v2553_v6, %v2551_v34  ;;  %vm7264_vm9 = vmmov %vm7263_vm2  ;;  %v2441_v51 = vrot.slane %v2434_v33, %v4556_v55  ;;  %v2478_v7 = vcombine.low %v2474_v0, %v2475_v21  ;;  %v6348_v12 = vsel %vm2188_vm15, %v2228_v62, 0.0  ;;  %v7269_v0 = vld [vmem:[#allocation39_spill] sm:$0xff] }
 0x668   : > { %v2731_v13 = vsel %vm7264_vm9, %v6222_v30, %v6231_v11  ;;  %v6350_v23 = vadd.f32 %v2274_v43, %v2187_v5  ;;  %vm2364_vm13 = vmand %vm6321_vm4, %vm4840_vm1  ;;  %v2560_v30 = vmul.f32 %v2559_v35, %v2554_v50  ;;  %v2561_v11 = vmul.f32 %v2559_v35, %v2555_v9  ;;  %v2861_v26 = vpop.permute.xlu1 %2860  ;;  %v7275_v43 = vld [vmem:[#allocation30_spill] sm:$0xff]  ;;  %v7281_v9 = vld [vmem:[#allocation35_spill] sm:$0xff] }
 0x669   : > { %v6365_v49 = vsel %vm2276_vm5, %v2316_v63, 0.0  ;;  %v6372_v38 = vsel %vm2320_vm8, %v2360_v47, 0.0  ;;  %v2736_v14 = vmul.f32 %v2735_v24, %v2730_v28  ;;  %v2737_v3 = vmul.f32 %v2735_v24, %v2731_v13  ;;  %vm2408_vm3 = vmand %vm6321_vm4, %vm4889_vm10  ;;  %v7280_v47 = vld [vmem:[#allocation33_spill] sm:$0xff] }
 0x66a   : > { %vm7265_vm15 = vcmp.lt.s32.totalorder %v4528_v8, 81  ;;  %v2518_v48 = vadd.f32 %v2516_v4, %v6023_v27  ;;  %v2519_v31 = vadd.f32 %v2517_v17, %v7267_v61  ;;  %v2406_v44 = vsel %vm2364_vm13, %v2404_v29, 0.0  ;;  %v7286_v61 = vld [vmem:[#allocation90_spill] sm:$0xff] }
 0x66b   : > { %v2774_v35 = vsel %vm7265_vm15, %v6264_v37, %v6255_v16  ;;  %vm7266_vm5 = vmmov %vm7265_vm15  ;;  %v2705_v46 = vrot.slane %v2698_v58, %v4556_v55  ;;  %v2448_v24 = vrot.slane %v2441_v51, %v4556_v55  ;;  %v2485_v41 = vrot.slane %v2478_v7, %v4556_v55 }
 0x66c   : > { %v2775_v19 = vsel %vm7266_vm5, %v6255_v16, %v6264_v37  ;;  %v2562_v33 = vadd.f32 %v2560_v30, %v7268_v53  ;;  %v2563_v21 = vadd.f32 %v2561_v11, %v7269_v0  ;;  %vm7270_vm6 = vcmp.lt.s32.totalorder %v4528_v8, 80  ;;  %v2859_v37 = vpop.permute.xlu0 %2858  ;;  %v7283_v11 = vld [vmem:[#allocation36_spill] sm:$0xff] }
 0x66d   : > { %v2818_v27 = vsel %vm7270_vm6, %v2815_v59, %v2817_v20  ;;  %vm7271_vm8 = vmmov %vm7270_vm6  ;;  %v2780_v36 = vmul.f32 %v2779_v25, %v2774_v35  ;;  %v2781_v6 = vmul.f32 %v2779_v25, %v2775_v19  ;;  %vm7273_vm2 = vcmp.lt.s32.totalorder %v4528_v8, 79 }
 0x66e   : > { %v2819_v16 = vsel %vm7271_vm8, %v2817_v20, %v2815_v59  ;;  %v2862_v5 = vsel %vm7273_vm2, %v2859_v37, %v2861_v26  ;;  %vm7274_vm9 = vmmov %vm7273_vm2  ;;  %v2407_v34 = vadd.f32 %v2406_v44, %v7275_v43  ;;  %vm7276_vm13 = vcmp.lt.s32.totalorder %v5698_v10, 13  ;;  %v7287_v44 = vld [vmem:[#allocation40_spill] sm:$0xff] }
 0x66f   : > { %v2863_v62 = vsel %vm7274_vm9, %v2861_v26, %v2859_v37  ;;  %vm7277_vm15 = vcmp.ge.s32.totalorder %v5698_v10, 4294967293  ;;  %v2738_v50 = vadd.f32 %v2736_v14, %v7280_v47  ;;  %v2739_v25 = vadd.f32 %v2737_v3, %v7281_v9  ;;  %v2597_v10 = vpop.permute.xlu1 %2596  ;;  %v7289_v26 = vld [vmem:[#allocation42_spill] sm:$0xff] }
 0x670   : > { %vm6414_vm5 = vmand %vm7277_vm15, %vm7276_vm13  ;;  %v2522_v28 = vcombine.low %v2518_v48, %v2519_v31  ;;  %v2824_v13 = vmul.f32 %v2823_v15, %v2818_v27  ;;  %v2825_v4 = vmul.f32 %v2823_v15, %v2819_v16  ;;  %v2868_v17 = vmul.f32 %v2867_v45, %v2862_v5  ;;  %v2595_v30 = vpop.permute.xlu0 %2594  ;;  %v7282_v15 = vld [vmem:[#allocation34_spill] sm:$0xff]  ;;  %v7291_v16 = vld [vmem:[#allocation44_spill] sm:$0xff] }
 0x671   : > { %v2869_v29 = vmul.f32 %v2867_v45, %v2863_v62  ;;  %v2712_v58 = vrot.slane %v2705_v46, %v4556_v55  ;;  %v2450_v51 = vsel %vm2408_vm3, %v2448_v24, 0.0  ;;  %v2492_v7 = vrot.slane %v2485_v41, %v4556_v55  ;;  %vm2672_vm6 = vmand %vm6414_vm5, %vm4840_vm1  ;;  %v7288_v24 = vld [vmem:[#allocation41_spill] sm:$0xff] }
 0x672   : > { %v2566_v20 = vcombine.low %v2562_v33, %v2563_v21  ;;  %v2782_v45 = vadd.f32 %v2780_v36, %v7282_v15  ;;  %v2783_v59 = vadd.f32 %v2781_v6, %v7283_v11  ;;  %vm7284_vm8 = vcmp.lt.s32.totalorder %v4528_v8, 94  ;;  %vm2452_vm1 = vmand %vm6321_vm4, %vm4859_vm7  ;;  %v7290_v21 = vld [vmem:[#allocation43_spill] sm:$0xff] }
 0x673   : > { %v2598_v14 = vsel %vm7284_vm8, %v2595_v30, %v2597_v10  ;;  %vm7285_vm2 = vmmov %vm7284_vm8  ;;  %v2742_v35 = vcombine.low %v2738_v50, %v2739_v25  ;;  %v2529_v19 = vrot.slane %v2522_v28, %v4556_v55  ;;  %v2826_v31 = vadd.f32 %v2824_v13, %v7286_v61  ;;  %v2641_v33 = vpop.permute.xlu1 %2640  ;;  %v7292_v6 = vld [vmem:[#allocation31_spill] sm:$0xff] }
 0x674   : > { %v2599_v3 = vsel %vm7285_vm2, %v2597_v10, %v2595_v30  ;;  %v2604_v48 = vmul.f32 %v2603_v22, %v2598_v14  ;;  %v2827_v46 = vadd.f32 %v2825_v4, %v7287_v44  ;;  %v2870_v41 = vadd.f32 %v2868_v17, %v7288_v24  ;;  %v2639_v36 = vpop.permute.xlu0 %2638  ;;  %vm2496_vm13 = vmand %vm6321_vm4, %vm4608_vm14 }
 0x675   : > { %v2605_v54 = vmul.f32 %v2603_v22, %v2599_v3  ;;  %v2871_v53 = vadd.f32 %v2869_v29, %v7289_v26  ;;  %v6458_v0 = vsel %vm2672_vm6, %v2712_v58, 0.0  ;;  %v2573_v22 = vrot.slane %v2566_v20, %v4556_v55  ;;  %v7296_v20 = vld [vmem:[#allocation46_spill] sm:$0xff]  ;;  %vm2540_vm15 = vmand %vm6321_vm4, %vm4956_vm11  ;;  %v7300_v26 = vld [vmem:[#allocation93_spill] sm:$0xff] }
 0x676   : > { %v2606_v27 = vadd.f32 %v2604_v48, %v7290_v21  ;;  %v2451_v5 = vadd.f32 %v2450_v51, %v7292_v6  ;;  %v2786_v62 = vcombine.low %v2782_v45, %v2783_v59  ;;  %vm7293_vm3 = vcmp.lt.s32.totalorder %v4528_v8, 93  ;;  %vm2584_vm2 = vmand %vm6321_vm4, %vm5000_vm12 }
 0x677   : > { %v2607_v37 = vadd.f32 %v2605_v54, %v7291_v16  ;;  %v2642_v43 = vsel %vm7293_vm3, %v2639_v36, %v2641_v33  ;;  %vm7294_vm9 = vmmov %vm7293_vm3  ;;  %v2494_v50 = vsel %vm2452_vm1, %v2492_v7, 0.0  ;;  %v2749_v13 = vrot.slane %v2742_v35, %v4556_v55  ;;  %v2905_v10 = vpop.permute.xlu1 %2904  ;;  %v7295_v7 = vld [vmem:[#allocation45_spill] sm:$0xff] }
 0x678   : > { %v2643_v47 = vsel %vm7294_vm9, %v2641_v33, %v2639_v36  ;;  %v2648_v25 = vmul.f32 %v2647_v39, %v2642_v43  ;;  %v2536_v4 = vrot.slane %v2529_v19, %v4556_v55  ;;  %v2830_v17 = vcombine.low %v2826_v31, %v2827_v46  ;;  %v2903_v15 = vpop.permute.xlu0 %2902  ;;  %vm2628_vm1 = vmand %vm6321_vm4, %vm5039_vm0 }
 0x679   : > { %v2610_v9 = vcombine.low %v2606_v27, %v2607_v37  ;;  %v2649_v28 = vmul.f32 %v2647_v39, %v2643_v47  ;;  %v2874_v29 = vcombine.low %v2870_v41, %v2871_v53  ;;  %v2580_v58 = vrot.slane %v2573_v22, %v4556_v55  ;;  %v7299_v41 = vld [vmem:[#allocation47_spill] sm:$0xff]  ;;  %vm2760_vm4 = vmand %vm6414_vm5, %vm4859_vm7 }
 0x67a   : > { %v2650_v39 = vadd.f32 %v2648_v25, %v7295_v7  ;;  %v2495_v45 = vadd.f32 %v2494_v50, %v2407_v34  ;;  %v2793_v11 = vrot.slane %v2786_v62, %v4556_v55  ;;  %vm7297_vm6 = vcmp.lt.s32.totalorder %v4528_v8, 78  ;;  %vm2936_vm7 = vmand %vm6414_vm5, %vm5039_vm0 }
 0x67b   : > { %v2617_v51 = vrot.slane %v2610_v9, %v4556_v55  ;;  %v2651_v30 = vadd.f32 %v2649_v28, %v7296_v20  ;;  %v2906_v59 = vsel %vm7297_vm6, %v2903_v15, %v2905_v10  ;;  %vm7298_vm8 = vmmov %vm7297_vm6  ;;  %v2756_v48 = vrot.slane %v2749_v13, %v4556_v55  ;;  %v2949_v44 = vpop.permute.xlu1 %2948  ;;  %v7304_v13 = vld [vmem:[#allocation32_spill] sm:$0xff] }
 0x67c   : > { %v2907_v14 = vsel %vm7298_vm8, %v2905_v10, %v2903_v15  ;;  %v2912_v35 = vmul.f32 %v2911_v2, %v2906_v59  ;;  %v2538_v54 = vsel %vm2496_vm13, %v2536_v4, 0.0  ;;  %v2837_v61 = vrot.slane %v2830_v17, %v4556_v55  ;;  %v2947_v33 = vpop.permute.xlu0 %2946  ;;  %vm2716_vm13 = vmand %vm6414_vm5, %vm4889_vm10 }
 0x67d   : > { %v2624_v34 = vrot.slane %v2617_v51, %v4556_v55  ;;  %v2654_v3 = vcombine.low %v2650_v39, %v2651_v30  ;;  %v2913_v19 = vmul.f32 %v2911_v2, %v2907_v14  ;;  %v2881_v31 = vrot.slane %v2874_v29, %v4556_v55  ;;  %vm2848_vm6 = vmand %vm6414_vm5, %vm4956_vm11 }
 0x67e   : > { %v2582_v46 = vsel %vm2540_vm15, %v2580_v58, 0.0  ;;  %v2914_v2 = vadd.f32 %v2912_v35, %v7299_v41  ;;  %v2800_v22 = vrot.slane %v2793_v11, %v4556_v55  ;;  %vm7301_vm3 = vcmp.lt.s32.totalorder %v4528_v8, 77  ;;  %vm2804_vm15 = vmand %vm6414_vm5, %vm4608_vm14  ;;  %v3038_v41 = vld [vmem:[%s7305_s20 + $0x30] sm:$0xff] }
 0x67f   : > { %v2661_v24 = vrot.slane %v2654_v3, %v4556_v55  ;;  %v2915_v53 = vadd.f32 %v2913_v19, %v7300_v26  ;;  %v2626_v21 = vsel %vm2584_vm2, %v2624_v34, 0.0  ;;  %v2950_v27 = vsel %vm7301_vm3, %v2947_v33, %v2949_v44  ;;  %vm7302_vm9 = vmmov %vm7301_vm3  ;;  %v7307_v19 = vld [vmem:[#allocation79_spill] sm:$0xff] }
 0x680   : > { %v2951_v16 = vsel %vm7302_vm9, %v2949_v44, %v2947_v33  ;;  %v2956_v6 = vmul.f32 %v2955_v1, %v2950_v27  ;;  %v2539_v18 = vadd.f32 %v2538_v54, %v2451_v5  ;;  %v2583_v8 = vadd.f32 %v2582_v46, %v2495_v45  ;;  %vm2892_vm10 = vmand %vm6414_vm5, %vm5000_vm12  ;;  %v3016_v35 = vpop.permute.xlu0 %3015  ;;  %v3030_v44 = vpop.permute.xlu1 %3029  ;;  %v3010_v46 = vld [vmem:[%s7305_s20 + $0x10] sm:$0xff] }
 0x681   : > { %v2668_v37 = vrot.slane %v2661_v24, %v4556_v55  ;;  %v2918_v36 = vcombine.low %v2914_v2, %v2915_v53  ;;  %v2957_v62 = vmul.f32 %v2955_v1, %v2951_v16  ;;  %v2844_v43 = vrot.slane %v2837_v61, %v4556_v55  ;;  %v7303_v1 = vld [vmem:[#allocation48_spill] sm:$0xff]  ;;  %v3011_v24 = vld [vmem:[%s7305_s20 + $0x18] sm:$0xff] }
 0x682   : > { %v2888_v47 = vrot.slane %v2881_v31, %v4556_v55  ;;  %v2958_v25 = vadd.f32 %v2956_v6, %v7303_v1  ;;  %v2231_v5 = vadd.f32 %v6348_v12, %v7304_v13  ;;  %v2363_v4 = vadd.f32 %v6372_v38, %v6350_v23  ;;  %v3024_v61 = vld [vmem:[%s7305_s20 + $0x20] sm:$0xff]  ;;  %v3025_v31 = vld [vmem:[%s7305_s20 + $0x28] sm:$0xff]  ;;  %v3039_v2 = vld [vmem:[%s7305_s20 + $0x38] sm:$0xff] }
 0x683   : > { %v2670_v50 = vsel %vm2628_vm1, %v2668_v37, 0.0  ;;  %v2925_v9 = vrot.slane %v2918_v36, %v4556_v55  ;;  %v2959_v28 = vadd.f32 %v2957_v62, %v6211_v57  ;;  %v2627_v17 = vadd.f32 %v2626_v21, %v2539_v18  ;;  %v7310_v62 = vld [vmem:[#allocation28_spill] sm:$0xff] }
 0x684   : > { %v2671_v29 = vadd.f32 %v2670_v50, %v2583_v8  ;;  %v2758_v10 = vsel %vm2716_vm13, %v2756_v48, 0.0  ;;  %v2802_v57 = vsel %vm2760_vm4, %v2800_v22, 0.0  ;;  %v2319_v23 = vadd.f32 %v6365_v49, %v2231_v5  ;;  %v3044_v26 = vpop.permute.xlu0 %3043  ;;  %v7311_v8 = vld [vmem:[#allocation29_spill] sm:$0xff] }
 0x685   : > { %v2932_v12 = vrot.slane %v2925_v9, %v4556_v55  ;;  %v2962_v40 = vcombine.low %v2958_v25, %v2959_v28  ;;  %v2715_v38 = vadd.f32 %v6458_v0, %v2363_v4  ;;  %v2846_v56 = vsel %vm2804_vm15, %v2844_v43, 0.0 }
 0x686   : > { %v2981_v58 = vadd.f32 %v2671_v29, %v2627_v17  ;;  %v2890_v52 = vsel %vm2848_vm6, %v2888_v47, 0.0  ;;  %v2759_v7 = vadd.f32 %v2758_v10, %v2319_v23  ;;  %v2984_v11 = vstv %s2983_s8 }
 0x687   : > { %v2969_v51 = vrot.slane %v2962_v40, %v4556_v55  ;;  %v2803_v49 = vadd.f32 %v2802_v57, %v2715_v38  ;;  %v2934_v32 = vsel %vm2892_vm10, %v2932_v12, 0.0  ;;  %v2987_v42 = vstv %s3281_s1 }
 0x688   : > { %v2847_v39 = vadd.f32 %v2846_v56, %v2759_v7  ;;  %v2998_v48 = vsub.s32 0, %v7307_v19  ;;  %v3002_v54 = vsub.s32 1, %v7307_v19  ;;  %v3032_v21 = vmul.f32 %v3030_v44, %v3024_v61 }
 0x689   : > { %v2976_v0 = vrot.slane %v2969_v51, %v4556_v55  ;;  %v2891_v20 = vadd.f32 %v2890_v52, %v2803_v49  ;;  %v3033_v27 = vmul.f32 %v3030_v44, %v3025_v31  ;;  %v3018_v16 = vmul.f32 %v3016_v35, %v3010_v46 }
 0x68a   : > { %v2935_v30 = vadd.f32 %v2934_v32, %v2847_v39  ;;  %v3019_v37 = vmul.f32 %v3016_v35, %v3011_v24  ;;  %v3046_v36 = vmul.f32 %v3044_v26, %v3038_v41  ;;  %v3047_v6 = vmul.f32 %v3044_v26, %v3039_v2 }
 0x68b   : > { %v2978_v60 = vsel %vm2936_vm7, %v2976_v0, 0.0 }
 0x68c   : > { %v2979_v15 = vadd.f32 %v2978_v60, %v2891_v20 }
 0x68e   : > { %v2980_v45 = vadd.f32 %v2979_v15, %v2935_v30 }
 0x690   : > { %v2982_v59 = vadd.f32 %v2981_v58, %v2980_v45 }
 0x692   : > { %v2985_v63 = vmul.f32 %v2984_v11, %v2982_v59 }
 0x694   : > { %v2988_v14 = vadd.f32 %v2987_v42, %v2985_v63 }
 0x696   : > { %v3282_v34 = vmul.f32 -1.442695, %v2988_v14 }
 0x698   : > { %3476 = vpow2.f32 %v3282_v34 }
 0x6a2   : > { %v3477_v55 = vpop.eup %3476 }
 0x6a3   : > { %v2992_v3 = vadd.f32 1.0, %v3477_v55 }
 0x6a5   : > { %3478 = vrcp.f32 %v2992_v3 }
 0x6af   : > { %v3479_v53 = vpop.eup %3478 }
 0x6b0   : > { %v2999_v33 = vrot.slane %v3479_v53, %v2998_v48  ;;  %v3003_v22 = vrot.slane %v3479_v53, %v3002_v54 }
 0x6b2   : > { %v3006_v18 = vmul.f32 %v2999_v33, %v7310_v62  ;;  %v3007_v43 = vmul.f32 %v3003_v22, %v7311_v8  ;;  %v3034_v47 = vmul.f32 %v3032_v21, %v2999_v33  ;;  %v3035_v50 = vmul.f32 %v3033_v27, %v3003_v22 }
 0x6b3   : > { %v3020_v9 = vmul.f32 %v3018_v16, %v2999_v33  ;;  %v3021_v1 = vmul.f32 %v3019_v37, %v3003_v22  ;;  %v3048_v25 = vmul.f32 %v3046_v36, %v2999_v33  ;;  %v3049_v28 = vmul.f32 %v3047_v6, %v3003_v22 }
 0x6b4   : > { %3008 = vst [vmem:[%s377_s13] sm:$0xff] %v3006_v18  ;;  %3009 = vst [vmem:[%s377_s13 + $0x8] sm:$0xff] %v3007_v43 }
 0x6b5   : > { %3036 = vst [vmem:[%s377_s13 + $0x20] sm:$0xff] %v3034_v47  ;;  %3037 = vst [vmem:[%s377_s13 + $0x28] sm:$0xff] %v3035_v50 }
 0x6b6   : > { %3022 = vst [vmem:[%s377_s13 + $0x10] sm:$0xff] %v3020_v9  ;;  %3023 = vst [vmem:[%s377_s13 + $0x18] sm:$0xff] %v3021_v1 }
 0x6b7   : > { %3050 = vst [vmem:[%s377_s13 + $0x30] sm:$0xff] %v3048_v25  ;;  %3051 = vst [vmem:[%s377_s13 + $0x38] sm:$0xff] %v3049_v28 }
 0x6b8   : > { %3554 = shalt.err (!%p3551_p7)
}
 0x6b9   : > { %s3555_s17 = scalar_lea.hbm %s6599_s5, 1024  ;;  %s3559_s21 = scalar_lea.hbm %s7312_s26, 2048 }
 0x6ba   : > { %p3556_p11 = scmp.ne.s32.totalorder %s6599_s5, %s3555_s17  ;;  %p3560_p3 = scmp.lt.u32.totalorder %s6599_s5, %s7312_s26 }
 0x6bb   : > { %p3561_p9 = scmp.lt.u32.totalorder %s3559_s21, %s3555_s17  ;;  %p3563_p5 = scmp.lt.u32.totalorder %s3555_s17, %s6599_s5 }
 0x6bc   : > { %p3557_p13 = pnand %p3556_p11, %p7314_p2 }
 0x6bd   : > { %p3562_p1 = por %p3561_p9, %p3560_p3 }
 0x6be   : > { %p3558_p6 = pneg %p3557_p13 }
 0x6bf   : > { %p3564_p8 = por %p3563_p5, %p3562_p1 }
 0x6c1   : > { %p3565_p10 = pnand %p3564_p8, %p3558_p6 }
 0x6c3   : > { %3568 = shalt.err (!%p3565_p10)
}
 0x6c4   : > { %s3676_s29 = smov 256   ;;  %s7315_s3 = smov 16  }
 0x6c5   : > { %3335 = dma.vmem_to_hbm [thread:$0]  (%p7314_p2), %s6601_s12, 1024, %s6599_s5, %s3053_s24, %s3676_s29, %s3676_s29, %s7315_s3  }
 0x6c6 PF: > { %s7316_s11 = sld [smem:[#allocation17_spill]]  ;;  %s7317_s28 = sld [smem:[#allocation25_spill]] }
 0x6c7   : > { %s7318_s22 = sld [smem:[#allocation20_spill]] }
 0x6cc   : > { %s3081_s14 = sand.u32 1, %s7316_s11   ;;  %p7319_p4 = scmp.ne.s32.totalorder %s7317_s28, 0 }
 0x6cd   : > { %p7320_p12 = scmp.ge.s32.totalorder %s7318_s22, 2  ;;  %s3082_s8 = scalar_lea.sflag [#allocation7], %s3081_s14 }
 0x6cf   : > { %p3349_p0 = pnand %p7320_p12, %p7319_p4 }
 0x6d1   : > { %3598 = dma.done.wait (!%p3349_p0), %s3082_s8, 1024  }
 0x6d2   : > { %3600 = vsyncadd (!%p3349_p0), %s3082_s8, 4294966272  ;;  %s7321_s12 = sld [smem:[#allocation22_spill]]  ;;  %s7322_s30 = sld [smem:[#allocation18_spill]] }
 0x6d3   : > { %s7323_s10 = sld [smem:[#allocation19_spill]]  ;;  %s7324_s11 = sld [smem:[#allocation23_spill]] }
 0x6d8   : > { %p24_p7 = scmp.ge.s32.totalorder %s7321_s12, 4  }
 0x6da   :  { %26 = sbr.rel (!%p24_p7) target bundleno = 18 (0x12), region = 110 }
 0x6e1   :  { %3087 = vsyncpa [#allocation6], 1 }
 0x6e2   :  { %3089 = vsyncpa [#allocation6 + $0x1], 1 }
 0x6e3   :  { %3090 = vsyncpa [#allocation7], 1 }
 0x6e4   :  { %3092 = vsyncpa [#allocation7 + $0x1], 1 }
 0x6e5   :  { %3093 = vsyncpa [#allocation8], 1 }
 0x6e6   :  { %3095 = vsyncpa [#allocation8 + $0x1], 1 }
 0x6e7   :  { %3096 = vsyncpa [#allocation11], 1 }

</bundles_post_ra>
